<compile_context>
chip_gen: v7x
topology: tpu7x:2x2x1
jax: 0.10.0
libtpu: 0.0.40
codegen_flags: <defaults>
</compile_context>

<pallas_src>
import math
from functools import partial

import numpy as np

import jax
import jax.numpy as jnp
from jax.experimental import pallas as pl
from jax.experimental.pallas import tpu as pltpu

NUM_BLOCKS = 4
NB_PAD = 128          # ring-mask columns padded to a full lane group


# ---------------------------------------------------------------------------
# Fused kernel: MXU ring pooling + per-block ClassBlock, K-accumulated over
# channel tiles.  Grid = (batch_tiles [parallel], channel_tiles [arbitrary]).
# ---------------------------------------------------------------------------
def _lpn_fused_kernel(x_ref, m_ref, w1_ref, b1_ref, w2_ref, b2_ref, o_ref,
                      acc_ref, *, nb):
    ci = pl.program_id(1)

    @pl.when(ci == 0)
    def _init():
        acc_ref[...] = jnp.zeros_like(acc_ref)

    bt, ct, s = x_ref.shape

    # ---- ring sums on this (batch, channel) tile via a 0/1 mask matmul ------
    # x tile stays in its HBM dtype (bf16 preferred); f32 accumulation on MXU.
    x2 = x_ref[...].reshape(bt * ct, s)                        # free reshape
    pooled = jnp.dot(x2, m_ref[...],
                     preferred_element_type=jnp.float32)       # (bt*ct, NB_PAD)
    pooled = pooled.reshape(bt, ct, -1)
    # Tiny relayout so channels land on lanes for the classifier matmul.
    pooled_t = jnp.transpose(pooled, (0, 2, 1))                # (bt, NB_PAD, ct)

    # ---- first Linear of every ClassBlock, accumulated over channel tiles ---
    # torch builds the pooled tensor with result.insert(0, ...); the mask
    # columns were already reordered so column k feeds classifier k directly.
    # 1/ring-area and eval-BN are folded into W1'.
    for k in range(nb):
        v = pooled_t[:, k, :].astype(w1_ref.dtype)             # (bt, ct)
        acc_ref[k] += jnp.dot(v, w1_ref[k],
                              preferred_element_type=jnp.float32)

    # ---- epilogue: folded BN/bias + second Linear, lane-dense store ---------
    @pl.when(ci == pl.num_programs(1) - 1)
    def _finalize():
        for k in range(nb):
            h = acc_ref[k] + b1_ref[k]          # BN(eval) folded into W1'/b1'
            # Dropout(p=0.5) is identity in eval mode.
            logits = jnp.dot(h.astype(w2_ref.dtype), w2_ref[k],
                             preferred_element_type=jnp.float32) + b2_ref[k]
            o_ref[:, k, :] = logits.astype(o_ref.dtype)


# ---------------------------------------------------------------------------
# Host-side ring masks: literal transcription of get_part_pool('avg',
# no_overlap=True), including torch's quirky F.pad argument order and the
# odd-H/W 'ep' re-padding path for the outermost ring.
# ---------------------------------------------------------------------------
def build_ring_masks(H, W, num_blocks):
    c_h, c_w = H // 2, W // 2
    per_h = math.floor(H / (2 * num_blocks))
    per_w = math.floor(W / (2 * num_blocks))
    if per_h < 1 or per_w < 1:
        # TODO(synk): bilinear-interpolate branch of get_part_pool (per_h < 1).
        raise NotImplementedError("feature map smaller than 2*num_blocks")

    masks = np.zeros((num_blocks, H, W), np.float32)
    divisors = np.zeros((num_blocks,), np.float32)
    for i in range(1, num_blocks + 1):
        cur = np.zeros((H, W), np.float32)
        if i < num_blocks:
            cur[c_h - i * per_h:c_h + i * per_h,
                c_w - i * per_w:c_w + i * per_w] = 1.0
            if i > 1:
                # torch: x_curr -= F.pad(x_pre, (per_h, per_h, per_w, per_w))
                #   -> W (cols) padded by per_h, H (rows) by per_w (quirky order)
                pre_h, pre_w = 2 * (i - 1) * per_h, 2 * (i - 1) * per_w
                if (pre_h + 2 * per_w, pre_w + 2 * per_h) != (2 * i * per_h,
                                                              2 * i * per_w):
                    raise NotImplementedError(
                        "per_h != per_w: the torch forward raises a shape "
                        "mismatch here; not supported")
                r0 = c_h - i * per_h + per_w
                c0 = c_w - i * per_w + per_h
                cur[r0:r0 + pre_h, c0:c0 + pre_w] -= 1.0
            divisors[i - 1] = float((2 * i * per_h) * (2 * i * per_w))
        else:
            cur[:, :] = 1.0
            if i > 1:
                pre_h, pre_w = 2 * (i - 1) * per_h, 2 * (i - 1) * per_w
                pad_h = c_h - (i - 1) * per_h      # torch pads W (cols) with this
                pad_w = c_w - (i - 1) * per_w      # torch pads H (rows) with this
                ep = 0 if (pre_h + 2 * pad_h == H) else H - (pre_h + 2 * pad_h)
                if (pre_h + 2 * pad_w + ep, pre_w + 2 * pad_h + ep) != (H, W):
                    raise NotImplementedError(
                        "non-square padding: the torch forward raises a shape "
                        "mismatch here; not supported")
                r0 = pad_w + ep
                c0 = pad_h + ep
                cur[r0:r0 + pre_h, c0:c0 + pre_w] -= 1.0
            divisors[i - 1] = float(H * W)
        masks[i - 1] = cur
    return masks, divisors


# ---------------------------------------------------------------------------
# Parameter preparation (offline folding / padding / bf16 cast)
# ---------------------------------------------------------------------------
def prepare_lpn_params(raw, H, W, num_blocks, *, eps=1e-5, lane=128):
    """Fold eval-mode BatchNorm1d and the per-ring 1/area scale into the first
    Linear (in f32, single bf16 cast), build the 0/1 ring-membership mask
    (ordered per classifier), and pad num_classes to a lane-dense multiple."""
    nb = num_blocks
    masks, divisors = build_ring_masks(H, W, nb)
    S = H * W

    # torch: result.insert(0, ...) -> classifier k consumes ring (nb - 1 - k)
    m = np.zeros((S, NB_PAD), np.float32)
    inv_area = np.zeros((nb, 1, 1), np.float32)
    for k in range(nb):
        ring = nb - 1 - k
        m[:, k] = masks[ring].reshape(-1)
        inv_area[k, 0, 0] = 1.0 / divisors[ring]
    mask = jnp.asarray(m, jnp.bfloat16)              # 0/1 -> exact in bf16

    w1, b1 = raw["w1"], raw["b1"]
    gamma, beta = raw["gamma"], raw["beta"]
    mean, var = raw["running_mean"], raw["running_var"]
    w2, b2 = raw["w2"], raw["b2"]

    scale = gamma / jnp.sqrt(var + eps)                              # (nb,1,bot)
    w1f = (w1 * scale * jnp.asarray(inv_area)).astype(jnp.bfloat16)  # (nb,C,bot)
    b1f = ((b1 - mean) * scale + beta).astype(jnp.float32)           # (nb,1,bot)

    nc = w2.shape[-1]
    ncp = ((nc + lane - 1) // lane) * lane
    pad = ncp - nc
    w2p = jnp.pad(w2, ((0, 0), (0, 0), (0, pad))).astype(jnp.bfloat16)
    b2p = jnp.pad(b2, ((0, 0), (0, 0), (0, pad))).astype(jnp.float32)
    return dict(mask=mask, w1=w1f, b1=b1f, w2=w2p, b2=b2p,
                num_classes=int(nc), H=int(H), W=int(W), num_blocks=nb)


# ---------------------------------------------------------------------------
# Generation-aware tiling helpers
# ---------------------------------------------------------------------------
def _vmem_capacity_bytes(default=64 << 20):
    try:
        cap = getattr(pltpu.get_tpu_info(), "vmem_capacity_bytes", None)
        if cap:
            return int(cap)
    except Exception:
        pass
    return default          # conservative: correct on v5e/v6e/v7x


def _pick_c_tile(C, S, bot, ncp, nb, nbp, x_bytes, b_tile, vmem_cap):
    budget = int(0.60 * vmem_cap)
    # conservative: residents counted double-buffered in case Buffered(1) is
    # unavailable and the fallback spec is used.
    resident = (2 * (S * nbp * 2 + nb * bot * 4 + nb * bot * ncp * 2 + nb * ncp * 4)
                + 2 * b_tile * nb * ncp * 4          # resident output block
                + nb * b_tile * bot * 4)             # accumulator scratch
    cands = [c for c in (2048, 1024, 512, 256, 128) if c <= C and C % c == 0]
    if not cands:
        cands = [C]
    for ct in cands:
        streamed = (2 * b_tile * ct * S * x_bytes    # x tile, double-buffered
                    + 2 * nb * ct * bot * 2          # W1' tile, double-buffered
                    + b_tile * ct * S * x_bytes      # in-kernel x value / spill
                    + b_tile * ct * nbp * 4)         # pooled f32 temporaries
        if resident + streamed <= budget:
            return ct
    raise ValueError(
        f"no channel tile of C={C} fits the ~{budget >> 20} MiB VMEM budget; "
        "reduce the batch tile or feature-map size")


# ---------------------------------------------------------------------------
# Wrapper
# ---------------------------------------------------------------------------
def lpn_forward(x, params, *, input_format=None, feature_dim=None,
                c_tile=None, batch_tiles=None, pool="avg"):
    if pool != "avg":
        # TODO(synk): pool='max' and 'avg+max' variants of get_part_pool.
        raise NotImplementedError("only pool='avg' is implemented")
    if x.ndim < 4:
        # TODO(synk): the len(x.shape)<4 (token sequence -> square map) branch.
        raise NotImplementedError("rank-3 token input not implemented")

    # torch sniffs channels-last via x.shape[-1]==feature_dim; allow an explicit
    # override.  NCHW (the canonical torch path) needs NO transpose here.
    if input_format is None:
        input_format = ("NHWC" if (feature_dim is not None
                                   and x.shape[-1] == feature_dim) else "NCHW")
    if input_format == "NHWC":
        x = jnp.transpose(x, (0, 3, 1, 2))   # what torch's permute(0,3,1,2) does
    elif input_format != "NCHW":
        raise ValueError(f"unknown input_format {input_format!r}")

    B, C, H, W = x.shape
    nb = params["num_blocks"]
    assert (H, W) == (params["H"], params["W"]), \
        "params were prepared for a different feature-map size"
    S = H * W
    # contiguous-dim merge: free, keeps x in its HBM dtype (bf16 recommended)
    x3 = x.reshape(B, C, S)

    mask, w1, b1, w2, b2 = (params[k] for k in ("mask", "w1", "b1", "w2", "b2"))
    nc = int(params["num_classes"])
    bot = w1.shape[-1]
    ncp = w2.shape[-1]
    nbp = mask.shape[-1]
    assert w1.shape == (nb, C, bot) and mask.shape[0] == S

    # batch tiling: parallel grid axis (used by v7x's 2 TCs; harmless elsewhere)
    if batch_tiles is None:
        batch_tiles = 2 if (B % 2 == 0 and B >= 2) else 1
    assert B % batch_tiles == 0, (B, batch_tiles)
    b_tile = B // batch_tiles

    vmem_cap = _vmem_capacity_bytes()
    x_bytes = jnp.dtype(x.dtype).itemsize
    if c_tile is None:
        c_tile = _pick_c_tile(C, S, bot, ncp, nb, nbp, x_bytes, b_tile, vmem_cap)
    assert C % c_tile == 0, (C, c_tile)
    n_ct = C // c_tile
    vmem_limit = max(32 << 20, int(0.75 * vmem_cap))

    kernel = partial(_lpn_fused_kernel, nb=nb)
    out_shape = jax.ShapeDtypeStruct((B, nb, ncp), jnp.float32)

    def build(single_buffer_residents):
        def res(shape, idx):
            if single_buffer_residents:
                return pl.BlockSpec(shape, idx, pipeline_mode=pl.Buffered(1))
            return pl.BlockSpec(shape, idx)

        in_specs = [
            pl.BlockSpec((b_tile, c_tile, S), lambda bi, ci: (bi, ci, 0)),  # x
            res((S, nbp), lambda bi, ci: (0, 0)),                           # mask
            pl.BlockSpec((nb, c_tile, bot), lambda bi, ci: (0, ci, 0)),     # W1'
            res((nb, 1, bot), lambda bi, ci: (0, 0, 0)),                    # b1'
            res((nb, bot, ncp), lambda bi, ci: (0, 0, 0)),                  # W2
            res((nb, 1, ncp), lambda bi, ci: (0, 0, 0)),                    # b2
        ]
        out_specs = pl.BlockSpec((b_tile, nb, ncp), lambda bi, ci: (bi, 0, 0))
        return pl.pallas_call(
            kernel,
            out_shape=out_shape,
            grid=(batch_tiles, n_ct),
            in_specs=in_specs,
            out_specs=out_specs,
            scratch_shapes=[pltpu.VMEM((nb, b_tile, bot), jnp.float32)],
            compiler_params=pltpu.CompilerParams(
                # batch axis is independent (megacore-shardable); the channel
                # axis is the classifier K-reduction, so it must be arbitrary.
                dimension_semantics=("parallel", "arbitrary"),
                vmem_limit_bytes=vmem_limit,
            ),
        )

    args = (x3, mask, w1, b1, w2, b2)
    try:
        out = build(True)(*args)       # single-buffered residents
    except Exception:
        out = build(False)(*args)      # fallback: default double buffering

    # matches torch.stack(y, dim=2) in eval mode: (B, num_classes, num_blocks)
    return jnp.transpose(out[:, :, :nc], (0, 2, 1))


# ---------------------------------------------------------------------------
# Deterministic synthetic parameters (mirrors ClassBlock shapes, eval BN stats)
# ---------------------------------------------------------------------------
def init_params(key, feature_dim, num_classes, num_blocks, bottleneck):
    ks = jax.random.split(key, 8)
    w1 = 0.05 * jax.random.normal(ks[0], (num_blocks, feature_dim, bottleneck), jnp.float32)
    b1 = 0.05 * jax.random.normal(ks[1], (num_blocks, 1, bottleneck), jnp.float32)
    gamma = 1.0 + 0.02 * jax.random.normal(ks[2], (num_blocks, 1, bottleneck), jnp.float32)
    beta = 0.02 * jax.random.normal(ks[3], (num_blocks, 1, bottleneck), jnp.float32)
    running_mean = 0.01 * jax.random.normal(ks[4], (num_blocks, 1, bottleneck), jnp.float32)
    running_var = 1.0 + 0.05 * jax.random.uniform(ks[5], (num_blocks, 1, bottleneck), jnp.float32)
    w2 = 0.05 * jax.random.normal(ks[6], (num_blocks, bottleneck, num_classes), jnp.float32)
    b2 = 0.05 * jax.random.normal(ks[7], (num_blocks, 1, num_classes), jnp.float32)
    return dict(w1=w1, b1=b1, gamma=gamma, beta=beta, running_mean=running_mean,
                running_var=running_var, w2=w2, b2=b2)


# ---------------------------------------------------------------------------
# Pure-JAX reference mirroring the PyTorch forward literally (eval mode,
# pad-and-subtract pooling + unfused Linear/BN/Linear on f32 raw params)
# ---------------------------------------------------------------------------
def ref_forward(x_nchw, raw, num_blocks, eps=1e-5):
    x = x_nchw.astype(jnp.float32)
    B, C, H, W = x.shape
    c_h, c_w = int(H / 2), int(W / 2)
    per_h = math.floor(H / (2 * num_blocks))
    per_w = math.floor(W / (2 * num_blocks))
    result = []
    for i in range(1, num_blocks + 1):
        if i < num_blocks:
            x_curr = x[:, :, c_h - i * per_h:c_h + i * per_h,
                             c_w - i * per_w:c_w + i * per_w]
            if i > 1:
                x_pre = x[:, :, c_h - (i - 1) * per_h:c_h + (i - 1) * per_h,
                                c_w - (i - 1) * per_w:c_w + (i - 1) * per_w]
                # F.pad(x_pre, (per_h, per_h, per_w, per_w)): W padded by per_h,
                # H padded by per_w (torch's quirky order, kept verbatim).
                x_pad = jnp.pad(x_pre, ((0, 0), (0, 0),
                                        (per_w, per_w), (per_h, per_h)))
                x_curr = x_curr - x_pad
            result.insert(0, x_curr.mean(axis=(2, 3)))
        else:
            if i > 1:
                x_pre = x[:, :, c_h - (i - 1) * per_h:c_h + (i - 1) * per_h,
                                c_w - (i - 1) * per_w:c_w + (i - 1) * per_w]
                pad_h = c_h - (i - 1) * per_h
                pad_w = c_w - (i - 1) * per_w
                if x_pre.shape[2] + 2 * pad_h == H:
                    x_pad = jnp.pad(x_pre, ((0, 0), (0, 0),
                                            (pad_w, pad_w), (pad_h, pad_h)))
                else:
                    ep = H - (x_pre.shape[2] + 2 * pad_h)
                    x_pad = jnp.pad(x_pre, ((0, 0), (0, 0),
                                            (pad_w + ep, pad_w), (pad_h + ep, pad_h)))
                xs = x - x_pad
            else:
                xs = x
            result.insert(0, xs.mean(axis=(2, 3)))
        del i
    pooled = jnp.stack(result, axis=2)                       # (B, C, nb)

    scale = raw["gamma"] / jnp.sqrt(raw["running_var"] + eps)
    ys = []
    for k in range(num_blocks):
        v = pooled[:, :, k]
        h = v @ raw["w1"][k] + raw["b1"][k]
        h = (h - raw["running_mean"][k]) * scale[k] + raw["beta"][k]
        ys.append(h @ raw["w2"][k] + raw["b2"][k])
    return jnp.stack(ys, axis=2)                             # (B, nc, nb)


if __name__ == "__main__":
    B, FEAT, H, W = 2, 256, 16, 16          # small feature_dim stand-in for 2048
    NUM_CLASSES, BOTTLENECK = 8, 128
    key = jax.random.PRNGKey(0)
    kx, kp = jax.random.split(key)

    x_f32 = jax.random.normal(kx, (B, FEAT, H, W), jnp.float32)   # NCHW like PyTorch
    raw = init_params(kp, FEAT, NUM_CLASSES, NUM_BLOCKS, BOTTLENECK)
    params = prepare_lpn_params(raw, H, W, NUM_BLOCKS)

    # feature map kept bf16 in HBM (halves the dominant HBM read)
    x_bf16 = x_f32.astype(jnp.bfloat16)

    # c_tile=128 -> 2 channel tiles (exercises the K-accumulation); batch auto-
    # splits into 2 parallel tiles, exercising the 2-D grid.
    y = lpn_forward(x_bf16, params, input_format="NCHW", c_tile=128)
    y = jax.block_until_ready(y)

    # reference consumes the same bf16-rounded feature map, f32 everywhere else
    y_ref = ref_forward(x_bf16.astype(jnp.float32), raw, NUM_BLOCKS)
    assert y.shape == (B, NUM_CLASSES, NUM_BLOCKS), y.shape
    max_err = float(jnp.max(jnp.abs(y - y_ref)))
    # kernel uses bf16 weights/activations on the MXU (f32 accumulation)
    assert jnp.allclose(y, y_ref, atol=2e-2, rtol=2e-2), max_err

    print("KERNEL_OK")
</pallas_src>

<mosaic_0001>
module attributes {stable_mosaic.version = 11 : i64} {
  func.func @_lpn_fused_kernel(%arg0: i32, %arg1: i32, %arg2: memref<1x128x256xbf16, #tpu.memory_space<vmem>>, %arg3: memref<256x128xbf16, #tpu.memory_space<vmem>>, %arg4: memref<4x128x128xbf16, #tpu.memory_space<vmem>>, %arg5: memref<4x1x128xf32, #tpu.memory_space<vmem>>, %arg6: memref<4x128x128xbf16, #tpu.memory_space<vmem>>, %arg7: memref<4x1x128xf32, #tpu.memory_space<vmem>>, %arg8: memref<1x4x128xf32, #tpu.memory_space<vmem>>, %arg9: memref<4x1x128xf32, #tpu.memory_space<vmem>>) attributes {dimension_semantics = [#tpu.dimension_semantics<parallel>, #tpu.dimension_semantics<arbitrary>], iteration_bounds = array<i64: 2, 2>, scalar_prefetch = 0 : i64, scratch_operands = 1 : i64, tpu.core_type = #tpu.core_type<tc>, window_params = [{transform_indices = @transform_0, window_bounds = array<i64: 1, 128, 256>}, {pipeline_mode = #tpu.pipeline_mode<synchronous>, transform_indices = @transform_1, window_bounds = array<i64: 256, 128>}, {transform_indices = @transform_2, window_bounds = array<i64: 4, 128, 128>}, {pipeline_mode = #tpu.pipeline_mode<synchronous>, transform_indices = @transform_3, window_bounds = array<i64: 4, 1, 128>}, {pipeline_mode = #tpu.pipeline_mode<synchronous>, transform_indices = @transform_4, window_bounds = array<i64: 4, 128, 128>}, {pipeline_mode = #tpu.pipeline_mode<synchronous>, transform_indices = @transform_5, window_bounds = array<i64: 4, 1, 128>}, {transform_indices = @transform_6, window_bounds = array<i64: 1, 4, 128>}]} {
    %c0_i32 = arith.constant 0 : i32
    %0 = arith.cmpi eq, %arg1, %c0_i32 : i32
    %1 = arith.extui %0 : i1 to i32
    %c0_i32_0 = arith.constant 0 : i32
    %2 = arith.cmpi ne, %1, %c0_i32_0 : i32
    scf.if %2 {
      %cst_43 = arith.constant 0.000000e+00 : f32
      %60 = vector.broadcast %cst_43 : f32 to vector<4x1x128xf32>
      %c0_44 = arith.constant 0 : index
      %c0_45 = arith.constant 0 : index
      %c0_46 = arith.constant 0 : index
      %61 = vector.load %arg9[%c0_44, %c0_45, %c0_46] : memref<4x1x128xf32, #tpu.memory_space<vmem>>, vector<4x1x128xf32>
      tpu.vector_store %arg9[%c0_44, %c0_45, %c0_46], %60 {strides = array<i32>} : memref<4x1x128xf32, #tpu.memory_space<vmem>>, vector<4x1x128xf32>,
    } else {
    }
    %c0 = arith.constant 0 : index
    %c0_1 = arith.constant 0 : index
    %c0_2 = arith.constant 0 : index
    %3 = vector.load %arg2[%c0, %c0_1, %c0_2] : memref<1x128x256xbf16, #tpu.memory_space<vmem>>, vector<1x128x256xbf16>
    %4 = vector.shape_cast %3 : vector<1x128x256xbf16> to vector<128x256xbf16>
    %c0_3 = arith.constant 0 : index
    %c0_4 = arith.constant 0 : index
    %5 = vector.load %arg3[%c0_3, %c0_4] : memref<256x128xbf16, #tpu.memory_space<vmem>>, vector<256x128xbf16>
    %cst = arith.constant dense<0.000000e+00> : vector<128x128xf32>
    %6 = tpu.matmul %4, %5, %cst {dimension_numbers = #tpu.dot_dimension_numbers<[1], [0], [0], [1], [0, 0, 1, 1], [], []>} : vector<128x256xbf16>, vector<256x128xbf16>, vector<128x128xf32> -> vector<128x128xf32>
    %7 = vector.shape_cast %6 : vector<128x128xf32> to vector<1x128x128xf32>
    %8 = tpu.transpose %7, [0, 2, 1] : vector<1x128x128xf32> -> vector<1x128x128xf32>
    %9 = vector.extract_strided_slice %8 {offsets = [0, 0, 0], sizes = [1, 1, 128], strides = [1, 1, 1]} : vector<1x128x128xf32> to vector<1x1x128xf32>
    %10 = vector.shape_cast %9 : vector<1x1x128xf32> to vector<1x128xf32>
    %11 = arith.truncf %10 : vector<1x128xf32> to vector<1x128xbf16>
    %c0_5 = arith.constant 0 : index
    %c0_6 = arith.constant 0 : index
    %c0_7 = arith.constant 0 : index
    %12 = vector.load %arg9[%c0_5, %c0_6, %c0_7] : memref<4x1x128xf32, #tpu.memory_space<vmem>>, vector<1x1x128xf32>
    %13 = vector.shape_cast %12 : vector<1x1x128xf32> to vector<1x128xf32>
    %c0_8 = arith.constant 0 : index
    %c0_9 = arith.constant 0 : index
    %c0_10 = arith.constant 0 : index
    %14 = vector.load %arg4[%c0_8, %c0_9, %c0_10] : memref<4x128x128xbf16, #tpu.memory_space<vmem>>, vector<1x128x128xbf16>
    %15 = vector.shape_cast %14 : vector<1x128x128xbf16> to vector<128x128xbf16>
    %cst_11 = arith.constant dense<0.000000e+00> : vector<1x128xf32>
    %16 = tpu.matmul %11, %15, %cst_11 {dimension_numbers = #tpu.dot_dimension_numbers<[1], [0], [0], [1], [0, 0, 1, 1], [], []>} : vector<1x128xbf16>, vector<128x128xbf16>, vector<1x128xf32> -> vector<1x128xf32>
    %17 = arith.addf %13, %16 : vector<1x128xf32>
    %c0_12 = arith.constant 0 : index
    %c0_13 = arith.constant 0 : index
    %c0_14 = arith.constant 0 : index
    %18 = vector.load %arg9[%c0_12, %c0_13, %c0_14] : memref<4x1x128xf32, #tpu.memory_space<vmem>>, vector<1x1x128xf32>
    %19 = vector.shape_cast %18 : vector<1x1x128xf32> to vector<1x128xf32>
    %20 = vector.shape_cast %17 : vector<1x128xf32> to vector<1x1x128xf32>
    tpu.vector_store %arg9[%c0_12, %c0_13, %c0_14], %20 {strides = array<i32>} : memref<4x1x128xf32, #tpu.memory_space<vmem>>, vector<1x1x128xf32>,
    %21 = vector.extract_strided_slice %8 {offsets = [0, 1, 0], sizes = [1, 1, 128], strides = [1, 1, 1]} : vector<1x128x128xf32> to vector<1x1x128xf32>
    %22 = vector.shape_cast %21 : vector<1x1x128xf32> to vector<1x128xf32>
    %23 = arith.truncf %22 : vector<1x128xf32> to vector<1x128xbf16>
    %c1 = arith.constant 1 : index
    %c0_15 = arith.constant 0 : index
    %c0_16 = arith.constant 0 : index
    %24 = vector.load %arg9[%c1, %c0_15, %c0_16] : memref<4x1x128xf32, #tpu.memory_space<vmem>>, vector<1x1x128xf32>
    %25 = vector.shape_cast %24 : vector<1x1x128xf32> to vector<1x128xf32>
    %c1_17 = arith.constant 1 : index
    %c0_18 = arith.constant 0 : index
    %c0_19 = arith.constant 0 : index
    %26 = vector.load %arg4[%c1_17, %c0_18, %c0_19] : memref<4x128x128xbf16, #tpu.memory_space<vmem>>, vector<1x128x128xbf16>
    %27 = vector.shape_cast %26 : vector<1x128x128xbf16> to vector<128x128xbf16>
    %cst_20 = arith.constant dense<0.000000e+00> : vector<1x128xf32>
    %28 = tpu.matmul %23, %27, %cst_20 {dimension_numbers = #tpu.dot_dimension_numbers<[1], [0], [0], [1], [0, 0, 1, 1], [], []>} : vector<1x128xbf16>, vector<128x128xbf16>, vector<1x128xf32> -> vector<1x128xf32>
    %29 = arith.addf %25, %28 : vector<1x128xf32>
    %c1_21 = arith.constant 1 : index
    %c0_22 = arith.constant 0 : index
    %c0_23 = arith.constant 0 : index
    %30 = vector.load %arg9[%c1_21, %c0_22, %c0_23] : memref<4x1x128xf32, #tpu.memory_space<vmem>>, vector<1x1x128xf32>
    %31 = vector.shape_cast %30 : vector<1x1x128xf32> to vector<1x128xf32>
    %32 = vector.shape_cast %29 : vector<1x128xf32> to vector<1x1x128xf32>
    tpu.vector_store %arg9[%c1_21, %c0_22, %c0_23], %32 {strides = array<i32>} : memref<4x1x128xf32, #tpu.memory_space<vmem>>, vector<1x1x128xf32>,
    %33 = vector.extract_strided_slice %8 {offsets = [0, 2, 0], sizes = [1, 1, 128], strides = [1, 1, 1]} : vector<1x128x128xf32> to vector<1x1x128xf32>
    %34 = vector.shape_cast %33 : vector<1x1x128xf32> to vector<1x128xf32>
    %35 = arith.truncf %34 : vector<1x128xf32> to vector<1x128xbf16>
    %c2 = arith.constant 2 : index
    %c0_24 = arith.constant 0 : index
    %c0_25 = arith.constant 0 : index
    %36 = vector.load %arg9[%c2, %c0_24, %c0_25] : memref<4x1x128xf32, #tpu.memory_space<vmem>>, vector<1x1x128xf32>
    %37 = vector.shape_cast %36 : vector<1x1x128xf32> to vector<1x128xf32>
    %c2_26 = arith.constant 2 : index
    %c0_27 = arith.constant 0 : index
    %c0_28 = arith.constant 0 : index
    %38 = vector.load %arg4[%c2_26, %c0_27, %c0_28] : memref<4x128x128xbf16, #tpu.memory_space<vmem>>, vector<1x128x128xbf16>
    %39 = vector.shape_cast %38 : vector<1x128x128xbf16> to vector<128x128xbf16>
    %cst_29 = arith.constant dense<0.000000e+00> : vector<1x128xf32>
    %40 = tpu.matmul %35, %39, %cst_29 {dimension_numbers = #tpu.dot_dimension_numbers<[1], [0], [0], [1], [0, 0, 1, 1], [], []>} : vector<1x128xbf16>, vector<128x128xbf16>, vector<1x128xf32> -> vector<1x128xf32>
    %41 = arith.addf %37, %40 : vector<1x128xf32>
    %c2_30 = arith.constant 2 : index
    %c0_31 = arith.constant 0 : index
    %c0_32 = arith.constant 0 : index
    %42 = vector.load %arg9[%c2_30, %c0_31, %c0_32] : memref<4x1x128xf32, #tpu.memory_space<vmem>>, vector<1x1x128xf32>
    %43 = vector.shape_cast %42 : vector<1x1x128xf32> to vector<1x128xf32>
    %44 = vector.shape_cast %41 : vector<1x128xf32> to vector<1x1x128xf32>
    tpu.vector_store %arg9[%c2_30, %c0_31, %c0_32], %44 {strides = array<i32>} : memref<4x1x128xf32, #tpu.memory_space<vmem>>, vector<1x1x128xf32>,
    %45 = vector.extract_strided_slice %8 {offsets = [0, 3, 0], sizes = [1, 1, 128], strides = [1, 1, 1]} : vector<1x128x128xf32> to vector<1x1x128xf32>
    %46 = vector.shape_cast %45 : vector<1x1x128xf32> to vector<1x128xf32>
    %47 = arith.truncf %46 : vector<1x128xf32> to vector<1x128xbf16>
    %c3 = arith.constant 3 : index
    %c0_33 = arith.constant 0 : index
    %c0_34 = arith.constant 0 : index
    %48 = vector.load %arg9[%c3, %c0_33, %c0_34] : memref<4x1x128xf32, #tpu.memory_space<vmem>>, vector<1x1x128xf32>
    %49 = vector.shape_cast %48 : vector<1x1x128xf32> to vector<1x128xf32>
    %c3_35 = arith.constant 3 : index
    %c0_36 = arith.constant 0 : index
    %c0_37 = arith.constant 0 : index
    %50 = vector.load %arg4[%c3_35, %c0_36, %c0_37] : memref<4x128x128xbf16, #tpu.memory_space<vmem>>, vector<1x128x128xbf16>
    %51 = vector.shape_cast %50 : vector<1x128x128xbf16> to vector<128x128xbf16>
    %cst_38 = arith.constant dense<0.000000e+00> : vector<1x128xf32>
    %52 = tpu.matmul %47, %51, %cst_38 {dimension_numbers = #tpu.dot_dimension_numbers<[1], [0], [0], [1], [0, 0, 1, 1], [], []>} : vector<1x128xbf16>, vector<128x128xbf16>, vector<1x128xf32> -> vector<1x128xf32>
    %53 = arith.addf %49, %52 : vector<1x128xf32>
    %c3_39 = arith.constant 3 : index
    %c0_40 = arith.constant 0 : index
    %c0_41 = arith.constant 0 : index
    %54 = vector.load %arg9[%c3_39, %c0_40, %c0_41] : memref<4x1x128xf32, #tpu.memory_space<vmem>>, vector<1x1x128xf32>
    %55 = vector.shape_cast %54 : vector<1x1x128xf32> to vector<1x128xf32>
    %56 = vector.shape_cast %53 : vector<1x128xf32> to vector<1x1x128xf32>
    tpu.vector_store %arg9[%c3_39, %c0_40, %c0_41], %56 {strides = array<i32>} : memref<4x1x128xf32, #tpu.memory_space<vmem>>, vector<1x1x128xf32>,
    %c1_i32 = arith.constant 1 : i32
    %57 = arith.cmpi eq, %arg1, %c1_i32 : i32
    %58 = arith.extui %57 : i1 to i32
    %c0_i32_42 = arith.constant 0 : i32
    %59 = arith.cmpi ne, %58, %c0_i32_42 : i32
    scf.if %59 {
      %c0_43 = arith.constant 0 : index
      %c0_44 = arith.constant 0 : index
      %c0_45 = arith.constant 0 : index
      %60 = vector.load %arg9[%c0_43, %c0_44, %c0_45] : memref<4x1x128xf32, #tpu.memory_space<vmem>>, vector<1x1x128xf32>
      %61 = vector.shape_cast %60 : vector<1x1x128xf32> to vector<1x128xf32>
      %c0_46 = arith.constant 0 : index
      %c0_47 = arith.constant 0 : index
      %c0_48 = arith.constant 0 : index
      %62 = vector.load %arg5[%c0_46, %c0_47, %c0_48] : memref<4x1x128xf32, #tpu.memory_space<vmem>>, vector<1x1x128xf32>
      %63 = vector.shape_cast %62 : vector<1x1x128xf32> to vector<1x128xf32>
      %64 = arith.addf %61, %63 : vector<1x128xf32>
      %65 = arith.truncf %64 : vector<1x128xf32> to vector<1x128xbf16>
      %c0_49 = arith.constant 0 : index
      %c0_50 = arith.constant 0 : index
      %c0_51 = arith.constant 0 : index
      %66 = vector.load %arg6[%c0_49, %c0_50, %c0_51] : memref<4x128x128xbf16, #tpu.memory_space<vmem>>, vector<1x128x128xbf16>
      %67 = vector.shape_cast %66 : vector<1x128x128xbf16> to vector<128x128xbf16>
      %cst_52 = arith.constant dense<0.000000e+00> : vector<1x128xf32>
      %68 = tpu.matmul %65, %67, %cst_52 {dimension_numbers = #tpu.dot_dimension_numbers<[1], [0], [0], [1], [0, 0, 1, 1], [], []>} : vector<1x128xbf16>, vector<128x128xbf16>, vector<1x128xf32> -> vector<1x128xf32>
      %c0_53 = arith.constant 0 : index
      %c0_54 = arith.constant 0 : index
      %c0_55 = arith.constant 0 : index
      %69 = vector.load %arg7[%c0_53, %c0_54, %c0_55] : memref<4x1x128xf32, #tpu.memory_space<vmem>>, vector<1x1x128xf32>
      %70 = vector.shape_cast %69 : vector<1x1x128xf32> to vector<1x128xf32>
      %71 = arith.addf %68, %70 : vector<1x128xf32>
      %c0_56 = arith.constant 0 : index
      %c0_57 = arith.constant 0 : index
      %c0_58 = arith.constant 0 : index
      %72 = vector.load %arg8[%c0_56, %c0_57, %c0_58] : memref<1x4x128xf32, #tpu.memory_space<vmem>>, vector<1x1x128xf32>
      %73 = vector.shape_cast %72 : vector<1x1x128xf32> to vector<1x128xf32>
      %74 = vector.shape_cast %71 : vector<1x128xf32> to vector<1x1x128xf32>
      tpu.vector_store %arg8[%c0_56, %c0_57, %c0_58], %74 {strides = array<i32>} : memref<1x4x128xf32, #tpu.memory_space<vmem>>, vector<1x1x128xf32>,
      %c1_59 = arith.constant 1 : index
      %c0_60 = arith.constant 0 : index
      %c0_61 = arith.constant 0 : index
      %75 = vector.load %arg9[%c1_59, %c0_60, %c0_61] : memref<4x1x128xf32, #tpu.memory_space<vmem>>, vector<1x1x128xf32>
      %76 = vector.shape_cast %75 : vector<1x1x128xf32> to vector<1x128xf32>
      %c1_62 = arith.constant 1 : index
      %c0_63 = arith.constant 0 : index
      %c0_64 = arith.constant 0 : index
      %77 = vector.load %arg5[%c1_62, %c0_63, %c0_64] : memref<4x1x128xf32, #tpu.memory_space<vmem>>, vector<1x1x128xf32>
      %78 = vector.shape_cast %77 : vector<1x1x128xf32> to vector<1x128xf32>
      %79 = arith.addf %76, %78 : vector<1x128xf32>
      %80 = arith.truncf %79 : vector<1x128xf32> to vector<1x128xbf16>
      %c1_65 = arith.constant 1 : index
      %c0_66 = arith.constant 0 : index
      %c0_67 = arith.constant 0 : index
      %81 = vector.load %arg6[%c1_65, %c0_66, %c0_67] : memref<4x128x128xbf16, #tpu.memory_space<vmem>>, vector<1x128x128xbf16>
      %82 = vector.shape_cast %81 : vector<1x128x128xbf16> to vector<128x128xbf16>
      %cst_68 = arith.constant dense<0.000000e+00> : vector<1x128xf32>
      %83 = tpu.matmul %80, %82, %cst_68 {dimension_numbers = #tpu.dot_dimension_numbers<[1], [0], [0], [1], [0, 0, 1, 1], [], []>} : vector<1x128xbf16>, vector<128x128xbf16>, vector<1x128xf32> -> vector<1x128xf32>
      %c1_69 = arith.constant 1 : index
      %c0_70 = arith.constant 0 : index
      %c0_71 = arith.constant 0 : index
      %84 = vector.load %arg7[%c1_69, %c0_70, %c0_71] : memref<4x1x128xf32, #tpu.memory_space<vmem>>, vector<1x1x128xf32>
      %85 = vector.shape_cast %84 : vector<1x1x128xf32> to vector<1x128xf32>
      %86 = arith.addf %83, %85 : vector<1x128xf32>
      %c0_72 = arith.constant 0 : index
      %c1_73 = arith.constant 1 : index
      %c0_74 = arith.constant 0 : index
      %87 = vector.load %arg8[%c0_72, %c1_73, %c0_74] : memref<1x4x128xf32, #tpu.memory_space<vmem>>, vector<1x1x128xf32>
      %88 = vector.shape_cast %87 : vector<1x1x128xf32> to vector<1x128xf32>
      %89 = vector.shape_cast %86 : vector<1x128xf32> to vector<1x1x128xf32>
      tpu.vector_store %arg8[%c0_72, %c1_73, %c0_74], %89 {strides = array<i32>} : memref<1x4x128xf32, #tpu.memory_space<vmem>>, vector<1x1x128xf32>,
      %c2_75 = arith.constant 2 : index
      %c0_76 = arith.constant 0 : index
      %c0_77 = arith.constant 0 : index
      %90 = vector.load %arg9[%c2_75, %c0_76, %c0_77] : memref<4x1x128xf32, #tpu.memory_space<vmem>>, vector<1x1x128xf32>
      %91 = vector.shape_cast %90 : vector<1x1x128xf32> to vector<1x128xf32>
      %c2_78 = arith.constant 2 : index
      %c0_79 = arith.constant 0 : index
      %c0_80 = arith.constant 0 : index
      %92 = vector.load %arg5[%c2_78, %c0_79, %c0_80] : memref<4x1x128xf32, #tpu.memory_space<vmem>>, vector<1x1x128xf32>
      %93 = vector.shape_cast %92 : vector<1x1x128xf32> to vector<1x128xf32>
      %94 = arith.addf %91, %93 : vector<1x128xf32>
      %95 = arith.truncf %94 : vector<1x128xf32> to vector<1x128xbf16>
      %c2_81 = arith.constant 2 : index
      %c0_82 = arith.constant 0 : index
      %c0_83 = arith.constant 0 : index
      %96 = vector.load %arg6[%c2_81, %c0_82, %c0_83] : memref<4x128x128xbf16, #tpu.memory_space<vmem>>, vector<1x128x128xbf16>
      %97 = vector.shape_cast %96 : vector<1x128x128xbf16> to vector<128x128xbf16>
      %cst_84 = arith.constant dense<0.000000e+00> : vector<1x128xf32>
      %98 = tpu.matmul %95, %97, %cst_84 {dimension_numbers = #tpu.dot_dimension_numbers<[1], [0], [0], [1], [0, 0, 1, 1], [], []>} : vector<1x128xbf16>, vector<128x128xbf16>, vector<1x128xf32> -> vector<1x128xf32>
      %c2_85 = arith.constant 2 : index
      %c0_86 = arith.constant 0 : index
      %c0_87 = arith.constant 0 : index
      %99 = vector.load %arg7[%c2_85, %c0_86, %c0_87] : memref<4x1x128xf32, #tpu.memory_space<vmem>>, vector<1x1x128xf32>
      %100 = vector.shape_cast %99 : vector<1x1x128xf32> to vector<1x128xf32>
      %101 = arith.addf %98, %100 : vector<1x128xf32>
      %c0_88 = arith.constant 0 : index
      %c2_89 = arith.constant 2 : index
      %c0_90 = arith.constant 0 : index
      %102 = vector.load %arg8[%c0_88, %c2_89, %c0_90] : memref<1x4x128xf32, #tpu.memory_space<vmem>>, vector<1x1x128xf32>
      %103 = vector.shape_cast %102 : vector<1x1x128xf32> to vector<1x128xf32>
      %104 = vector.shape_cast %101 : vector<1x128xf32> to vector<1x1x128xf32>
      tpu.vector_store %arg8[%c0_88, %c2_89, %c0_90], %104 {strides = array<i32>} : memref<1x4x128xf32, #tpu.memory_space<vmem>>, vector<1x1x128xf32>,
      %c3_91 = arith.constant 3 : index
      %c0_92 = arith.constant 0 : index
      %c0_93 = arith.constant 0 : index
      %105 = vector.load %arg9[%c3_91, %c0_92, %c0_93] : memref<4x1x128xf32, #tpu.memory_space<vmem>>, vector<1x1x128xf32>
      %106 = vector.shape_cast %105 : vector<1x1x128xf32> to vector<1x128xf32>
      %c3_94 = arith.constant 3 : index
      %c0_95 = arith.constant 0 : index
      %c0_96 = arith.constant 0 : index
      %107 = vector.load %arg5[%c3_94, %c0_95, %c0_96] : memref<4x1x128xf32, #tpu.memory_space<vmem>>, vector<1x1x128xf32>
      %108 = vector.shape_cast %107 : vector<1x1x128xf32> to vector<1x128xf32>
      %109 = arith.addf %106, %108 : vector<1x128xf32>
      %110 = arith.truncf %109 : vector<1x128xf32> to vector<1x128xbf16>
      %c3_97 = arith.constant 3 : index
      %c0_98 = arith.constant 0 : index
      %c0_99 = arith.constant 0 : index
      %111 = vector.load %arg6[%c3_97, %c0_98, %c0_99] : memref<4x128x128xbf16, #tpu.memory_space<vmem>>, vector<1x128x128xbf16>
      %112 = vector.shape_cast %111 : vector<1x128x128xbf16> to vector<128x128xbf16>
      %cst_100 = arith.constant dense<0.000000e+00> : vector<1x128xf32>
      %113 = tpu.matmul %110, %112, %cst_100 {dimension_numbers = #tpu.dot_dimension_numbers<[1], [0], [0], [1], [0, 0, 1, 1], [], []>} : vector<1x128xbf16>, vector<128x128xbf16>, vector<1x128xf32> -> vector<1x128xf32>
      %c3_101 = arith.constant 3 : index
      %c0_102 = arith.constant 0 : index
      %c0_103 = arith.constant 0 : index
      %114 = vector.load %arg7[%c3_101, %c0_102, %c0_103] : memref<4x1x128xf32, #tpu.memory_space<vmem>>, vector<1x1x128xf32>
      %115 = vector.shape_cast %114 : vector<1x1x128xf32> to vector<1x128xf32>
      %116 = arith.addf %113, %115 : vector<1x128xf32>
      %c0_104 = arith.constant 0 : index
      %c3_105 = arith.constant 3 : index
      %c0_106 = arith.constant 0 : index
      %117 = vector.load %arg8[%c0_104, %c3_105, %c0_106] : memref<1x4x128xf32, #tpu.memory_space<vmem>>, vector<1x1x128xf32>
      %118 = vector.shape_cast %117 : vector<1x1x128xf32> to vector<1x128xf32>
      %119 = vector.shape_cast %116 : vector<1x128xf32> to vector<1x1x128xf32>
      tpu.vector_store %arg8[%c0_104, %c3_105, %c0_106], %119 {strides = array<i32>} : memref<1x4x128xf32, #tpu.memory_space<vmem>>, vector<1x1x128xf32>,
    } else {
    }
    return
  }
  func.func @transform_0(%arg0: i32, %arg1: i32) -> (i32, i32, i32) {
    %c0_i32 = arith.constant 0 : i32
    %c0_i32_0 = arith.constant 0 : i32
    return %arg0, %arg1, %c0_i32 : i32, i32, i32
  }
  func.func @transform_1(%arg0: i32, %arg1: i32) -> (i32, i32) {
    %c0_i32 = arith.constant 0 : i32
    %c0_i32_0 = arith.constant 0 : i32
    %c0_i32_1 = arith.constant 0 : i32
    return %c0_i32, %c0_i32_0 : i32, i32
  }
  func.func @transform_2(%arg0: i32, %arg1: i32) -> (i32, i32, i32) {
    %c0_i32 = arith.constant 0 : i32
    %c0_i32_0 = arith.constant 0 : i32
    %c0_i32_1 = arith.constant 0 : i32
    return %c0_i32, %arg1, %c0_i32_0 : i32, i32, i32
  }
  func.func @transform_3(%arg0: i32, %arg1: i32) -> (i32, i32, i32) {
    %c0_i32 = arith.constant 0 : i32
    %c0_i32_0 = arith.constant 0 : i32
    %c0_i32_1 = arith.constant 0 : i32
    %c0_i32_2 = arith.constant 0 : i32
    return %c0_i32, %c0_i32_0, %c0_i32_1 : i32, i32, i32
  }
  func.func @transform_4(%arg0: i32, %arg1: i32) -> (i32, i32, i32) {
    %c0_i32 = arith.constant 0 : i32
    %c0_i32_0 = arith.constant 0 : i32
    %c0_i32_1 = arith.constant 0 : i32
    %c0_i32_2 = arith.constant 0 : i32
    return %c0_i32, %c0_i32_0, %c0_i32_1 : i32, i32, i32
  }
  func.func @transform_5(%arg0: i32, %arg1: i32) -> (i32, i32, i32) {
    %c0_i32 = arith.constant 0 : i32
    %c0_i32_0 = arith.constant 0 : i32
    %c0_i32_1 = arith.constant 0 : i32
    %c0_i32_2 = arith.constant 0 : i32
    return %c0_i32, %c0_i32_0, %c0_i32_1 : i32, i32, i32
  }
  func.func @transform_6(%arg0: i32, %arg1: i32) -> (i32, i32, i32) {
    %c0_i32 = arith.constant 0 : i32
    %c0_i32_0 = arith.constant 0 : i32
    %c0_i32_1 = arith.constant 0 : i32
    return %arg0, %c0_i32, %c0_i32_0 : i32, i32, i32
  }
}

module attributes {stable_mosaic.version = 11 : i64} {
  func.func @_lpn_fused_kernel(%arg0: i32, %arg1: i32, %arg2: memref<1x128x256xbf16, #tpu.memory_space<vmem>>, %arg3: memref<256x128xbf16, #tpu.memory_space<vmem>>, %arg4: memref<4x128x128xbf16, #tpu.memory_space<vmem>>, %arg5: memref<4x1x128xf32, #tpu.memory_space<vmem>>, %arg6: memref<4x128x128xbf16, #tpu.memory_space<vmem>>, %arg7: memref<4x1x128xf32, #tpu.memory_space<vmem>>, %arg8: memref<1x4x128xf32, #tpu.memory_space<vmem>>, %arg9: memref<4x1x128xf32, #tpu.memory_space<vmem>>) attributes {dimension_semantics = [#tpu.dimension_semantics<parallel>, #tpu.dimension_semantics<arbitrary>], iteration_bounds = array<i64: 2, 2>, scalar_prefetch = 0 : i64, scratch_operands = 1 : i64, tpu.core_type = #tpu.core_type<tc>, window_params = [{transform_indices = @transform_0, window_bounds = array<i64: 1, 128, 256>}, {pipeline_mode = #tpu.pipeline_mode<synchronous>, transform_indices = @transform_1, window_bounds = array<i64: 256, 128>}, {transform_indices = @transform_2, window_bounds = array<i64: 4, 128, 128>}, {pipeline_mode = #tpu.pipeline_mode<synchronous>, transform_indices = @transform_3, window_bounds = array<i64: 4, 1, 128>}, {pipeline_mode = #tpu.pipeline_mode<synchronous>, transform_indices = @transform_4, window_bounds = array<i64: 4, 128, 128>}, {pipeline_mode = #tpu.pipeline_mode<synchronous>, transform_indices = @transform_5, window_bounds = array<i64: 4, 1, 128>}, {transform_indices = @transform_6, window_bounds = array<i64: 1, 4, 128>}]} {
    %c0_i32 = arith.constant 0 : i32
    %0 = arith.cmpi eq, %arg1, %c0_i32 : i32
    %1 = arith.extui %0 : i1 to i32
    %c0_i32_0 = arith.constant 0 : i32
    %2 = arith.cmpi ne, %1, %c0_i32_0 : i32
    scf.if %2 {
      %cst_43 = arith.constant 0.000000e+00 : f32
      %60 = vector.broadcast %cst_43 : f32 to vector<4x1x128xf32>
      %c0_44 = arith.constant 0 : index
      %c0_45 = arith.constant 0 : index
      %c0_46 = arith.constant 0 : index
      %61 = vector.load %arg9[%c0_44, %c0_45, %c0_46] : memref<4x1x128xf32, #tpu.memory_space<vmem>>, vector<4x1x128xf32>
      tpu.vector_store %arg9[%c0_44, %c0_45, %c0_46], %60 {strides = array<i32>} : memref<4x1x128xf32, #tpu.memory_space<vmem>>, vector<4x1x128xf32>,
    } else {
    }
    %c0 = arith.constant 0 : index
    %c0_1 = arith.constant 0 : index
    %c0_2 = arith.constant 0 : index
    %3 = vector.load %arg2[%c0, %c0_1, %c0_2] : memref<1x128x256xbf16, #tpu.memory_space<vmem>>, vector<1x128x256xbf16>
    %4 = vector.shape_cast %3 : vector<1x128x256xbf16> to vector<128x256xbf16>
    %c0_3 = arith.constant 0 : index
    %c0_4 = arith.constant 0 : index
    %5 = vector.load %arg3[%c0_3, %c0_4] : memref<256x128xbf16, #tpu.memory_space<vmem>>, vector<256x128xbf16>
    %cst = arith.constant dense<0.000000e+00> : vector<128x128xf32>
    %6 = tpu.matmul %4, %5, %cst {dimension_numbers = #tpu.dot_dimension_numbers<[1], [0], [0], [1], [0, 0, 1, 1], [], []>} : vector<128x256xbf16>, vector<256x128xbf16>, vector<128x128xf32> -> vector<128x128xf32>
    %7 = vector.shape_cast %6 : vector<128x128xf32> to vector<1x128x128xf32>
    %8 = tpu.transpose %7, [0, 2, 1] : vector<1x128x128xf32> -> vector<1x128x128xf32>
    %9 = vector.extract_strided_slice %8 {offsets = [0, 0, 0], sizes = [1, 1, 128], strides = [1, 1, 1]} : vector<1x128x128xf32> to vector<1x1x128xf32>
    %10 = vector.shape_cast %9 : vector<1x1x128xf32> to vector<1x128xf32>
    %11 = arith.truncf %10 : vector<1x128xf32> to vector<1x128xbf16>
    %c0_5 = arith.constant 0 : index
    %c0_6 = arith.constant 0 : index
    %c0_7 = arith.constant 0 : index
    %12 = vector.load %arg9[%c0_5, %c0_6, %c0_7] : memref<4x1x128xf32, #tpu.memory_space<vmem>>, vector<1x1x128xf32>
    %13 = vector.shape_cast %12 : vector<1x1x128xf32> to vector<1x128xf32>
    %c0_8 = arith.constant 0 : index
    %c0_9 = arith.constant 0 : index
    %c0_10 = arith.constant 0 : index
    %14 = vector.load %arg4[%c0_8, %c0_9, %c0_10] : memref<4x128x128xbf16, #tpu.memory_space<vmem>>, vector<1x128x128xbf16>
    %15 = vector.shape_cast %14 : vector<1x128x128xbf16> to vector<128x128xbf16>
    %cst_11 = arith.constant dense<0.000000e+00> : vector<1x128xf32>
    %16 = tpu.matmul %11, %15, %cst_11 {dimension_numbers = #tpu.dot_dimension_numbers<[1], [0], [0], [1], [0, 0, 1, 1], [], []>} : vector<1x128xbf16>, vector<128x128xbf16>, vector<1x128xf32> -> vector<1x128xf32>
    %17 = arith.addf %13, %16 : vector<1x128xf32>
    %c0_12 = arith.constant 0 : index
    %c0_13 = arith.constant 0 : index
    %c0_14 = arith.constant 0 : index
    %18 = vector.load %arg9[%c0_12, %c0_13, %c0_14] : memref<4x1x128xf32, #tpu.memory_space<vmem>>, vector<1x1x128xf32>
    %19 = vector.shape_cast %18 : vector<1x1x128xf32> to vector<1x128xf32>
    %20 = vector.shape_cast %17 : vector<1x128xf32> to vector<1x1x128xf32>
    tpu.vector_store %arg9[%c0_12, %c0_13, %c0_14], %20 {strides = array<i32>} : memref<4x1x128xf32, #tpu.memory_space<vmem>>, vector<1x1x128xf32>,
    %21 = vector.extract_strided_slice %8 {offsets = [0, 1, 0], sizes = [1, 1, 128], strides = [1, 1, 1]} : vector<1x128x128xf32> to vector<1x1x128xf32>
    %22 = vector.shape_cast %21 : vector<1x1x128xf32> to vector<1x128xf32>
    %23 = arith.truncf %22 : vector<1x128xf32> to vector<1x128xbf16>
    %c1 = arith.constant 1 : index
    %c0_15 = arith.constant 0 : index
    %c0_16 = arith.constant 0 : index
    %24 = vector.load %arg9[%c1, %c0_15, %c0_16] : memref<4x1x128xf32, #tpu.memory_space<vmem>>, vector<1x1x128xf32>
    %25 = vector.shape_cast %24 : vector<1x1x128xf32> to vector<1x128xf32>
    %c1_17 = arith.constant 1 : index
    %c0_18 = arith.constant 0 : index
    %c0_19 = arith.constant 0 : index
    %26 = vector.load %arg4[%c1_17, %c0_18, %c0_19] : memref<4x128x128xbf16, #tpu.memory_space<vmem>>, vector<1x128x128xbf16>
    %27 = vector.shape_cast %26 : vector<1x128x128xbf16> to vector<128x128xbf16>
    %cst_20 = arith.constant dense<0.000000e+00> : vector<1x128xf32>
    %28 = tpu.matmul %23, %27, %cst_20 {dimension_numbers = #tpu.dot_dimension_numbers<[1], [0], [0], [1], [0, 0, 1, 1], [], []>} : vector<1x128xbf16>, vector<128x128xbf16>, vector<1x128xf32> -> vector<1x128xf32>
    %29 = arith.addf %25, %28 : vector<1x128xf32>
    %c1_21 = arith.constant 1 : index
    %c0_22 = arith.constant 0 : index
    %c0_23 = arith.constant 0 : index
    %30 = vector.load %arg9[%c1_21, %c0_22, %c0_23] : memref<4x1x128xf32, #tpu.memory_space<vmem>>, vector<1x1x128xf32>
    %31 = vector.shape_cast %30 : vector<1x1x128xf32> to vector<1x128xf32>
    %32 = vector.shape_cast %29 : vector<1x128xf32> to vector<1x1x128xf32>
    tpu.vector_store %arg9[%c1_21, %c0_22, %c0_23], %32 {strides = array<i32>} : memref<4x1x128xf32, #tpu.memory_space<vmem>>, vector<1x1x128xf32>,
    %33 = vector.extract_strided_slice %8 {offsets = [0, 2, 0], sizes = [1, 1, 128], strides = [1, 1, 1]} : vector<1x128x128xf32> to vector<1x1x128xf32>
    %34 = vector.shape_cast %33 : vector<1x1x128xf32> to vector<1x128xf32>
    %35 = arith.truncf %34 : vector<1x128xf32> to vector<1x128xbf16>
    %c2 = arith.constant 2 : index
    %c0_24 = arith.constant 0 : index
    %c0_25 = arith.constant 0 : index
    %36 = vector.load %arg9[%c2, %c0_24, %c0_25] : memref<4x1x128xf32, #tpu.memory_space<vmem>>, vector<1x1x128xf32>
    %37 = vector.shape_cast %36 : vector<1x1x128xf32> to vector<1x128xf32>
    %c2_26 = arith.constant 2 : index
    %c0_27 = arith.constant 0 : index
    %c0_28 = arith.constant 0 : index
    %38 = vector.load %arg4[%c2_26, %c0_27, %c0_28] : memref<4x128x128xbf16, #tpu.memory_space<vmem>>, vector<1x128x128xbf16>
    %39 = vector.shape_cast %38 : vector<1x128x128xbf16> to vector<128x128xbf16>
    %cst_29 = arith.constant dense<0.000000e+00> : vector<1x128xf32>
    %40 = tpu.matmul %35, %39, %cst_29 {dimension_numbers = #tpu.dot_dimension_numbers<[1], [0], [0], [1], [0, 0, 1, 1], [], []>} : vector<1x128xbf16>, vector<128x128xbf16>, vector<1x128xf32> -> vector<1x128xf32>
    %41 = arith.addf %37, %40 : vector<1x128xf32>
    %c2_30 = arith.constant 2 : index
    %c0_31 = arith.constant 0 : index
    %c0_32 = arith.constant 0 : index
    %42 = vector.load %arg9[%c2_30, %c0_31, %c0_32] : memref<4x1x128xf32, #tpu.memory_space<vmem>>, vector<1x1x128xf32>
    %43 = vector.shape_cast %42 : vector<1x1x128xf32> to vector<1x128xf32>
    %44 = vector.shape_cast %41 : vector<1x128xf32> to vector<1x1x128xf32>
    tpu.vector_store %arg9[%c2_30, %c0_31, %c0_32], %44 {strides = array<i32>} : memref<4x1x128xf32, #tpu.memory_space<vmem>>, vector<1x1x128xf32>,
    %45 = vector.extract_strided_slice %8 {offsets = [0, 3, 0], sizes = [1, 1, 128], strides = [1, 1, 1]} : vector<1x128x128xf32> to vector<1x1x128xf32>
    %46 = vector.shape_cast %45 : vector<1x1x128xf32> to vector<1x128xf32>
    %47 = arith.truncf %46 : vector<1x128xf32> to vector<1x128xbf16>
    %c3 = arith.constant 3 : index
    %c0_33 = arith.constant 0 : index
    %c0_34 = arith.constant 0 : index
    %48 = vector.load %arg9[%c3, %c0_33, %c0_34] : memref<4x1x128xf32, #tpu.memory_space<vmem>>, vector<1x1x128xf32>
    %49 = vector.shape_cast %48 : vector<1x1x128xf32> to vector<1x128xf32>
    %c3_35 = arith.constant 3 : index
    %c0_36 = arith.constant 0 : index
    %c0_37 = arith.constant 0 : index
    %50 = vector.load %arg4[%c3_35, %c0_36, %c0_37] : memref<4x128x128xbf16, #tpu.memory_space<vmem>>, vector<1x128x128xbf16>
    %51 = vector.shape_cast %50 : vector<1x128x128xbf16> to vector<128x128xbf16>
    %cst_38 = arith.constant dense<0.000000e+00> : vector<1x128xf32>
    %52 = tpu.matmul %47, %51, %cst_38 {dimension_numbers = #tpu.dot_dimension_numbers<[1], [0], [0], [1], [0, 0, 1, 1], [], []>} : vector<1x128xbf16>, vector<128x128xbf16>, vector<1x128xf32> -> vector<1x128xf32>
    %53 = arith.addf %49, %52 : vector<1x128xf32>
    %c3_39 = arith.constant 3 : index
    %c0_40 = arith.constant 0 : index
    %c0_41 = arith.constant 0 : index
    %54 = vector.load %arg9[%c3_39, %c0_40, %c0_41] : memref<4x1x128xf32, #tpu.memory_space<vmem>>, vector<1x1x128xf32>
    %55 = vector.shape_cast %54 : vector<1x1x128xf32> to vector<1x128xf32>
    %56 = vector.shape_cast %53 : vector<1x128xf32> to vector<1x1x128xf32>
    tpu.vector_store %arg9[%c3_39, %c0_40, %c0_41], %56 {strides = array<i32>} : memref<4x1x128xf32, #tpu.memory_space<vmem>>, vector<1x1x128xf32>,
    %c1_i32 = arith.constant 1 : i32
    %57 = arith.cmpi eq, %arg1, %c1_i32 : i32
    %58 = arith.extui %57 : i1 to i32
    %c0_i32_42 = arith.constant 0 : i32
    %59 = arith.cmpi ne, %58, %c0_i32_42 : i32
    scf.if %59 {
      %c0_43 = arith.constant 0 : index
      %c0_44 = arith.constant 0 : index
      %c0_45 = arith.constant 0 : index
      %60 = vector.load %arg9[%c0_43, %c0_44, %c0_45] : memref<4x1x128xf32, #tpu.memory_space<vmem>>, vector<1x1x128xf32>
      %61 = vector.shape_cast %60 : vector<1x1x128xf32> to vector<1x128xf32>
      %c0_46 = arith.constant 0 : index
      %c0_47 = arith.constant 0 : index
      %c0_48 = arith.constant 0 : index
      %62 = vector.load %arg5[%c0_46, %c0_47, %c0_48] : memref<4x1x128xf32, #tpu.memory_space<vmem>>, vector<1x1x128xf32>
      %63 = vector.shape_cast %62 : vector<1x1x128xf32> to vector<1x128xf32>
      %64 = arith.addf %61, %63 : vector<1x128xf32>
      %65 = arith.truncf %64 : vector<1x128xf32> to vector<1x128xbf16>
      %c0_49 = arith.constant 0 : index
      %c0_50 = arith.constant 0 : index
      %c0_51 = arith.constant 0 : index
      %66 = vector.load %arg6[%c0_49, %c0_50, %c0_51] : memref<4x128x128xbf16, #tpu.memory_space<vmem>>, vector<1x128x128xbf16>
      %67 = vector.shape_cast %66 : vector<1x128x128xbf16> to vector<128x128xbf16>
      %cst_52 = arith.constant dense<0.000000e+00> : vector<1x128xf32>
      %68 = tpu.matmul %65, %67, %cst_52 {dimension_numbers = #tpu.dot_dimension_numbers<[1], [0], [0], [1], [0, 0, 1, 1], [], []>} : vector<1x128xbf16>, vector<128x128xbf16>, vector<1x128xf32> -> vector<1x128xf32>
      %c0_53 = arith.constant 0 : index
      %c0_54 = arith.constant 0 : index
      %c0_55 = arith.constant 0 : index
      %69 = vector.load %arg7[%c0_53, %c0_54, %c0_55] : memref<4x1x128xf32, #tpu.memory_space<vmem>>, vector<1x1x128xf32>
      %70 = vector.shape_cast %69 : vector<1x1x128xf32> to vector<1x128xf32>
      %71 = arith.addf %68, %70 : vector<1x128xf32>
      %c0_56 = arith.constant 0 : index
      %c0_57 = arith.constant 0 : index
      %c0_58 = arith.constant 0 : index
      %72 = vector.load %arg8[%c0_56, %c0_57, %c0_58] : memref<1x4x128xf32, #tpu.memory_space<vmem>>, vector<1x1x128xf32>
      %73 = vector.shape_cast %72 : vector<1x1x128xf32> to vector<1x128xf32>
      %74 = vector.shape_cast %71 : vector<1x128xf32> to vector<1x1x128xf32>
      tpu.vector_store %arg8[%c0_56, %c0_57, %c0_58], %74 {strides = array<i32>} : memref<1x4x128xf32, #tpu.memory_space<vmem>>, vector<1x1x128xf32>,
      %c1_59 = arith.constant 1 : index
      %c0_60 = arith.constant 0 : index
      %c0_61 = arith.constant 0 : index
      %75 = vector.load %arg9[%c1_59, %c0_60, %c0_61] : memref<4x1x128xf32, #tpu.memory_space<vmem>>, vector<1x1x128xf32>
      %76 = vector.shape_cast %75 : vector<1x1x128xf32> to vector<1x128xf32>
      %c1_62 = arith.constant 1 : index
      %c0_63 = arith.constant 0 : index
      %c0_64 = arith.constant 0 : index
      %77 = vector.load %arg5[%c1_62, %c0_63, %c0_64] : memref<4x1x128xf32, #tpu.memory_space<vmem>>, vector<1x1x128xf32>
      %78 = vector.shape_cast %77 : vector<1x1x128xf32> to vector<1x128xf32>
      %79 = arith.addf %76, %78 : vector<1x128xf32>
      %80 = arith.truncf %79 : vector<1x128xf32> to vector<1x128xbf16>
      %c1_65 = arith.constant 1 : index
      %c0_66 = arith.constant 0 : index
      %c0_67 = arith.constant 0 : index
      %81 = vector.load %arg6[%c1_65, %c0_66, %c0_67] : memref<4x128x128xbf16, #tpu.memory_space<vmem>>, vector<1x128x128xbf16>
      %82 = vector.shape_cast %81 : vector<1x128x128xbf16> to vector<128x128xbf16>
      %cst_68 = arith.constant dense<0.000000e+00> : vector<1x128xf32>
      %83 = tpu.matmul %80, %82, %cst_68 {dimension_numbers = #tpu.dot_dimension_numbers<[1], [0], [0], [1], [0, 0, 1, 1], [], []>} : vector<1x128xbf16>, vector<128x128xbf16>, vector<1x128xf32> -> vector<1x128xf32>
      %c1_69 = arith.constant 1 : index
      %c0_70 = arith.constant 0 : index
      %c0_71 = arith.constant 0 : index
      %84 = vector.load %arg7[%c1_69, %c0_70, %c0_71] : memref<4x1x128xf32, #tpu.memory_space<vmem>>, vector<1x1x128xf32>
      %85 = vector.shape_cast %84 : vector<1x1x128xf32> to vector<1x128xf32>
      %86 = arith.addf %83, %85 : vector<1x128xf32>
      %c0_72 = arith.constant 0 : index
      %c1_73 = arith.constant 1 : index
      %c0_74 = arith.constant 0 : index
      %87 = vector.load %arg8[%c0_72, %c1_73, %c0_74] : memref<1x4x128xf32, #tpu.memory_space<vmem>>, vector<1x1x128xf32>
      %88 = vector.shape_cast %87 : vector<1x1x128xf32> to vector<1x128xf32>
      %89 = vector.shape_cast %86 : vector<1x128xf32> to vector<1x1x128xf32>
      tpu.vector_store %arg8[%c0_72, %c1_73, %c0_74], %89 {strides = array<i32>} : memref<1x4x128xf32, #tpu.memory_space<vmem>>, vector<1x1x128xf32>,
      %c2_75 = arith.constant 2 : index
      %c0_76 = arith.constant 0 : index
      %c0_77 = arith.constant 0 : index
      %90 = vector.load %arg9[%c2_75, %c0_76, %c0_77] : memref<4x1x128xf32, #tpu.memory_space<vmem>>, vector<1x1x128xf32>
      %91 = vector.shape_cast %90 : vector<1x1x128xf32> to vector<1x128xf32>
      %c2_78 = arith.constant 2 : index
      %c0_79 = arith.constant 0 : index
      %c0_80 = arith.constant 0 : index
      %92 = vector.load %arg5[%c2_78, %c0_79, %c0_80] : memref<4x1x128xf32, #tpu.memory_space<vmem>>, vector<1x1x128xf32>
      %93 = vector.shape_cast %92 : vector<1x1x128xf32> to vector<1x128xf32>
      %94 = arith.addf %91, %93 : vector<1x128xf32>
      %95 = arith.truncf %94 : vector<1x128xf32> to vector<1x128xbf16>
      %c2_81 = arith.constant 2 : index
      %c0_82 = arith.constant 0 : index
      %c0_83 = arith.constant 0 : index
      %96 = vector.load %arg6[%c2_81, %c0_82, %c0_83] : memref<4x128x128xbf16, #tpu.memory_space<vmem>>, vector<1x128x128xbf16>
      %97 = vector.shape_cast %96 : vector<1x128x128xbf16> to vector<128x128xbf16>
      %cst_84 = arith.constant dense<0.000000e+00> : vector<1x128xf32>
      %98 = tpu.matmul %95, %97, %cst_84 {dimension_numbers = #tpu.dot_dimension_numbers<[1], [0], [0], [1], [0, 0, 1, 1], [], []>} : vector<1x128xbf16>, vector<128x128xbf16>, vector<1x128xf32> -> vector<1x128xf32>
      %c2_85 = arith.constant 2 : index
      %c0_86 = arith.constant 0 : index
      %c0_87 = arith.constant 0 : index
      %99 = vector.load %arg7[%c2_85, %c0_86, %c0_87] : memref<4x1x128xf32, #tpu.memory_space<vmem>>, vector<1x1x128xf32>
      %100 = vector.shape_cast %99 : vector<1x1x128xf32> to vector<1x128xf32>
      %101 = arith.addf %98, %100 : vector<1x128xf32>
      %c0_88 = arith.constant 0 : index
      %c2_89 = arith.constant 2 : index
      %c0_90 = arith.constant 0 : index
      %102 = vector.load %arg8[%c0_88, %c2_89, %c0_90] : memref<1x4x128xf32, #tpu.memory_space<vmem>>, vector<1x1x128xf32>
      %103 = vector.shape_cast %102 : vector<1x1x128xf32> to vector<1x128xf32>
      %104 = vector.shape_cast %101 : vector<1x128xf32> to vector<1x1x128xf32>
      tpu.vector_store %arg8[%c0_88, %c2_89, %c0_90], %104 {strides = array<i32>} : memref<1x4x128xf32, #tpu.memory_space<vmem>>, vector<1x1x128xf32>,
      %c3_91 = arith.constant 3 : index
      %c0_92 = arith.constant 0 : index
      %c0_93 = arith.constant 0 : index
      %105 = vector.load %arg9[%c3_91, %c0_92, %c0_93] : memref<4x1x128xf32, #tpu.memory_space<vmem>>, vector<1x1x128xf32>
      %106 = vector.shape_cast %105 : vector<1x1x128xf32> to vector<1x128xf32>
      %c3_94 = arith.constant 3 : index
      %c0_95 = arith.constant 0 : index
      %c0_96 = arith.constant 0 : index
      %107 = vector.load %arg5[%c3_94, %c0_95, %c0_96] : memref<4x1x128xf32, #tpu.memory_space<vmem>>, vector<1x1x128xf32>
      %108 = vector.shape_cast %107 : vector<1x1x128xf32> to vector<1x128xf32>
      %109 = arith.addf %106, %108 : vector<1x128xf32>
      %110 = arith.truncf %109 : vector<1x128xf32> to vector<1x128xbf16>
      %c3_97 = arith.constant 3 : index
      %c0_98 = arith.constant 0 : index
      %c0_99 = arith.constant 0 : index
      %111 = vector.load %arg6[%c3_97, %c0_98, %c0_99] : memref<4x128x128xbf16, #tpu.memory_space<vmem>>, vector<1x128x128xbf16>
      %112 = vector.shape_cast %111 : vector<1x128x128xbf16> to vector<128x128xbf16>
      %cst_100 = arith.constant dense<0.000000e+00> : vector<1x128xf32>
      %113 = tpu.matmul %110, %112, %cst_100 {dimension_numbers = #tpu.dot_dimension_numbers<[1], [0], [0], [1], [0, 0, 1, 1], [], []>} : vector<1x128xbf16>, vector<128x128xbf16>, vector<1x128xf32> -> vector<1x128xf32>
      %c3_101 = arith.constant 3 : index
      %c0_102 = arith.constant 0 : index
      %c0_103 = arith.constant 0 : index
      %114 = vector.load %arg7[%c3_101, %c0_102, %c0_103] : memref<4x1x128xf32, #tpu.memory_space<vmem>>, vector<1x1x128xf32>
      %115 = vector.shape_cast %114 : vector<1x1x128xf32> to vector<1x128xf32>
      %116 = arith.addf %113, %115 : vector<1x128xf32>
      %c0_104 = arith.constant 0 : index
      %c3_105 = arith.constant 3 : index
      %c0_106 = arith.constant 0 : index
      %117 = vector.load %arg8[%c0_104, %c3_105, %c0_106] : memref<1x4x128xf32, #tpu.memory_space<vmem>>, vector<1x1x128xf32>
      %118 = vector.shape_cast %117 : vector<1x1x128xf32> to vector<1x128xf32>
      %119 = vector.shape_cast %116 : vector<1x128xf32> to vector<1x1x128xf32>
      tpu.vector_store %arg8[%c0_104, %c3_105, %c0_106], %119 {strides = array<i32>} : memref<1x4x128xf32, #tpu.memory_space<vmem>>, vector<1x1x128xf32>,
    } else {
    }
    return
  }
  func.func @transform_0(%arg0: i32, %arg1: i32) -> (i32, i32, i32) {
    %c0_i32 = arith.constant 0 : i32
    %c0_i32_0 = arith.constant 0 : i32
    return %arg0, %arg1, %c0_i32 : i32, i32, i32
  }
  func.func @transform_1(%arg0: i32, %arg1: i32) -> (i32, i32) {
    %c0_i32 = arith.constant 0 : i32
    %c0_i32_0 = arith.constant 0 : i32
    %c0_i32_1 = arith.constant 0 : i32
    return %c0_i32, %c0_i32_0 : i32, i32
  }
  func.func @transform_2(%arg0: i32, %arg1: i32) -> (i32, i32, i32) {
    %c0_i32 = arith.constant 0 : i32
    %c0_i32_0 = arith.constant 0 : i32
    %c0_i32_1 = arith.constant 0 : i32
    return %c0_i32, %arg1, %c0_i32_0 : i32, i32, i32
  }
  func.func @transform_3(%arg0: i32, %arg1: i32) -> (i32, i32, i32) {
    %c0_i32 = arith.constant 0 : i32
    %c0_i32_0 = arith.constant 0 : i32
    %c0_i32_1 = arith.constant 0 : i32
    %c0_i32_2 = arith.constant 0 : i32
    return %c0_i32, %c0_i32_0, %c0_i32_1 : i32, i32, i32
  }
  func.func @transform_4(%arg0: i32, %arg1: i32) -> (i32, i32, i32) {
    %c0_i32 = arith.constant 0 : i32
    %c0_i32_0 = arith.constant 0 : i32
    %c0_i32_1 = arith.constant 0 : i32
    %c0_i32_2 = arith.constant 0 : i32
    return %c0_i32, %c0_i32_0, %c0_i32_1 : i32, i32, i32
  }
  func.func @transform_5(%arg0: i32, %arg1: i32) -> (i32, i32, i32) {
    %c0_i32 = arith.constant 0 : i32
    %c0_i32_0 = arith.constant 0 : i32
    %c0_i32_1 = arith.constant 0 : i32
    %c0_i32_2 = arith.constant 0 : i32
    return %c0_i32, %c0_i32_0, %c0_i32_1 : i32, i32, i32
  }
  func.func @transform_6(%arg0: i32, %arg1: i32) -> (i32, i32, i32) {
    %c0_i32 = arith.constant 0 : i32
    %c0_i32_0 = arith.constant 0 : i32
    %c0_i32_1 = arith.constant 0 : i32
    return %arg0, %c0_i32, %c0_i32_0 : i32, i32, i32
  }
}

</mosaic_0001>

<bundles_post_ra>
// kernel: tpu_custom_call.1
= control target key start
LH: loop header
LB: loop body
LE: loop exit
PB: predicated region body
PF: predicated region fallthrough
CT: control target
= control target key end

     0   :  { %s3350_s0 = inlined_call_operand.hbm [shape: bf16[2,256,256], index: 0, kind: input, shape index: {}]   ;;  %s3351_s1 = inlined_call_operand.hbm [shape: bf16[256,128], index: 1, kind: input, shape index: {}]   ;;  %s3352_s2 = inlined_call_operand.hbm [shape: bf16[4,256,128], index: 2, kind: input, shape index: {}]   ;;  %s3353_s3 = inlined_call_operand.vmem [shape: f32[4,1,128], index: 3, kind: input, shape index: {}]   ;;  %s3354_s4 = inlined_call_operand.hbm [shape: bf16[4,128,128], index: 4, kind: input, shape index: {}]   ;;  %s3355_s5 = inlined_call_operand.vmem [shape: f32[4,1,128], index: 5, kind: input, shape index: {}]   ;;  %s3356_s6 = inlined_call_operand.hbm [shape: f32[2,4,128], index: 6, kind: output, shape index: {}]  }
   0x1   :  { %3376 = sst [smem:[#allocation31_spill]] %s3353_s3 }
   0x2   :  { %3377 = sst [smem:[#allocation32_spill]] %s3355_s5 }
   0x3   :  { %3378 = sst [smem:[#allocation33_spill]] %s3356_s6 }
   0x4   :  { %11 = vsyncpa [#allocation4], 0 }
   0x5   :  { %13 = vsyncpa [#allocation4 + $0x1], 0 }
   0x6   :  { %14 = vsyncpa [#allocation7], 0 }
   0x7   :  { %15 = vsyncpa [#allocation5], 0 }
   0x8   :  { %17 = vsyncpa [#allocation5 + $0x1], 0  ;;  %s2820_s21 = smov 0   ;;  %s2822_s22 = smov 0  }
   0x9   :  { %s2824_s23 = smov 0   ;;  %s2826_s24 = smov 0  }
   0xa   :  { %s2828_s25 = smov 0   ;;  %s2830_s26 = smov 0  }
   0xb   :  { %s2832_s27 = smov 0   ;;  %s2834_s28 = smov 0  }
   0xc   :  { %s2836_s29 = smov 0   ;;  %s2838_s30 = smov 0  }
   0xd   :  { %s2840_s7 = smov 0   ;;  %s2842_s8 = smov 0  }
   0xe   :  { %s2844_s9 = smov 0   ;;  %s2846_s10 = smov 0  }
   0xf LB: > { %3379 = sst [smem:[#allocation19_spill]] %s2712_s21  ;;  %s2889_s11 = sadd.s32 4294967295, %s2764_s10   ;;  %s2764_s10 = sphi %s2846_s10, %s23_s10   ;;  %s2760_s9 = sphi %s2844_s9, %s3441_s9   ;;  %s2756_s8 = sphi %s2842_s8, %s3440_s8   ;;  %s2752_s7 = sphi %s2840_s7, %s3439_s7   ;;  %s2748_s30 = sphi %s2838_s30, %s3438_s30   ;;  %s2744_s29 = sphi %s2836_s29, %s3437_s29   ;;  %s2740_s28 = sphi %s2834_s28, %s3436_s28   ;;  %s2736_s27 = sphi %s2832_s27, %s3435_s27   ;;  %s2732_s26 = sphi %s2830_s26, %s3434_s26   ;;  %s2728_s25 = sphi %s2828_s25, %s3433_s25   ;;  %s2724_s24 = sphi %s2826_s24, %s3432_s24   ;;  %s2720_s23 = sphi %s2824_s23, %s3427_s23   ;;  %s2716_s22 = sphi %s2822_s22, %s3426_s22   ;;  %s2712_s21 = sphi %s2820_s21, %s3425_s21  }
  0x10   : > { %3380 = sst [smem:[#allocation20_spill]] %s2716_s22  ;;  %s32_s13 = sadd.s32 1, %s2756_s8 }
  0x11   : > { %3381 = sst [smem:[#allocation21_spill]] %s2720_s23  ;;  %s35_s14 = sadd.s32 1, %s2760_s9 }
  0x12   : > { %3382 = sst [smem:[#allocation22_spill]] %s2748_s30  ;;  %p33_p0 = scmp.ge.s32.totalorder %s32_s13, 2 }
  0x13   : > { %3383 = sst [smem:[#allocation23_spill]] %s2752_s7  ;;  %s44_s15 = sadd.s32 1, %s2744_s29 }
  0x14   : > { %p51_p1 = scmp.ne.s32.totalorder %s2744_s29, %s2740_s28  ;;  %p52_p2 = scmp.eq.s32.totalorder %s2764_s10, 0 }
  0x15   : > { %s3443_s13 = smov (%p33_p0, %s32_s13), 0  ;;  %s3445_s14 = smov (!%p33_p0, %s35_s14), %s2760_s9 }
  0x16   : > { %3384 = sst [smem:[#allocation24_spill]] %s3443_s13  ;;  %s40_s16 = ssub.s32 %s2756_s8, %s3443_s13 }
  0x17   : > { %p2905_p3 = por %p52_p2, %p51_p1  ;;  %p37_p4 = scmp.ge.s32.totalorder %s3445_s14, 2 }
  0x18   : > { %p57_p5 = scmp.ne.s32.totalorder %s2740_s28, %s2736_s27  ;;  %p3359_p6 = scmp.eq.s32.totalorder %s2889_s11, 0 }
  0x19   : > { %s3385_s17 = scalar_select %p2905_p3, 1, 0 }
  0x1a   : > { %p89_p7 = scmp.eq.s32.totalorder %s40_s16, 0  ;;  %s3447_s14 = smov (%p37_p4, %s3445_s14), 0 }
  0x1b   : > { %3386 = sst [smem:[#allocation25_spill]] %s3447_s14  ;;  %p2915_p8 = por %p3359_p6, %p57_p5 }
  0x1c   : > { %s91_s19 = sadd.s32 1, %s2732_s26  ;;  %s39_s20 = ssub.s32 %s2760_s9, %s3447_s14 }
  0x1d   : > { %s3387_s18 = scalar_select %p2915_p8, 1, 0 }
  0x1e   : > { %p98_p9 = scmp.ne.s32.totalorder %s2732_s26, %s2728_s25  ;;  %s41_s27 = sor.u32 %s40_s16, %s39_s20 }
  0x1f   : > { %p104_p10 = scmp.ne.s32.totalorder %s2728_s25, %s2724_s24  ;;  %p42_p11 = scmp.eq.s32.totalorder %s41_s27, 0 }
  0x20   : > { %p2928_p12 = por %p98_p9, %p52_p2  ;;  %p178_p0 = scmp.eq.s32.totalorder %s39_s20, 0 }
  0x21   : > { %s2933_s13 = scalar_select %p89_p7, %s2732_s26, %s91_s19  }
  0x22   : > { %s3388_s12 = scalar_select %p2928_p12, 1, 0 }
  0x23   : > { %3389 = sst [smem:[#allocation26_spill]] %s2933_s13  ;;  %p2940_p13 = por %p104_p10, %p3359_p6 }
  0x24   : > { %s2936_s6 = scalar_select %p42_p11, %s2744_s29, %s44_s15  }
  0x25   : > { %s3391_s7 = scalar_select %p2940_p13, 1, 0 }
  0x26   : > { %3390 = sst [smem:[#allocation27_spill]] %s2936_s6  ;;  %s180_s16 = sadd.s32 1, %s2720_s23 }
  0x27   : > { %p190_p1 = scmp.ne.s32.totalorder %s2720_s23, %s2716_s22  ;;  %p191_p4 = scmp.eq.s32.totalorder %s2889_s11, 3 }
  0x28   : > { %s2948_s24 = scalar_select %p178_p0, %s2720_s23, %s180_s16  }
  0x29   : > { %p196_p2 = scmp.ne.s32.totalorder %s2716_s22, %s2712_s21  ;;  %s3393_s27 = sadd.s32 4294967294, %s2764_s10  }
  0x2a   : > { %3392 = sst [smem:[#allocation28_spill]] %s2948_s24  ;;  %p197_p5 = scmp.eq.s32.totalorder %s3393_s27, 3 }
  0x2b   : > { %p1778_p9 = scmp.ge.s32.totalorder %s2764_s10, 1  ;;  %p2956_p7 = por %p191_p4, %p190_p1 }
  0x2c   : > { %p204_p11 = scmp.lt.s32.totalorder %s2764_s10, 5  ;;  %p2961_p10 = por %p197_p5, %p196_p2 }
  0x2d   : > { %s3394_s19 = scalar_select %p2956_p7, 1, 0 }
  0x2e   : > { %s3396_s15 = scalar_select %p2961_p10, 1, 0 }
  0x2f   : > { %3395 = sst [smem:[#allocation29_spill]] %s3394_s19  ;;  %p2965_p6 = pnand %p1778_p9, %p204_p11 }
  0x30   : > { %3397 = sst [smem:[#allocation30_spill]] %s3396_s15  ;;  %s2766_s16 = smov [#allocation6]  }
  0x31   : > { %s3398_s20 = scalar_select %p2965_p6, 1, 0 }
  0x32   : > { %s216_s14 = sshll.u32 %s2766_s16, 4  ;;  %p2273_p0 = pneg %p2965_p6  ;;  %s217_s14 = int_to_ptr.vmem [resolvable:$true] %s216_s14 }
  0x33   : > { %p3399_p13 = scmp.eq.s32.totalorder %s2889_s11, 0  ;;  %s2767_s6 = smov [#allocation9]  }
  0x34   : > { %s232_s13 = sshll.u32 %s2767_s6, 4  ;;  %s2522_s15 = scalar_lea.hbm %s3351_s1, 2048  ;;  %s2977_s13 = int_to_ptr.vmem [resolvable:$true] %s232_s13 }
  0x35   : > { %p2973_p1 = pnand %p2273_p0, %p3399_p13  ;;  %p2523_p4 = scmp.ne.s32.totalorder %s3351_s1, %s2522_s15 }
  0x36   : > { %p2529_p9 = scmp.lt.u32.totalorder %s2522_s15, %s3351_s1 }
  0x37   : > { %p2524_p2 = pneg %p2973_p1 }
  0x39   : > { %p2525_p13 = pnand %p2524_p2, %p2523_p4 }
  0x3b   : > { %p2526_p5 = pneg %p2525_p13 }
  0x3d   : > { %p2531_p11 = pnand %p2529_p9, %p2526_p5 }
  0x3f   : > { %2534 = shalt.err (!%p2531_p11)
}
  0x40   : > { %s2535_s6 = scalar_lea.vmem %s217_s14, 2048  ;;  %p2543_p8 = scmp.lt.s32.totalorder %s217_s14, %s217_s14 }
  0x41   : > { %p2536_p0 = scmp.ne.s32.totalorder %s217_s14, %s2535_s6  ;;  %p2544_p6 = scmp.lt.s32.totalorder %s2535_s6, %s2535_s6 }
  0x43   : > { %p2538_p10 = pnand %p2536_p0, %p2524_p2  ;;  %p2545_p12 = por %p2544_p6, %p2543_p8 }
  0x45   : > { %p2539_p7 = pneg %p2538_p10 }
  0x47   : > { %p2546_p3 = pnand %p2545_p12, %p2539_p7 }
  0x49   : > { %2549 = shalt.err (!%p2546_p3)
}
  0x4a   : > { %s2768_s21 = smov 64   ;;  %s2769_s23 = smov 4  }
  0x4b   : > { %2276 = dma.hbm_to_vmem [thread:$0]  (!%p2973_p1), %s3351_s1, 2048, %s217_s14, [#allocation7], %s2768_s21, %s2768_s21, %s2769_s23  }
  0x4c   : > { %s2550_s16 = scalar_lea.hbm %s3354_s4, 4096 }
  0x4d   : > { %p2551_p10 = scmp.ne.s32.totalorder %s3354_s4, %s2550_s16  ;;  %p2557_p8 = scmp.lt.u32.totalorder %s2550_s16, %s3354_s4 }
  0x4f   : > { %p2553_p3 = pnand %p2551_p10, %p2524_p2 }
  0x51   : > { %p2554_p6 = pneg %p2553_p3 }
  0x53   : > { %p2559_p12 = pnand %p2557_p8, %p2554_p6 }
  0x55   : > { %2562 = shalt.err (!%p2559_p12)
}
  0x56   : > { %s2563_s14 = scalar_lea.vmem %s2977_s13, 4096  ;;  %p2571_p5 = scmp.lt.s32.totalorder %s2977_s13, %s2977_s13 }
  0x57   : > { %p2564_p7 = scmp.ne.s32.totalorder %s2977_s13, %s2563_s14  ;;  %p2572_p9 = scmp.lt.s32.totalorder %s2563_s14, %s2563_s14 }
  0x59   : > { %p2566_p4 = pnand %p2564_p7, %p2524_p2  ;;  %p2573_p11 = por %p2572_p9, %p2571_p5 }
  0x5b   : > { %p2567_p13 = pneg %p2566_p4 }
  0x5d   : > { %p2574_p0 = pnand %p2573_p11, %p2567_p13 }
  0x5f   : > { %2577 = shalt.err (!%p2574_p0)
}
  0x60   : > { %2279 = dma.hbm_to_vmem [thread:$0]  (!%p2973_p1), %s3354_s4, 4096, %s2977_s13, [#allocation7], %s2768_s21, %s2768_s21, %s2769_s23  }
  0x61   : > { %p1781_p10 = scmp.ge.s32.totalorder %s2764_s10, 4 }
  0x62   : > { %s249_s30 = sand.u32 (!%p1781_p10), 1, %s2764_s10   ;;  %s251_s5 = sand.u32 (!%p1781_p10), 1, %s2744_s29  }
  0x63   : > { %245 = sbr.rel (%p1781_p10) target bundleno = 141 (0x8d), region = 32  ;;  %s1782_s24 = sshll.u32 (!%p1781_p10), %s251_s5, 7 }
  0x64   : > { %s1954_s19 = sshll.u32 (!%p1781_p10), %s2756_s8, 5  ;;  %s1785_s15 = sshll.u32 (!%p1781_p10), %s2760_s9, 6 }
  0x65   : > { %s253_s16 = scalar_lea.vmem (!%p1781_p10), [#allocation3], %s1782_s24  ;;  %s260_s6 = sadd.s32 (!%p1781_p10), %s1954_s19, %s1785_s15 }
  0x66   : > { %s263_s27 = sshll.u32 (!%p1781_p10), %s253_s16, 4  ;;  %s1786_s14 = sshll.u32 (!%p1781_p10), %s260_s6, 6  ;;  %s3031_s27 = int_to_ptr.vmem [resolvable:$true] %s263_s27 }
  0x67   : > { %s3036_s23 = scalar_lea.hbm (!%p1781_p10), %s3350_s0, %s1786_s14  ;;  %s3038_s3 = scalar_lea.sflag (!%p1781_p10), [#allocation4], %s249_s30 }
  0x68   : > { %s2578_s22 = scalar_lea.hbm (!%p1781_p10), %s3036_s23, 2048  ;;  %p3401_p2 = scmp.ne.s32.totalorder (!%p1781_p10), %s3385_s17, 0 }
  0x69   : > { %p2579_p1 = scmp.ne.s32.totalorder (!%p1781_p10), %s3036_s23, %s2578_s22  ;;  %s2582_s19 = scalar_lea.hbm (!%p1781_p10), %s3350_s0, 8192 }
  0x6a   : > { %p2583_p8 = scmp.lt.u32.totalorder %s3036_s23, %s3350_s0  ;;  %p2584_p12 = scmp.lt.u32.totalorder %s2582_s19, %s2578_s22 }
  0x6b   : > { %p2580_p3 = pnand %p2579_p1, %p3401_p2  ;;  %p2586_p4 = scmp.lt.u32.totalorder %s2578_s22, %s3036_s23 }
  0x6c   : > { %p2585_p7 = por %p2584_p12, %p2583_p8 }
  0x6d   : > { %p2581_p6 = pneg %p2580_p3 }
  0x6e   : > { %p2587_p13 = por %p2586_p4, %p2585_p7 }
  0x70   : > { %p2588_p5 = pnand %p2587_p13, %p2581_p6 }
  0x72   : > { %2591 = shalt.err (!%p2588_p5)
}
  0x73   : > { %s2592_s30 = scalar_lea.vmem %s3031_s27, 2048  ;;  %s2770_s6 = smov [#allocation3]  }
  0x74   : > { %p2593_p9 = scmp.ne.s32.totalorder %s3031_s27, %s2592_s30  ;;  %s2596_s14 = sshll.u32 %s2770_s6, 4  ;;  %s2597_s14 = int_to_ptr.vmem [resolvable:$false] %s2596_s14 }
  0x75   : > { %s2598_s13 = scalar_lea.vmem %s2597_s14, 4096  ;;  %p2599_p10 = scmp.lt.s32.totalorder %s3031_s27, %s2597_s14 }
  0x76   : > { %p2594_p11 = pnand %p2593_p9, %p3401_p2  ;;  %p2600_p1 = scmp.lt.s32.totalorder %s2598_s13, %s2592_s30 }
  0x78   : > { %p2595_p0 = pneg %p2594_p11  ;;  %p2601_p3 = por %p2600_p1, %p2599_p10 }
  0x7a   : > { %p2602_p8 = pnand %p2601_p3, %p2595_p0 }
  0x7c   : > { %2605 = shalt.err (!%p2602_p8)
}
  0x7d   : > { %s2771_s21 = smov 128   ;;  %s2772_s22 = smov 8  }
  0x7e   : > { %2256 = dma.hbm_to_vmem [thread:$0]  (%p3401_p2), %s3036_s23, 2048, %s3031_s27, %s3038_s3, %s2771_s21, %s2771_s21, %s2772_s22  }
  0x7f   : > { %s275_s5 = sand.u32 1, %s2732_s26   ;;  %s1955_s19 = sshll.u32 %s2756_s8, 10 }
  0x80   : > { %s1787_s24 = sshll.u32 %s275_s5, 8  ;;  %p3402_p6 = scmp.ne.s32.totalorder %s3388_s12, 0 }
  0x81   : > { %s283_s6 = scalar_lea.hbm %s3352_s2, %s1955_s19  ;;  %s2773_s17 = smov 2048  }
  0x82   : > { %s2257_s15 = scalar_select %p3402_p6, [#allocation0], [#allocation13] }
  0x83   : > { %2258 = sst [smem:[#allocation12]] (%p3402_p6), %s2773_s17  ;;  %s277_s23 = scalar_lea.vmem [#allocation8], %s1787_s24 }
  0x84   : > { %s288_s27 = sld [smem:[%s2257_s15]]   ;;  %s296_s14 = sshll.u32 %s277_s23, 4  ;;  %s297_s14 = int_to_ptr.vmem [resolvable:$true] %s296_s14 }
  0x85   : > { %s2774_s13 = smov 1024   ;;  %s2775_s21 = smov 16  }
  0x86   : > { %2259 = sst [smem:[#allocation12 + $0x1]] (%p3402_p6), %s2774_s13  ;;  %s2776_s22 = smov 64  }
  0x87   : > { %2260 = sst [smem:[#allocation12 + $0x2]] (%p3402_p6), %s2775_s21  ;;  %s2777_s19 = smov 4  }
  0x88   : > { %2261 = sst [smem:[#allocation12 + $0x3]] (%p3402_p6), %s2776_s22  ;;  %s2778_s16 = smov [#allocation11]  }
  0x89   : > { %2262 = sst [smem:[#allocation12 + $0x4]] (%p3402_p6), %s2776_s22 }
  0x8a   : > { %s1790_s5 = sshll.u32 %s288_s27, 26  ;;  %2263 = sst [smem:[#allocation12 + $0x5]] (%p3402_p6), %s2777_s19 }
  0x8b   : > { %s1791_s15 = sadd.s32 134217728, %s1790_s5 }
  0x8c   : > { %2264 = dma.general (%p3402_p6), %s283_s6, 4096, %s297_s14, %s3038_s3, %s2778_s16, [#allocation12], %s1791_s15, 0  }
  0x8d PF: > { %p3403_p2 = scmp.ne.s32.totalorder %s3398_s20, 0 }
  0x8e   : > { %s323_s24 = sand.u32 (!%p3403_p2), 1, %s2889_s11   ;;  %s325_s30 = sand.u32 (!%p3403_p2), 1, %s2740_s28  }
  0x8f   : > { %321 = sbr.rel (%p3403_p2) target bundleno = 1088 (0x440), region = 44  ;;  %s1793_s17 = sshll.u32 (!%p3403_p2), %s325_s30, 7 }
  0x90   : > { %s324_s23 = scalar_lea.sflag (!%p3403_p2), [#allocation4], %s323_s24  ;;  %s3088_s13 = scalar_lea.vmem (!%p3403_p2), [#allocation3], %s1793_s17 }
  0x91   : > { %p3404_p12 = scmp.ne.s32.totalorder (!%p3403_p2), %s3387_s18, 0 }
  0x96   : > { %2691 = dma.done.wait (%p3404_p12), %s324_s23, 2048  }
  0x97   : > { %2693 = vsyncadd (%p3404_p12), %s324_s23, 4294965248  ;;  %p3405_p7 = scmp.eq.s32.totalorder %s2889_s11, 0 }
  0x99   : > { %2695 = dma.done.wait (%p3405_p7), [#allocation7], 2048   ;;  %p3406_p4 = pmov %p3405_p7 }
  0x9a   : > { %s338_s12 = sand.u32 1, %s2728_s25   ;;  %p3407_p13 = scmp.ne.s32.totalorder %s3391_s7, 0 }
  0x9b   : > { %2697 = vsyncadd (%p3406_p4), [#allocation7], 4294965248  ;;  %s1795_s20 = sshll.u32 %s338_s12, 8 }
  0x9c   : > { %s3099_s3 = scalar_lea.vmem [#allocation8], %s1795_s20 }
  0x9d   : > { %2699 = dma.done.wait (%p3407_p13), %s324_s23, 4096  }
  0x9e   : > { %2701 = vsyncadd (%p3407_p13), %s324_s23, 4294963200  ;;  %p3408_p5 = pmov %p3406_p4 }
  0x9f   : > { %p3409_p9 = pmov %p3406_p4 }
  0xa0   : > { %2703 = dma.done.wait (%p3408_p5), [#allocation7], 4096  }
  0xa1   : > { %2705 = vsyncadd (%p3409_p9), [#allocation7], 4294963200  ;;  %s3410_s18 = sld [smem:[#allocation20_spill]] }
  0xa2   : > { %s3411_s21 = sld [smem:[#allocation22_spill]] }
  0xa7   : > { %s375_s6 = sand.u32 1, %s3410_s18  }
  0xa8   : > { %s1797_s27 = sshll.u32 %s375_s6, 2  ;;  %p1798_p11 = scmp.ne.s32.totalorder %s3411_s21, 0 }
  0xa9   : > { %s3112_s14 = scalar_lea.vmem [#allocation10], %s1797_s27  ;;  %v2779_v0 = vmov (!%p1798_p11), 0.0  }
  0xaa   : > { %384 = sbr.rel (%p1798_p11) target bundleno = 177 (0xb1), region = 64  ;;  %385 = vst [vmem:[#allocation2] sm:$0x1] (!%p1798_p11), %v2779_v0  ;;  %386 = vst [vmem:[#allocation2 + $0x1] sm:$0x1] (!%p1798_p11), %v2779_v0 }
  0xab   : > { %387 = vst [vmem:[#allocation2 + $0x2] sm:$0x1] (!%p1798_p11), %v2779_v0  ;;  %388 = vst [vmem:[#allocation2 + $0x3] sm:$0x1] (!%p1798_p11), %v2779_v0 }
  0xb1 PF: > { %v2418_v1 = vld [vmem:[#allocation6 + $0x40] sm:$0xff]   ;;  %v2420_v3 = vld [vmem:[#allocation6 + $0x48] sm:$0xff]   ;;  %v2422_v5 = vld [vmem:[#allocation6 + $0x50] sm:$0xff]   ;;  %v2780_v35 = vmov 0.0   ;;  %vm2781_vm0 = vmmov 0   ;;  %s3412_s7 = sld [smem:[#allocation22_spill]] }
  0xb2   : > { %v2419_v2 = vld [vmem:[#allocation6] sm:$0xff]   ;;  %1956 = vmatprep.subr.bf16.mxu0 %v2418_v1  ;;  %v2421_v4 = vld [vmem:[#allocation6 + $0x8] sm:$0xff]   ;;  %v2423_v6 = vld [vmem:[#allocation6 + $0x10] sm:$0xff]   ;;  %2092 = vmatprep.subr.bf16.mxu1 %v2780_v35 }
  0xb3   : > { %1957 = vmatpush3.bf16.msra.mxu0 %v2419_v2  ;;  %v2424_v7 = vld [vmem:[#allocation6 + $0x58] sm:$0xff]   ;;  %v2426_v9 = vld [vmem:[#allocation6 + $0x60] sm:$0xff]   ;;  %v2428_v11 = vld [vmem:[#allocation6 + $0x68] sm:$0xff]   ;;  %2108 = vmatprep.mubr.msk.bf16.mxu1 %vm2781_vm0, %v2780_v35 }
  0xb4   : > { %1958 = vmatprep.subr.bf16.mxu0 %v2420_v3  ;;  %v2425_v8 = vld [vmem:[#allocation6 + $0x18] sm:$0xff]   ;;  %v2427_v10 = vld [vmem:[#allocation6 + $0x20] sm:$0xff]   ;;  %v2429_v13 = vld [vmem:[#allocation6 + $0x28] sm:$0xff]  }
  0xb5   : > { %v2436_v12 = vld [vmem:[%s3088_s13 + $0x4] ss:$8 sps:$4 sm:$0xff]   ;;  %v2430_v14 = vld [vmem:[#allocation6 + $0x70] sm:$0xff]   ;;  %v2432_v16 = vld [vmem:[#allocation6 + $0x78] sm:$0xff]  }
  0xb6   : > { %645 = vmatprep.mubr.bf16.mxu0 %v2436_v12  ;;  %v2431_v15 = vld [vmem:[#allocation6 + $0x30] sm:$0xff]   ;;  %v2433_v17 = vld [vmem:[#allocation6 + $0x38] sm:$0xff]   ;;  %v2434_v18 = vld [vmem:[%s3088_s13] ss:$8 sps:$4 sm:$0xff]  }
  0xb7   : > { %1959 = vmatpush3.bf16.msra.mxu0 %v2421_v4  ;;  %v2437_v19 = vld [vmem:[%s3088_s13 + $0x14] ss:$8 sps:$4 sm:$0xff]   ;;  %v2439_v20 = vld [vmem:[%s3088_s13 + $0x10] ss:$8 sps:$4 sm:$0xff]   ;;  %v2440_v21 = vld [vmem:[%s3088_s13 + $0x24] ss:$8 sps:$4 sm:$0xff]  }
  0xb8   : > { %1960 = vmatprep.subr.bf16.mxu0 %v2422_v5  ;;  %v2442_v22 = vld [vmem:[%s3088_s13 + $0x20] ss:$8 sps:$4 sm:$0xff]   ;;  %v2443_v23 = vld [vmem:[%s3088_s13 + $0x34] ss:$8 sps:$4 sm:$0xff]   ;;  %v2445_v24 = vld [vmem:[%s3088_s13 + $0x30] ss:$8 sps:$4 sm:$0xff]  }
  0xb9   : > { %v2446_v25 = vld [vmem:[%s3088_s13 + $0x44] ss:$8 sps:$4 sm:$0xff]   ;;  %v2448_v26 = vld [vmem:[%s3088_s13 + $0x40] ss:$8 sps:$4 sm:$0xff]   ;;  %v2449_v27 = vld [vmem:[%s3088_s13 + $0x54] ss:$8 sps:$4 sm:$0xff]  }
  0xba   : > { %v2451_v28 = vld [vmem:[%s3088_s13 + $0x50] ss:$8 sps:$4 sm:$0xff]   ;;  %v2452_v29 = vld [vmem:[%s3088_s13 + $0x64] ss:$8 sps:$4 sm:$0xff]   ;;  %v2454_v30 = vld [vmem:[%s3088_s13 + $0x60] ss:$8 sps:$4 sm:$0xff]  }
  0xbb   : > { %1961 = vmatpush3.bf16.msra.mxu0 %v2423_v6  ;;  %v2455_v31 = vld [vmem:[%s3088_s13 + $0x74] ss:$8 sps:$4 sm:$0xff]   ;;  %v2457_v32 = vld [vmem:[%s3088_s13 + $0x70] ss:$8 sps:$4 sm:$0xff]   ;;  %v2458_v33 = vld [vmem:[%s3099_s3] sm:$0xff]   ;;  %p1911_p0 = scmp.ne.s32.totalorder %s3412_s7, 1 }
  0xbc   : > { %1962 = vmatprep.subr.bf16.mxu0 %v2424_v7  ;;  %v2459_v34 = vld [vmem:[%s3099_s3 + $0x80] sm:$0xff]   ;;  %2093 = vmatpush3.bf16.msra.mxu1 %v2458_v33  ;;  %v2460_v36 = vld [vmem:[%s3099_s3 + $0x8] sm:$0xff]   ;;  %v2462_v38 = vld [vmem:[%s3099_s3 + $0x10] sm:$0xff]   ;;  %vm2783_vm1 = vmmov (!%p1911_p0), 0   ;;  %s3413_s5 = sld [smem:[#allocation31_spill]] (!%p1911_p0)  ;;  %s3414_s12 = sld [smem:[#allocation32_spill]] (!%p1911_p0) }
  0xbd   : > { %v2461_v37 = vld [vmem:[%s3099_s3 + $0x88] sm:$0xff]   ;;  %2094 = vmatprep.subr.bf16.mxu1 %v2780_v35  ;;  %v2463_v39 = vld [vmem:[%s3099_s3 + $0x90] sm:$0xff]   ;;  %v2464_v40 = vld [vmem:[%s3099_s3 + $0x18] sm:$0xff]  }
  0xbe   : > { %v2465_v41 = vld [vmem:[%s3099_s3 + $0x98] sm:$0xff]   ;;  %v2466_v42 = vld [vmem:[%s3099_s3 + $0x20] sm:$0xff]   ;;  %v2468_v44 = vld [vmem:[%s3099_s3 + $0x28] sm:$0xff]  }
  0xbf   : > { %1963 = vmatpush3.bf16.msra.mxu0 %v2425_v8  ;;  %v2467_v43 = vld [vmem:[%s3099_s3 + $0xa0] sm:$0xff]   ;;  %v2469_v45 = vld [vmem:[%s3099_s3 + $0xa8] sm:$0xff]   ;;  %v2470_v46 = vld [vmem:[%s3099_s3 + $0x30] sm:$0xff]  }
  0xc0   : > { %1964 = vmatprep.subr.bf16.mxu0 %v2426_v9  ;;  %2095 = vmatpush3.bf16.msra.mxu1 %v2460_v36  ;;  %v2471_v47 = vld [vmem:[%s3099_s3 + $0xb0] sm:$0xff]   ;;  %v2472_v48 = vld [vmem:[%s3099_s3 + $0x38] sm:$0xff]   ;;  %v2474_v36 = vld [vmem:[%s3099_s3 + $0x40] sm:$0xff]  }
  0xc1   : > { %2096 = vmatprep.subr.bf16.mxu1 %v2780_v35  ;;  %v2473_v55 = vld [vmem:[%s3099_s3 + $0xb8] sm:$0xff]  }
  0xc3   : > { %1965 = vmatpush3.bf16.msra.mxu0 %v2427_v10 }
  0xc4   : > { %1966 = vmatprep.subr.bf16.mxu0 %v2428_v11  ;;  %2097 = vmatpush3.bf16.msra.mxu1 %v2462_v38 }
  0xc5   : > { %2098 = vmatprep.subr.bf16.mxu1 %v2780_v35 }
  0xc7   : > { %1967 = vmatpush3.bf16.msra.mxu0 %v2429_v13 }
  0xc8   : > { %1968 = vmatprep.subr.bf16.mxu0 %v2430_v14  ;;  %2099 = vmatpush3.bf16.msra.mxu1 %v2464_v40  ;;  %v2476_v40 = vld [vmem:[%s3099_s3 + $0x50] sm:$0xff]  }
  0xc9   : > { %2100 = vmatprep.subr.bf16.mxu1 %v2780_v35 }
  0xcb   : > { %1969 = vmatpush3.bf16.msra.mxu0 %v2431_v15 }
  0xcc   : > { %1970 = vmatprep.subr.bf16.mxu0 %v2432_v16  ;;  %2101 = vmatpush3.bf16.msra.mxu1 %v2466_v42  ;;  %v2478_v42 = vld [vmem:[%s3099_s3 + $0x60] sm:$0xff]  }
  0xcd   : > { %2102 = vmatprep.subr.bf16.mxu1 %v2780_v35 }
  0xcf   : > { %1971 = vmatpush3.bf16.msra.mxu0 %v2433_v17 }
  0xd0   : > { %2132 = vmatprep.subr.bf16.mxu0 %v2780_v35  ;;  %2103 = vmatpush3.bf16.msra.mxu1 %v2468_v44  ;;  %v2480_v44 = vld [vmem:[%s3099_s3 + $0x70] sm:$0xff]  }
  0xd1   : > { %2104 = vmatprep.subr.bf16.mxu1 %v2780_v35 }
  0xd2   : > { %646 = vmatmul.mubr.bf16.vlgmr.msra.gmra.mrb[0].mxu0 %v2434_v18 }
  0xd3   : > { %653 = vmatprep.mubr.bf16.mxu0 %v2437_v19  ;;  %2133 = vmatpush3.bf16.msra.mxu0 %v2459_v34 }
  0xd4   : > { %2134 = vmatprep.subr.bf16.mxu0 %v2780_v35  ;;  %2105 = vmatpush3.bf16.msra.mxu1 %v2470_v46  ;;  %v2482_v46 = vld [vmem:[%s3099_s3 + $0xc0] sm:$0xff]  }
  0xd5   : > { %2106 = vmatprep.subr.bf16.mxu1 %v2780_v35 }
  0xd7   : > { %2135 = vmatpush3.bf16.msra.mxu0 %v2461_v37 }
  0xd8   : > { %2136 = vmatprep.subr.bf16.mxu0 %v2780_v35  ;;  %2107 = vmatpush3.bf16.msra.mxu1 %v2472_v48  ;;  %v2483_v48 = vld [vmem:[%s3099_s3 + $0xc8] sm:$0xff]  }
  0xd9   : > { %2112 = vmatprep.subr.bf16.mxu1 %v2780_v35 }
  0xda   : > { %654 = vmatmul.mubr.bf16.gmra.mrb[4].mxu0 %v2439_v20 }
  0xdb   : > { %661 = vmatprep.mubr.bf16.mxu0 %v2440_v21  ;;  %2137 = vmatpush3.bf16.msra.mxu0 %v2463_v39  ;;  %v2475_v39 = vld [vmem:[%s3099_s3 + $0x48] sm:$0xff]  }
  0xdc   : > { %2138 = vmatprep.subr.bf16.mxu0 %v2780_v35 }
  0xdf   : > { %2139 = vmatpush3.bf16.msra.mxu0 %v2465_v41  ;;  %v2477_v41 = vld [vmem:[%s3099_s3 + $0x58] sm:$0xff]  }
  0xe0   : > { %2140 = vmatprep.subr.bf16.mxu0 %v2780_v35 }
  0xe2   : > { %662 = vmatmul.mubr.bf16.gmra.mrb[8].mxu0 %v2442_v22 }
  0xe3   : > { %669 = vmatprep.mubr.bf16.mxu0 %v2443_v23  ;;  %2141 = vmatpush3.bf16.msra.mxu0 %v2467_v43  ;;  %v2479_v43 = vld [vmem:[%s3099_s3 + $0x68] sm:$0xff]  }
  0xe4   : > { %2142 = vmatprep.subr.bf16.mxu0 %v2780_v35 }
  0xe7   : > { %2143 = vmatpush3.bf16.msra.mxu0 %v2469_v45  ;;  %v2481_v45 = vld [vmem:[%s3099_s3 + $0x78] sm:$0xff]  }
  0xe8   : > { %2144 = vmatprep.subr.bf16.mxu0 %v2780_v35 }
  0xea   : > { %670 = vmatmul.mubr.bf16.gmra.mrb[12].mxu0 %v2445_v24 }
  0xeb   : > { %677 = vmatprep.mubr.bf16.mxu0 %v2446_v25  ;;  %2145 = vmatpush3.bf16.msra.mxu0 %v2471_v47 }
  0xec   : > { %2146 = vmatprep.subr.bf16.mxu0 %v2780_v35 }
  0xef   : > { %2147 = vmatpush3.bf16.msra.mxu0 %v2473_v55 }
  0xf2   : > { %678 = vmatmul.mubr.bf16.gmra.mrb[16].mxu0 %v2448_v26 }
  0xf3   : > { %685 = vmatprep.mubr.bf16.mxu0 %v2449_v27 }
  0xfa   : > { %686 = vmatmul.mubr.bf16.gmra.mrb[20].mxu0 %v2451_v28 }
  0xfb   : > { %693 = vmatprep.mubr.bf16.mxu0 %v2452_v29 }
 0x102   : > { %694 = vmatmul.mubr.bf16.gmra.mrb[24].mxu0 %v2454_v30 }
 0x103   : > { %701 = vmatprep.mubr.bf16.mxu0 %v2455_v31 }
 0x10a   : > { %702 = vmatmul.mubr.bf16.gmra.mrb[28].mxu0 %v2457_v32 }
 0x10b   : > { %2148 = vmatprep.mubr.msk.bf16.mxu0 %vm2781_vm0, %v2780_v35 }
 0x1a5   : > { %v1972_v49 = vpop.f32.mrb[0].mxu0 }
 0x1a6   : > { %v1973_v50 = vpop.f32.mrb[1].mxu0 }
 0x1a7   : > { %v1975_v51 = vpop.f32.mrb[2].mxu0  ;;  %v1974_v52 = vadd.f32 %v1973_v50, %v1972_v49  ;;  %v2484_v49 = vld [vmem:[%s3099_s3 + $0xd0] sm:$0xff]   ;;  %v2485_v50 = vld [vmem:[%s3099_s3 + $0xd8] sm:$0xff]  }
 0x1a8   : > { %v1976_v53 = vpop.f32.mrb[3].mxu0 }
 0x1a9   : > { %v1977_v54 = vadd.f32 %v1976_v53, %v1975_v51  ;;  %710 = vxpose.xlu0.b32.start [1/16] (narrow) %v1974_v52, 8  ;;  %v2486_v51 = vld [vmem:[%s3099_s3 + $0xe0] sm:$0xff]   ;;  %v2487_v52 = vld [vmem:[%s3099_s3 + $0xe8] sm:$0xff]   ;;  %v2488_v53 = vld [vmem:[%s3099_s3 + $0xf0] sm:$0xff]  }
 0x1ad   : > { %v1978_v56 = vpop.f32.mrb[4].mxu0  ;;  %711 = vxpose.xlu0.b32.cont [2/16] (narrow) %v1977_v54, 8  ;;  %v2489_v54 = vld [vmem:[%s3099_s3 + $0xf8] sm:$0xff]  }
 0x1ae   : > { %v1979_v57 = vpop.f32.mrb[5].mxu0 }
 0x1af   : > { %v1980_v58 = vadd.f32 %v1979_v57, %v1978_v56  ;;  %v1981_v59 = vpop.f32.mrb[6].mxu0  ;;  %v743_v56 = vld [vmem:[#allocation2] sm:$0x1] }
 0x1b0   : > { %v1982_v60 = vpop.f32.mrb[7].mxu0 }
 0x1b1   : > { %v1983_v61 = vadd.f32 %v1982_v60, %v1981_v59  ;;  %712 = vxpose.xlu0.b32.cont [3/16] (narrow) %v1980_v58, 8  ;;  %v964_v58 = vld [vmem:[#allocation2 + $0x2] sm:$0x1] }
 0x1b5   : > { %v1984_v62 = vpop.f32.mrb[8].mxu0  ;;  %713 = vxpose.xlu0.b32.cont [4/16] (narrow) %v1983_v61, 8 }
 0x1b6   : > { %v1985_v63 = vpop.f32.mrb[9].mxu0 }
 0x1b7   : > { %v1986_v0 = vadd.f32 %v1985_v63, %v1984_v62  ;;  %v1987_v1 = vpop.f32.mrb[10].mxu0 }
 0x1b8   : > { %v1988_v2 = vpop.f32.mrb[11].mxu0 }
 0x1b9   : > { %v1989_v3 = vadd.f32 %v1988_v2, %v1987_v1  ;;  %714 = vxpose.xlu0.b32.cont [5/16] (narrow) %v1986_v0, 8 }
 0x1bd   : > { %v1990_v4 = vpop.f32.mrb[12].mxu0  ;;  %715 = vxpose.xlu0.b32.cont [6/16] (narrow) %v1989_v3, 8 }
 0x1be   : > { %v1991_v5 = vpop.f32.mrb[13].mxu0 }
 0x1bf   : > { %v1992_v6 = vadd.f32 %v1991_v5, %v1990_v4  ;;  %v1993_v7 = vpop.f32.mrb[14].mxu0  ;;  %v851_v4 = vld [vmem:[#allocation2 + $0x1] sm:$0x1] }
 0x1c0   : > { %v1994_v8 = vpop.f32.mrb[15].mxu0 }
 0x1c1   : > { %v1995_v9 = vadd.f32 %v1994_v8, %v1993_v7  ;;  %716 = vxpose.xlu0.b32.cont [7/16] (narrow) %v1992_v6, 8 }
 0x1c5   : > { %v1996_v10 = vpop.f32.mrb[16].mxu0  ;;  %717 = vxpose.xlu0.b32.cont [8/16] (narrow) %v1995_v9, 8  ;;  %v1076_v9 = vld [vmem:[#allocation2 + $0x3] sm:$0x1] }
 0x1c6   : > { %v1997_v11 = vpop.f32.mrb[17].mxu0 }
 0x1c7   : > { %v1998_v12 = vadd.f32 %v1997_v11, %v1996_v10  ;;  %v1999_v13 = vpop.f32.mrb[18].mxu0 }
 0x1c8   : > { %v2000_v14 = vpop.f32.mrb[19].mxu0 }
 0x1c9   : > { %v2001_v15 = vadd.f32 %v2000_v14, %v1999_v13  ;;  %718 = vxpose.xlu0.b32.cont [9/16] (narrow) %v1998_v12, 8 }
 0x1cd   : > { %v2002_v16 = vpop.f32.mrb[20].mxu0  ;;  %719 = vxpose.xlu0.b32.cont [10/16] (narrow) %v2001_v15, 8  ;;  %v2490_v15 = vld [vmem:[#allocation9] sm:$0xff] (!%p1911_p0)  }
 0x1ce   : > { %v2003_v17 = vpop.f32.mrb[21].mxu0 }
 0x1cf   : > { %v2004_v18 = vadd.f32 %v2003_v17, %v2002_v16  ;;  %v2005_v19 = vpop.f32.mrb[22].mxu0  ;;  %v2782_v16 = vmov (!%p1911_p0), 0.0   ;;  %v2491_v17 = vld [vmem:[#allocation9 + $0x40] sm:$0xff] (!%p1911_p0)  }
 0x1d0   : > { %v2006_v20 = vpop.f32.mrb[23].mxu0  ;;  %2172 = vmatprep.subr.bf16.mxu0 (!%p1911_p0), %v2782_v16 }
 0x1d1   : > { %v2007_v21 = vadd.f32 %v2006_v20, %v2005_v19  ;;  %720 = vxpose.xlu0.b32.cont [11/16] (narrow) %v2004_v18, 8  ;;  %v2492_v18 = vld [vmem:[#allocation9 + $0x8] sm:$0xff] (!%p1911_p0)   ;;  %v2494_v20 = vld [vmem:[#allocation9 + $0x10] sm:$0xff] (!%p1911_p0)  }
 0x1d2   : > { %v2493_v19 = vld [vmem:[#allocation9 + $0x48] sm:$0xff] (!%p1911_p0)  }
 0x1d5   : > { %v2008_v22 = vpop.f32.mrb[24].mxu0  ;;  %721 = vxpose.xlu0.b32.cont [12/16] (narrow) %v2007_v21, 8  ;;  %v2495_v21 = vld [vmem:[#allocation9 + $0x50] sm:$0xff] (!%p1911_p0)  }
 0x1d6   : > { %v2009_v23 = vpop.f32.mrb[25].mxu0 }
 0x1d7   : > { %v2010_v24 = vadd.f32 %v2009_v23, %v2008_v22  ;;  %v2011_v25 = vpop.f32.mrb[26].mxu0  ;;  %v2496_v22 = vld [vmem:[#allocation9 + $0x18] sm:$0xff] (!%p1911_p0)  }
 0x1d8   : > { %v2012_v26 = vpop.f32.mrb[27].mxu0  ;;  %v2497_v23 = vld [vmem:[#allocation9 + $0x58] sm:$0xff] (!%p1911_p0)  }
 0x1d9   : > { %v2013_v27 = vadd.f32 %v2012_v26, %v2011_v25  ;;  %722 = vxpose.xlu0.b32.cont [13/16] (narrow) %v2010_v24, 8  ;;  %v2498_v24 = vld [vmem:[#allocation9 + $0x20] sm:$0xff] (!%p1911_p0)   ;;  %v2500_v26 = vld [vmem:[#allocation9 + $0x28] sm:$0xff] (!%p1911_p0)  }
 0x1da   : > { %v2499_v25 = vld [vmem:[#allocation9 + $0x60] sm:$0xff] (!%p1911_p0)  }
 0x1dd   : > { %v2014_v28 = vpop.f32.mrb[28].mxu0  ;;  %723 = vxpose.xlu0.b32.cont [14/16] (narrow) %v2013_v27, 8  ;;  %v2501_v27 = vld [vmem:[#allocation9 + $0x68] sm:$0xff] (!%p1911_p0)  }
 0x1de   : > { %v2015_v29 = vpop.f32.mrb[29].mxu0 }
 0x1df   : > { %v2016_v30 = vadd.f32 %v2015_v29, %v2014_v28  ;;  %v2017_v31 = vpop.f32.mrb[30].mxu0  ;;  %v2502_v28 = vld [vmem:[#allocation9 + $0x30] sm:$0xff] (!%p1911_p0)  }
 0x1e0   : > { %v2018_v32 = vpop.f32.mrb[31].mxu0 }
 0x1e1   : > { %v2019_v33 = vadd.f32 %v2018_v32, %v2017_v31  ;;  %724 = vxpose.xlu0.b32.cont [15/16] (narrow) %v2016_v30, 8  ;;  %v2503_v30 = vld [vmem:[#allocation9 + $0x70] sm:$0xff] (!%p1911_p0)   ;;  %v1191_v31 = vld [vmem:[%s3413_s5] sm:$0x1] (!%p1911_p0) }
 0x1e5   : > { %725 = vxpose.xlu0.b32.end [16/16] (narrow) %v2019_v33, 8  ;;  %v1920_v33 = vld [vmem:[%s3413_s5 + $0x1] sm:$0x1] (!%p1911_p0) }
 0x229   : > { %v726_v34 = vpop.trf.xlu0 }
 0x22a   : > { %v742_v37 = vpack.c.bf16 %v726_v34, %v726_v34 }
 0x22c   : > { %v983_v38 = vrot.slane %v742_v37, 1  ;;  %2109 = vmatmul.mubr.bf16.vlgmr.msra.gmra.mrb[0].mxu1 %v742_v37  ;;  %v870_v47 = vshrl.u32 %v742_v37, 16 }
 0x22d   : > { %2113 = vmatpush3.bf16.msra.mxu1 %v2474_v36  ;;  %2128 = vmatprep.mubr.msk.bf16.mxu1 %vm2781_vm0, %v2780_v35  ;;  %v2504_v36 = vld [vmem:[#allocation9 + $0x38] sm:$0xff] (!%p1911_p0)  }
 0x22e   : > { %2149 = vmatmul.mubr.bf16.vlgmr.msra.gmra.mrb[32].mxu0 %v983_v38  ;;  %2114 = vmatprep.subr.bf16.mxu1 %v2780_v35  ;;  %v1094_v55 = vrot.slane %v870_v47, 1  ;;  %v2505_v38 = vld [vmem:[#allocation9 + $0x78] sm:$0xff] (!%p1911_p0)  }
 0x22f   : > { %2173 = vmatpush3.bf16.msra.mxu0 (!%p1911_p0), %v2490_v15  ;;  %2188 = vmatprep.mubr.msk.bf16.mxu0 (!%p1911_p0), %vm2783_vm1, %v2782_v16 }
 0x230   : > { %2174 = vmatprep.subr.bf16.mxu0 (!%p1911_p0), %v2782_v16 }
 0x231   : > { %2115 = vmatpush3.bf16.msra.mxu1 %v2475_v39 }
 0x232   : > { %2116 = vmatprep.subr.bf16.mxu1 %v2780_v35 }
 0x233   : > { %2175 = vmatpush3.bf16.msra.mxu0 (!%p1911_p0), %v2492_v18 }
 0x234   : > { %2176 = vmatprep.subr.bf16.mxu0 (!%p1911_p0), %v2782_v16 }
 0x235   : > { %2117 = vmatpush3.bf16.msra.mxu1 %v2476_v40 }
 0x236   : > { %2118 = vmatprep.subr.bf16.mxu1 %v2780_v35 }
 0x237   : > { %2177 = vmatpush3.bf16.msra.mxu0 (!%p1911_p0), %v2494_v20 }
 0x238   : > { %2178 = vmatprep.subr.bf16.mxu0 (!%p1911_p0), %v2782_v16 }
 0x239   : > { %2119 = vmatpush3.bf16.msra.mxu1 %v2477_v41  ;;  %v2506_v41 = vld [vmem:[#allocation9 + $0x80] sm:$0xff] (!%p1911_p0)  }
 0x23a   : > { %2120 = vmatprep.subr.bf16.mxu1 %v2780_v35 }
 0x23b   : > { %2179 = vmatpush3.bf16.msra.mxu0 (!%p1911_p0), %v2496_v22 }
 0x23c   : > { %2180 = vmatprep.subr.bf16.mxu0 (!%p1911_p0), %v2782_v16 }
 0x23d   : > { %2121 = vmatpush3.bf16.msra.mxu1 %v2478_v42  ;;  %v2507_v42 = vld [vmem:[#allocation9 + $0xc0] sm:$0xff] (!%p1911_p0)  }
 0x23e   : > { %2122 = vmatprep.subr.bf16.mxu1 %v2780_v35 }
 0x23f   : > { %2181 = vmatpush3.bf16.msra.mxu0 (!%p1911_p0), %v2498_v24 }
 0x240   : > { %2182 = vmatprep.subr.bf16.mxu0 (!%p1911_p0), %v2782_v16 }
 0x241   : > { %2123 = vmatpush3.bf16.msra.mxu1 %v2479_v43  ;;  %v2508_v43 = vld [vmem:[#allocation9 + $0x88] sm:$0xff] (!%p1911_p0)  }
 0x242   : > { %2124 = vmatprep.subr.bf16.mxu1 %v2780_v35 }
 0x243   : > { %2183 = vmatpush3.bf16.msra.mxu0 (!%p1911_p0), %v2500_v26 }
 0x244   : > { %2184 = vmatprep.subr.bf16.mxu0 (!%p1911_p0), %v2782_v16 }
 0x245   : > { %2125 = vmatpush3.bf16.msra.mxu1 %v2480_v44  ;;  %v2509_v44 = vld [vmem:[#allocation9 + $0xc8] sm:$0xff] (!%p1911_p0)  }
 0x246   : > { %2126 = vmatprep.subr.bf16.mxu1 %v2780_v35 }
 0x247   : > { %2185 = vmatpush3.bf16.msra.mxu0 (!%p1911_p0), %v2502_v28 }
 0x248   : > { %2186 = vmatprep.subr.bf16.mxu0 (!%p1911_p0), %v2782_v16 }
 0x249   : > { %2127 = vmatpush3.bf16.msra.mxu1 %v2481_v45  ;;  %v2510_v45 = vld [vmem:[#allocation9 + $0x90] sm:$0xff] (!%p1911_p0)  }
 0x24a   : > { %2152 = vmatprep.subr.bf16.mxu1 %v2780_v35 }
 0x24b   : > { %2187 = vmatpush3.bf16.msra.mxu0 (!%p1911_p0), %v2504_v36 }
 0x24c   : > { %2129 = vmatmul.mubr.bf16.vlgmr.msra.gmra.mrb[4].mxu1 %v870_v47  ;;  %2212 = vmatprep.subr.bf16.mxu0 (!%p1911_p0), %v2782_v16  ;;  %v2512_v47 = vld [vmem:[#allocation9 + $0x98] sm:$0xff] (!%p1911_p0)  }
 0x24d   : > { %2153 = vmatpush3.bf16.msra.mxu1 %v2482_v46  ;;  %2168 = vmatprep.mubr.msk.bf16.mxu1 %vm2781_vm0, %v2780_v35  ;;  %v2511_v46 = vld [vmem:[#allocation9 + $0xd0] sm:$0xff] (!%p1911_p0)  }
 0x24e   : > { %2154 = vmatprep.subr.bf16.mxu1 %v2780_v35 }
 0x251   : > { %2155 = vmatpush3.bf16.msra.mxu1 %v2483_v48  ;;  %v2513_v48 = vld [vmem:[#allocation9 + $0xd8] sm:$0xff] (!%p1911_p0)  }
 0x252   : > { %2156 = vmatprep.subr.bf16.mxu1 %v2780_v35 }
 0x255   : > { %2157 = vmatpush3.bf16.msra.mxu1 %v2484_v49  ;;  %v2514_v49 = vld [vmem:[#allocation9 + $0xa0] sm:$0xff] (!%p1911_p0)  }
 0x256   : > { %2158 = vmatprep.subr.bf16.mxu1 %v2780_v35 }
 0x259   : > { %2159 = vmatpush3.bf16.msra.mxu1 %v2485_v50  ;;  %v2515_v50 = vld [vmem:[#allocation9 + $0xe0] sm:$0xff] (!%p1911_p0)  }
 0x25a   : > { %2160 = vmatprep.subr.bf16.mxu1 %v2780_v35 }
 0x25d   : > { %2161 = vmatpush3.bf16.msra.mxu1 %v2486_v51  ;;  %v2516_v51 = vld [vmem:[#allocation9 + $0xa8] sm:$0xff] (!%p1911_p0)  }
 0x25e   : > { %2162 = vmatprep.subr.bf16.mxu1 %v2780_v35 }
 0x261   : > { %2163 = vmatpush3.bf16.msra.mxu1 %v2487_v52  ;;  %v2517_v52 = vld [vmem:[#allocation9 + $0xe8] sm:$0xff] (!%p1911_p0)  }
 0x262   : > { %2164 = vmatprep.subr.bf16.mxu1 %v2780_v35 }
 0x265   : > { %2165 = vmatpush3.bf16.msra.mxu1 %v2488_v53  ;;  %v2518_v53 = vld [vmem:[#allocation9 + $0xb0] sm:$0xff] (!%p1911_p0)  }
 0x266   : > { %2166 = vmatprep.subr.bf16.mxu1 %v2780_v35 }
 0x269   : > { %2167 = vmatpush3.bf16.msra.mxu1 %v2489_v54 }
 0x26a   : > { %2192 = vmatprep.subr.bf16.mxu1 (!%p1911_p0), %v2782_v16 }
 0x26c   : > { %2169 = vmatmul.mubr.bf16.vlgmr.msra.gmra.mrb[8].mxu1 %v1094_v55  ;;  %v1930_v55 = vld [vmem:[%s3413_s5 + $0x2] sm:$0x1] (!%p1911_p0) }
 0x26d   : > { %2193 = vmatpush3.bf16.msra.mxu1 (!%p1911_p0), %v2491_v17  ;;  %2208 = vmatprep.mubr.msk.bf16.mxu1 (!%p1911_p0), %vm2783_vm1, %v2782_v16 }
 0x26e   : > { %2194 = vmatprep.subr.bf16.mxu1 (!%p1911_p0), %v2782_v16 }
 0x271   : > { %2195 = vmatpush3.bf16.msra.mxu1 (!%p1911_p0), %v2493_v19 }
 0x272   : > { %2196 = vmatprep.subr.bf16.mxu1 (!%p1911_p0), %v2782_v16 }
 0x275   : > { %2197 = vmatpush3.bf16.msra.mxu1 (!%p1911_p0), %v2495_v21 }
 0x276   : > { %2198 = vmatprep.subr.bf16.mxu1 (!%p1911_p0), %v2782_v16 }
 0x279   : > { %2199 = vmatpush3.bf16.msra.mxu1 (!%p1911_p0), %v2497_v23 }
 0x27a   : > { %2200 = vmatprep.subr.bf16.mxu1 (!%p1911_p0), %v2782_v16 }
 0x27d   : > { %2201 = vmatpush3.bf16.msra.mxu1 (!%p1911_p0), %v2499_v25 }
 0x27e   : > { %2202 = vmatprep.subr.bf16.mxu1 (!%p1911_p0), %v2782_v16 }
 0x281   : > { %2203 = vmatpush3.bf16.msra.mxu1 (!%p1911_p0), %v2501_v27 }
 0x282   : > { %2204 = vmatprep.subr.bf16.mxu1 (!%p1911_p0), %v2782_v16 }
 0x285   : > { %2205 = vmatpush3.bf16.msra.mxu1 (!%p1911_p0), %v2503_v30 }
 0x286   : > { %2206 = vmatprep.subr.bf16.mxu1 (!%p1911_p0), %v2782_v16 }
 0x289   : > { %2207 = vmatpush3.bf16.msra.mxu1 (!%p1911_p0), %v2505_v38 }
 0x28a   : > { %2232 = vmatprep.subr.bf16.mxu1 (!%p1911_p0), %v2782_v16 }
 0x2ff   : > { %v842_v57 = vpop.f32.mrb[0].mxu1 }
 0x300   : > { %v848_v59 = vadd.f32 %v842_v57, %v743_v56  ;;  %v2110_v60 = vpop.f32.mrb[1].mxu1  ;;  %v2519_v56 = vld [vmem:[#allocation9 + $0xf0] sm:$0xff] (!%p1911_p0)  }
 0x301   : > { %v845_v61 = vpop.f32.mrb[2].mxu1  ;;  %v1067_v62 = vpop.f32.mrb[32].mxu0  ;;  %v2520_v60 = vld [vmem:[#allocation9 + $0xb8] sm:$0xff] (!%p1911_p0)  }
 0x302   : > { %849 = vst [vmem:[#allocation2] sm:$0x1] %v848_v59  ;;  %v1073_v63 = vadd.f32 %v1067_v62, %v964_v58  ;;  %v2111_v0 = vpop.f32.mrb[3].mxu1  ;;  %v2150_v1 = vpop.f32.mrb[33].mxu0  ;;  %v1940_v58 = vld [vmem:[%s3413_s5 + $0x3] sm:$0x1] (!%p1911_p0) }
 0x303   : > { %v1070_v2 = vpop.f32.mrb[34].mxu0  ;;  %v2521_v62 = vld [vmem:[#allocation9 + $0xf8] sm:$0xff] (!%p1911_p0)  }
 0x304   : > { %1074 = vst [vmem:[#allocation2 + $0x2] sm:$0x1] %v1073_v63  ;;  %v2151_v3 = vpop.f32.mrb[35].mxu0  ;;  %v1210_v1 = vld [vmem:[%s3414_s12] sm:$0x1] (!%p1911_p0) }
 0x305   : > { %v1921_v2 = vld [vmem:[%s3414_s12 + $0x1] sm:$0x1] (!%p1911_p0) }
 0x309   : > { %v1190_v29 = vld [vmem:[#allocation2] sm:$0x1] (!%p1911_p0) }
 0x30a   : > { %v1192_v34 = vadd.f32 (!%p1911_p0), %v1191_v31, %v1190_v29 }
 0x30b   : > { %v1413_v54 = vld [vmem:[#allocation2 + $0x2] sm:$0x1] (!%p1911_p0) }
 0x30c   : > { %v1193_v39 = vpack.c.bf16 (!%p1911_p0), %v1192_v34, %v1192_v34  ;;  %v1416_v59 = vadd.f32 (!%p1911_p0), %v1930_v55, %v1413_v54 }
 0x30e   : > { %2189 = vmatmul.mubr.bf16.vlgmr.msra.gmra.mrb[0].mxu0 (!%p1911_p0), %v1193_v39  ;;  %v1417_v63 = vpack.c.bf16 (!%p1911_p0), %v1416_v59, %v1416_v59 }
 0x30f   : > { %2213 = vmatpush3.bf16.msra.mxu0 (!%p1911_p0), %v2506_v41  ;;  %2228 = vmatprep.mubr.msk.bf16.mxu0 (!%p1911_p0), %vm2783_vm1, %v2782_v16 }
 0x310   : > { %2214 = vmatprep.subr.bf16.mxu0 (!%p1911_p0), %v2782_v16 }
 0x313   : > { %2215 = vmatpush3.bf16.msra.mxu0 (!%p1911_p0), %v2508_v43 }
 0x314   : > { %2216 = vmatprep.subr.bf16.mxu0 (!%p1911_p0), %v2782_v16 }
 0x317   : > { %2217 = vmatpush3.bf16.msra.mxu0 (!%p1911_p0), %v2510_v45 }
 0x318   : > { %2218 = vmatprep.subr.bf16.mxu0 (!%p1911_p0), %v2782_v16 }
 0x31b   : > { %2219 = vmatpush3.bf16.msra.mxu0 (!%p1911_p0), %v2512_v47 }
 0x31c   : > { %2220 = vmatprep.subr.bf16.mxu0 (!%p1911_p0), %v2782_v16 }
 0x31f   : > { %v955_v5 = vpop.f32.mrb[4].mxu1  ;;  %2221 = vmatpush3.bf16.msra.mxu0 (!%p1911_p0), %v2514_v49 }
 0x320   : > { %v961_v35 = vadd.f32 %v955_v5, %v851_v4  ;;  %v2130_v6 = vpop.f32.mrb[5].mxu1  ;;  %2222 = vmatprep.subr.bf16.mxu0 (!%p1911_p0), %v2782_v16 }
 0x321   : > { %v958_v7 = vpop.f32.mrb[6].mxu1 }
 0x322   : > { %962 = vst [vmem:[#allocation2 + $0x1] sm:$0x1] %v961_v35  ;;  %v2131_v8 = vpop.f32.mrb[7].mxu1 }
 0x323   : > { %2223 = vmatpush3.bf16.msra.mxu0 (!%p1911_p0), %v2516_v51 }
 0x324   : > { %2224 = vmatprep.subr.bf16.mxu0 (!%p1911_p0), %v2782_v16 }
 0x327   : > { %2225 = vmatpush3.bf16.msra.mxu0 (!%p1911_p0), %v2518_v53 }
 0x328   : > { %2226 = vmatprep.subr.bf16.mxu0 (!%p1911_p0), %v2782_v16 }
 0x329   : > { %v1300_v32 = vld [vmem:[#allocation2 + $0x1] sm:$0x1] (!%p1911_p0) }
 0x32a   : > { %v1303_v37 = vadd.f32 (!%p1911_p0), %v1920_v33, %v1300_v32 }
 0x32b   : > { %2227 = vmatpush3.bf16.msra.mxu0 (!%p1911_p0), %v2520_v60 }
 0x32c   : > { %v1304_v40 = vpack.c.bf16 (!%p1911_p0), %v1303_v37, %v1303_v37 }
 0x32e   : > { %2209 = vmatmul.mubr.bf16.vlgmr.msra.gmra.mrb[0].mxu1 (!%p1911_p0), %v1304_v40  ;;  %2229 = vmatmul.mubr.bf16.vlgmr.msra.gmra.mrb[4].mxu0 (!%p1911_p0), %v1417_v63 }
 0x32f   : > { %2233 = vmatpush3.bf16.msra.mxu1 (!%p1911_p0), %v2507_v42  ;;  %2248 = vmatprep.mubr.msk.bf16.mxu1 (!%p1911_p0), %vm2783_vm1, %v2782_v16 }
 0x330   : > { %2234 = vmatprep.subr.bf16.mxu1 (!%p1911_p0), %v2782_v16 }
 0x333   : > { %2235 = vmatpush3.bf16.msra.mxu1 (!%p1911_p0), %v2509_v44 }
 0x334   : > { %2236 = vmatprep.subr.bf16.mxu1 (!%p1911_p0), %v2782_v16 }
 0x337   : > { %2237 = vmatpush3.bf16.msra.mxu1 (!%p1911_p0), %v2511_v46 }
 0x338   : > { %2238 = vmatprep.subr.bf16.mxu1 (!%p1911_p0), %v2782_v16 }
 0x33b   : > { %2239 = vmatpush3.bf16.msra.mxu1 (!%p1911_p0), %v2513_v48 }
 0x33c   : > { %1189 = sbr.rel (%p1911_p0) target bundleno = 1061 (0x425), region = 68  ;;  %2240 = vmatprep.subr.bf16.mxu1 (!%p1911_p0), %v2782_v16 }
 0x33f   : > { %v1178_v10 = vpop.f32.mrb[8].mxu1  ;;  %2241 = vmatpush3.bf16.msra.mxu1 (!%p1911_p0), %v2515_v50 }
 0x340   : > { %v1184_v11 = vadd.f32 %v1178_v10, %v1076_v9  ;;  %v2170_v12 = vpop.f32.mrb[9].mxu1  ;;  %2242 = vmatprep.subr.bf16.mxu1 (!%p1911_p0), %v2782_v16 }
 0x341   : > { %v1181_v13 = vpop.f32.mrb[10].mxu1  ;;  %v1931_v12 = vld [vmem:[%s3414_s12 + $0x2] sm:$0x1] (!%p1911_p0) }
 0x342   : > { %1185 = vst [vmem:[#allocation2 + $0x3] sm:$0x1] %v1184_v11  ;;  %v2171_v14 = vpop.f32.mrb[11].mxu1  ;;  %v1941_v13 = vld [vmem:[%s3414_s12 + $0x3] sm:$0x1] (!%p1911_p0) }
 0x343   : > { %2243 = vmatpush3.bf16.msra.mxu1 %v2517_v52 }
 0x344   : > { %2244 = vmatprep.subr.bf16.mxu1 %v2782_v16 }
 0x347   : > { %2245 = vmatpush3.bf16.msra.mxu1 %v2519_v56 }
 0x348   : > { %2246 = vmatprep.subr.bf16.mxu1 %v2782_v16 }
 0x349   : > { %v1526_v57 = vld [vmem:[#allocation2 + $0x3] sm:$0x1] }
 0x34a   : > { %v1529_v61 = vadd.f32 %v1940_v58, %v1526_v57 }
 0x34b   : > { %2247 = vmatpush3.bf16.msra.mxu1 %v2521_v62 }
 0x34c   : > { %v1530_v0 = vpack.c.bf16 %v1529_v61, %v1529_v61 }
 0x34e   : > { %2249 = vmatmul.mubr.bf16.vlgmr.msra.gmra.mrb[4].mxu1 %v1530_v0 }
 0x3e1   : > { %v1293_v3 = vpop.f32.mrb[0].mxu0 }
 0x3e2   : > { %v1294_v4 = vadd.f32 %v1293_v3, %v1210_v1  ;;  %v2190_v35 = vpop.f32.mrb[1].mxu0 }
 0x3e3   : > { %v1296_v8 = vpop.f32.mrb[2].mxu0 }
 0x3e4   : > { %1299 = vst [vmem:[%s3112_s14] sm:$0x1] %v1294_v4  ;;  %v2191_v10 = vpop.f32.mrb[3].mxu0 }
 0x401   : > { %v1406_v5 = vpop.f32.mrb[0].mxu1  ;;  %v1519_v14 = vpop.f32.mrb[4].mxu0 }
 0x402   : > { %v1407_v6 = vadd.f32 %v1921_v2, %v1406_v5  ;;  %v2210_v7 = vpop.f32.mrb[1].mxu1  ;;  %v1520_v15 = vadd.f32 %v1931_v12, %v1519_v14  ;;  %v2230_v17 = vpop.f32.mrb[5].mxu0 }
 0x403   : > { %v1409_v9 = vpop.f32.mrb[2].mxu1  ;;  %v1522_v20 = vpop.f32.mrb[6].mxu0 }
 0x404   : > { %1412 = vst [vmem:[%s3112_s14 + $0x1] sm:$0x1] %v1407_v6  ;;  %v2211_v11 = vpop.f32.mrb[3].mxu1  ;;  %1525 = vst [vmem:[%s3112_s14 + $0x2] sm:$0x1] %v1520_v15  ;;  %v2231_v22 = vpop.f32.mrb[7].mxu0 }
 0x421   : > { %v1632_v16 = vpop.f32.mrb[4].mxu1 }
 0x422   : > { %v1633_v18 = vadd.f32 %v1941_v13, %v1632_v16  ;;  %v2250_v19 = vpop.f32.mrb[5].mxu1 }
 0x423   : > { %v1635_v21 = vpop.f32.mrb[6].mxu1 }
 0x424   : > { %1638 = vst [vmem:[%s3112_s14 + $0x3] sm:$0x1] %v1633_v18  ;;  %v2251_v23 = vpop.f32.mrb[7].mxu1 }
 0x425 PF: > { %s3415_s11 = sld [smem:[#allocation23_spill]]  ;;  %s3417_s19 = sld [smem:[#allocation29_spill]] }
 0x426   : > { %s3418_s30 = sld [smem:[#allocation33_spill]]  ;;  %s1653_s13 = sshll.u32 %s3112_s14, 4  ;;  %s1654_s13 = int_to_ptr.vmem [resolvable:$true] %s1653_s13 }
 0x427   : > { %s1640_s20 = scalar_lea.sflag [#allocation5], %s375_s6  ;;  %s2606_s3 = scalar_lea.vmem %s1654_s13, 64 }
 0x428   : > { %p2607_p10 = scmp.ne.s32.totalorder %s1654_s13, %s2606_s3  ;;  %s2784_s18 = smov [#allocation10]  }
 0x429   : > { %s2610_s27 = sshll.u32 %s2784_s18, 4  ;;  %s2611_s27 = int_to_ptr.vmem [resolvable:$false] %s2610_s27 }
 0x42a   : > { %s2612_s21 = scalar_lea.vmem %s2611_s27, 128  ;;  %p2613_p6 = scmp.lt.s32.totalorder %s1654_s13, %s2611_s27 }
 0x42b   : > { %s1951_s15 = sshll.u32 %s3415_s11, 6  ;;  %p3420_p1 = scmp.ne.s32.totalorder %s3417_s19, 0 }
 0x42c   : > { %s3419_s17 = smov %s3418_s30  ;;  %s3276_s23 = scalar_lea.hbm %s3418_s30, %s1951_s15 }
 0x42d   : > { %p2608_p3 = pnand %p2607_p10, %p3420_p1  ;;  %p2614_p2 = scmp.lt.s32.totalorder %s2612_s21, %s2606_s3 }
 0x42f   : > { %p2609_p8 = pneg %p2608_p3  ;;  %p2615_p12 = por %p2614_p2, %p2613_p6 }
 0x431   : > { %p2616_p7 = pnand %p2615_p12, %p2609_p8 }
 0x433   : > { %2619 = shalt.err (!%p2616_p7)
}
 0x434   : > { %s2620_s6 = scalar_lea.hbm %s3276_s23, 64  ;;  %s2624_s11 = scalar_lea.hbm %s3419_s17, 128 }
 0x435   : > { %p2621_p4 = scmp.ne.s32.totalorder %s3276_s23, %s2620_s6  ;;  %p2625_p9 = scmp.lt.u32.totalorder %s3276_s23, %s3419_s17 }
 0x436   : > { %p2626_p11 = scmp.lt.u32.totalorder %s2624_s11, %s2620_s6  ;;  %p2628_p10 = scmp.lt.u32.totalorder %s2620_s6, %s3276_s23 }
 0x437   : > { %p2622_p13 = pnand %p2621_p4, %p3420_p1 }
 0x438   : > { %p2627_p0 = por %p2626_p11, %p2625_p9 }
 0x439   : > { %p2623_p5 = pneg %p2622_p13 }
 0x43a   : > { %p2629_p3 = por %p2628_p10, %p2627_p0 }
 0x43c   : > { %p2630_p8 = pnand %p2629_p3, %p2623_p5 }
 0x43e   : > { %2633 = shalt.err (!%p2630_p8)
}
 0x43f   : > { %2271 = dma.vmem_to_hbm [thread:$0]  (%p3420_p1), %s1654_s13, 64, %s3276_s23, %s1640_s20  }
 0x440 PF: > { %s3421_s16 = sld [smem:[#allocation19_spill]]  ;;  %s3422_s24 = sld [smem:[#allocation30_spill]] }
 0x441   : > { %p2288_p6 = scmp.ge.s32.totalorder %s2764_s10, 2 }
 0x446   : > { %s1665_s30 = sand.u32 1, %s3421_s16   ;;  %p3423_p2 = scmp.ne.s32.totalorder %s3422_s24, 0 }
 0x447   : > { %s1666_s3 = scalar_lea.sflag [#allocation5], %s1665_s30 }
 0x448   : > { %p2281_p12 = pnand %p2288_p6, %p3423_p2 }
 0x44a   : > { %2707 = dma.done.wait (!%p2281_p12), %s1666_s3, 64  }
 0x44b   : > { %2709 = vsyncadd (!%p2281_p12), %s1666_s3, 4294967232  ;;  %s23_s10 = sadd.s32 1, %s2764_s10   ;;  %s3425_s21 = sld [smem:[#allocation20_spill]] }
 0x44c   : > { %p3303_p7 = scmp.ge.s32.totalorder %s23_s10, 6   ;;  %s3426_s22 = sld [smem:[#allocation21_spill]] }
 0x44d   : > { %s3427_s23 = sld [smem:[#allocation28_spill]]  ;;  %s3428_s19 = sld [smem:[#allocation26_spill]] }
 0x44e   : > { %s3429_s13 = sld [smem:[#allocation27_spill]]  ;;  %s3430_s20 = sld [smem:[#allocation24_spill]] }
 0x44f   : > { %s3431_s6 = sld [smem:[#allocation25_spill]]  ;;  %s3432_s24 = smov %s2728_s25 }
 0x450   : > { %s3433_s25 = smov %s2732_s26  ;;  %s3435_s27 = smov %s2740_s28 }
 0x451   : > { %s3436_s28 = smov %s2744_s29  ;;  %s3438_s30 = smov %s2756_s8 }
 0x452   : > { %s3439_s7 = smov %s2760_s9  ;;  %22 = sbr.rel (!%p3303_p7) target bundleno = 15 (0xf), region = 136 }
 0x453   : > { %s3434_s26 = smov %s3428_s19 }
 0x454   : > { %s3437_s29 = smov %s3429_s13  ;;  %s3440_s8 = smov %s3430_s20 }
 0x455   : > { %s3441_s9 = smov %s3431_s6 }
 0x459   :  { %1671 = vsyncpa [#allocation4], 1 }
 0x45a   :  { %1673 = vsyncpa [#allocation4 + $0x1], 1 }
 0x45b   :  { %1674 = vsyncpa [#allocation7], 1 }
 0x45c   :  { %1675 = vsyncpa [#allocation5], 1 }
 0x45d   :  { %1677 = vsyncpa [#allocation5 + $0x1], 1 }

// kernel: tpu_custom_call.1
= control target key start
LH: loop header
LB: loop body
LE: loop exit
PB: predicated region body
PF: predicated region fallthrough
CT: control target
= control target key end

     0   :  { %s3350_s0 = inlined_call_operand.hbm [shape: bf16[2,256,256], index: 0, kind: input, shape index: {}]   ;;  %s3351_s1 = inlined_call_operand.hbm [shape: bf16[256,128], index: 1, kind: input, shape index: {}]   ;;  %s3352_s2 = inlined_call_operand.hbm [shape: bf16[4,256,128], index: 2, kind: input, shape index: {}]   ;;  %s3353_s3 = inlined_call_operand.vmem [shape: f32[4,1,128], index: 3, kind: input, shape index: {}]   ;;  %s3354_s4 = inlined_call_operand.hbm [shape: bf16[4,128,128], index: 4, kind: input, shape index: {}]   ;;  %s3355_s5 = inlined_call_operand.vmem [shape: f32[4,1,128], index: 5, kind: input, shape index: {}]   ;;  %s3356_s6 = inlined_call_operand.hbm [shape: f32[2,4,128], index: 6, kind: output, shape index: {}]  }
   0x1   :  { %3376 = sst [smem:[#allocation31_spill]] %s3353_s3 }
   0x2   :  { %3377 = sst [smem:[#allocation32_spill]] %s3355_s5 }
   0x3   :  { %3378 = sst [smem:[#allocation33_spill]] %s3356_s6 }
   0x4   :  { %11 = vsyncpa [#allocation4], 0 }
   0x5   :  { %13 = vsyncpa [#allocation4 + $0x1], 0 }
   0x6   :  { %14 = vsyncpa [#allocation7], 0 }
   0x7   :  { %15 = vsyncpa [#allocation5], 0 }
   0x8   :  { %17 = vsyncpa [#allocation5 + $0x1], 0  ;;  %s2820_s21 = smov 0   ;;  %s2822_s22 = smov 0  }
   0x9   :  { %s2824_s23 = smov 0   ;;  %s2826_s24 = smov 0  }
   0xa   :  { %s2828_s25 = smov 0   ;;  %s2830_s26 = smov 0  }
   0xb   :  { %s2832_s27 = smov 0   ;;  %s2834_s28 = smov 0  }
   0xc   :  { %s2836_s29 = smov 0   ;;  %s2838_s30 = smov 0  }
   0xd   :  { %s2840_s7 = smov 0   ;;  %s2842_s8 = smov 0  }
   0xe   :  { %s2844_s9 = smov 0   ;;  %s2846_s10 = smov 0  }
   0xf LB: > { %3379 = sst [smem:[#allocation19_spill]] %s2712_s21  ;;  %s2889_s11 = sadd.s32 4294967295, %s2764_s10   ;;  %s2764_s10 = sphi %s2846_s10, %s23_s10   ;;  %s2760_s9 = sphi %s2844_s9, %s3441_s9   ;;  %s2756_s8 = sphi %s2842_s8, %s3440_s8   ;;  %s2752_s7 = sphi %s2840_s7, %s3439_s7   ;;  %s2748_s30 = sphi %s2838_s30, %s3438_s30   ;;  %s2744_s29 = sphi %s2836_s29, %s3437_s29   ;;  %s2740_s28 = sphi %s2834_s28, %s3436_s28   ;;  %s2736_s27 = sphi %s2832_s27, %s3435_s27   ;;  %s2732_s26 = sphi %s2830_s26, %s3434_s26   ;;  %s2728_s25 = sphi %s2828_s25, %s3433_s25   ;;  %s2724_s24 = sphi %s2826_s24, %s3432_s24   ;;  %s2720_s23 = sphi %s2824_s23, %s3427_s23   ;;  %s2716_s22 = sphi %s2822_s22, %s3426_s22   ;;  %s2712_s21 = sphi %s2820_s21, %s3425_s21  }
  0x10   : > { %3380 = sst [smem:[#allocation20_spill]] %s2716_s22  ;;  %s32_s13 = sadd.s32 1, %s2756_s8 }
  0x11   : > { %3381 = sst [smem:[#allocation21_spill]] %s2720_s23  ;;  %s35_s14 = sadd.s32 1, %s2760_s9 }
  0x12   : > { %3382 = sst [smem:[#allocation22_spill]] %s2748_s30  ;;  %p33_p0 = scmp.ge.s32.totalorder %s32_s13, 2 }
  0x13   : > { %3383 = sst [smem:[#allocation23_spill]] %s2752_s7  ;;  %s44_s15 = sadd.s32 1, %s2744_s29 }
  0x14   : > { %p51_p1 = scmp.ne.s32.totalorder %s2744_s29, %s2740_s28  ;;  %p52_p2 = scmp.eq.s32.totalorder %s2764_s10, 0 }
  0x15   : > { %s3443_s13 = smov (%p33_p0, %s32_s13), 0  ;;  %s3445_s14 = smov (!%p33_p0, %s35_s14), %s2760_s9 }
  0x16   : > { %3384 = sst [smem:[#allocation24_spill]] %s3443_s13  ;;  %s40_s16 = ssub.s32 %s2756_s8, %s3443_s13 }
  0x17   : > { %p2905_p3 = por %p52_p2, %p51_p1  ;;  %p37_p4 = scmp.ge.s32.totalorder %s3445_s14, 2 }
  0x18   : > { %p57_p5 = scmp.ne.s32.totalorder %s2740_s28, %s2736_s27  ;;  %p3359_p6 = scmp.eq.s32.totalorder %s2889_s11, 0 }
  0x19   : > { %s3385_s17 = scalar_select %p2905_p3, 1, 0 }
  0x1a   : > { %p89_p7 = scmp.eq.s32.totalorder %s40_s16, 0  ;;  %s3447_s14 = smov (%p37_p4, %s3445_s14), 0 }
  0x1b   : > { %3386 = sst [smem:[#allocation25_spill]] %s3447_s14  ;;  %p2915_p8 = por %p3359_p6, %p57_p5 }
  0x1c   : > { %s91_s19 = sadd.s32 1, %s2732_s26  ;;  %s39_s20 = ssub.s32 %s2760_s9, %s3447_s14 }
  0x1d   : > { %s3387_s18 = scalar_select %p2915_p8, 1, 0 }
  0x1e   : > { %p98_p9 = scmp.ne.s32.totalorder %s2732_s26, %s2728_s25  ;;  %s41_s27 = sor.u32 %s40_s16, %s39_s20 }
  0x1f   : > { %p104_p10 = scmp.ne.s32.totalorder %s2728_s25, %s2724_s24  ;;  %p42_p11 = scmp.eq.s32.totalorder %s41_s27, 0 }
  0x20   : > { %p2928_p12 = por %p98_p9, %p52_p2  ;;  %p178_p0 = scmp.eq.s32.totalorder %s39_s20, 0 }
  0x21   : > { %s2933_s13 = scalar_select %p89_p7, %s2732_s26, %s91_s19  }
  0x22   : > { %s3388_s12 = scalar_select %p2928_p12, 1, 0 }
  0x23   : > { %3389 = sst [smem:[#allocation26_spill]] %s2933_s13  ;;  %p2940_p13 = por %p104_p10, %p3359_p6 }
  0x24   : > { %s2936_s6 = scalar_select %p42_p11, %s2744_s29, %s44_s15  }
  0x25   : > { %s3391_s7 = scalar_select %p2940_p13, 1, 0 }
  0x26   : > { %3390 = sst [smem:[#allocation27_spill]] %s2936_s6  ;;  %s180_s16 = sadd.s32 1, %s2720_s23 }
  0x27   : > { %p190_p1 = scmp.ne.s32.totalorder %s2720_s23, %s2716_s22  ;;  %p191_p4 = scmp.eq.s32.totalorder %s2889_s11, 3 }
  0x28   : > { %s2948_s24 = scalar_select %p178_p0, %s2720_s23, %s180_s16  }
  0x29   : > { %p196_p2 = scmp.ne.s32.totalorder %s2716_s22, %s2712_s21  ;;  %s3393_s27 = sadd.s32 4294967294, %s2764_s10  }
  0x2a   : > { %3392 = sst [smem:[#allocation28_spill]] %s2948_s24  ;;  %p197_p5 = scmp.eq.s32.totalorder %s3393_s27, 3 }
  0x2b   : > { %p1778_p9 = scmp.ge.s32.totalorder %s2764_s10, 1  ;;  %p2956_p7 = por %p191_p4, %p190_p1 }
  0x2c   : > { %p204_p11 = scmp.lt.s32.totalorder %s2764_s10, 5  ;;  %p2961_p10 = por %p197_p5, %p196_p2 }
  0x2d   : > { %s3394_s19 = scalar_select %p2956_p7, 1, 0 }
  0x2e   : > { %s3396_s15 = scalar_select %p2961_p10, 1, 0 }
  0x2f   : > { %3395 = sst [smem:[#allocation29_spill]] %s3394_s19  ;;  %p2965_p6 = pnand %p1778_p9, %p204_p11 }
  0x30   : > { %3397 = sst [smem:[#allocation30_spill]] %s3396_s15  ;;  %s2766_s16 = smov [#allocation6]  }
  0x31   : > { %s3398_s20 = scalar_select %p2965_p6, 1, 0 }
  0x32   : > { %s216_s14 = sshll.u32 %s2766_s16, 4  ;;  %p2273_p0 = pneg %p2965_p6  ;;  %s217_s14 = int_to_ptr.vmem [resolvable:$true] %s216_s14 }
  0x33   : > { %p3399_p13 = scmp.eq.s32.totalorder %s2889_s11, 0  ;;  %s2767_s6 = smov [#allocation9]  }
  0x34   : > { %s232_s13 = sshll.u32 %s2767_s6, 4  ;;  %s2522_s15 = scalar_lea.hbm %s3351_s1, 2048  ;;  %s2977_s13 = int_to_ptr.vmem [resolvable:$true] %s232_s13 }
  0x35   : > { %p2973_p1 = pnand %p2273_p0, %p3399_p13  ;;  %p2523_p4 = scmp.ne.s32.totalorder %s3351_s1, %s2522_s15 }
  0x36   : > { %p2529_p9 = scmp.lt.u32.totalorder %s2522_s15, %s3351_s1 }
  0x37   : > { %p2524_p2 = pneg %p2973_p1 }
  0x39   : > { %p2525_p13 = pnand %p2524_p2, %p2523_p4 }
  0x3b   : > { %p2526_p5 = pneg %p2525_p13 }
  0x3d   : > { %p2531_p11 = pnand %p2529_p9, %p2526_p5 }
  0x3f   : > { %2534 = shalt.err (!%p2531_p11)
}
  0x40   : > { %s2535_s6 = scalar_lea.vmem %s217_s14, 2048  ;;  %p2543_p8 = scmp.lt.s32.totalorder %s217_s14, %s217_s14 }
  0x41   : > { %p2536_p0 = scmp.ne.s32.totalorder %s217_s14, %s2535_s6  ;;  %p2544_p6 = scmp.lt.s32.totalorder %s2535_s6, %s2535_s6 }
  0x43   : > { %p2538_p10 = pnand %p2536_p0, %p2524_p2  ;;  %p2545_p12 = por %p2544_p6, %p2543_p8 }
  0x45   : > { %p2539_p7 = pneg %p2538_p10 }
  0x47   : > { %p2546_p3 = pnand %p2545_p12, %p2539_p7 }
  0x49   : > { %2549 = shalt.err (!%p2546_p3)
}
  0x4a   : > { %s2768_s21 = smov 64   ;;  %s2769_s23 = smov 4  }
  0x4b   : > { %2276 = dma.hbm_to_vmem [thread:$0]  (!%p2973_p1), %s3351_s1, 2048, %s217_s14, [#allocation7], %s2768_s21, %s2768_s21, %s2769_s23  }
  0x4c   : > { %s2550_s16 = scalar_lea.hbm %s3354_s4, 4096 }
  0x4d   : > { %p2551_p10 = scmp.ne.s32.totalorder %s3354_s4, %s2550_s16  ;;  %p2557_p8 = scmp.lt.u32.totalorder %s2550_s16, %s3354_s4 }
  0x4f   : > { %p2553_p3 = pnand %p2551_p10, %p2524_p2 }
  0x51   : > { %p2554_p6 = pneg %p2553_p3 }
  0x53   : > { %p2559_p12 = pnand %p2557_p8, %p2554_p6 }
  0x55   : > { %2562 = shalt.err (!%p2559_p12)
}
  0x56   : > { %s2563_s14 = scalar_lea.vmem %s2977_s13, 4096  ;;  %p2571_p5 = scmp.lt.s32.totalorder %s2977_s13, %s2977_s13 }
  0x57   : > { %p2564_p7 = scmp.ne.s32.totalorder %s2977_s13, %s2563_s14  ;;  %p2572_p9 = scmp.lt.s32.totalorder %s2563_s14, %s2563_s14 }
  0x59   : > { %p2566_p4 = pnand %p2564_p7, %p2524_p2  ;;  %p2573_p11 = por %p2572_p9, %p2571_p5 }
  0x5b   : > { %p2567_p13 = pneg %p2566_p4 }
  0x5d   : > { %p2574_p0 = pnand %p2573_p11, %p2567_p13 }
  0x5f   : > { %2577 = shalt.err (!%p2574_p0)
}
  0x60   : > { %2279 = dma.hbm_to_vmem [thread:$0]  (!%p2973_p1), %s3354_s4, 4096, %s2977_s13, [#allocation7], %s2768_s21, %s2768_s21, %s2769_s23  }
  0x61   : > { %p1781_p10 = scmp.ge.s32.totalorder %s2764_s10, 4 }
  0x62   : > { %s249_s30 = sand.u32 (!%p1781_p10), 1, %s2764_s10   ;;  %s251_s5 = sand.u32 (!%p1781_p10), 1, %s2744_s29  }
  0x63   : > { %245 = sbr.rel (%p1781_p10) target bundleno = 141 (0x8d), region = 32  ;;  %s1782_s24 = sshll.u32 (!%p1781_p10), %s251_s5, 7 }
  0x64   : > { %s1954_s19 = sshll.u32 (!%p1781_p10), %s2756_s8, 5  ;;  %s1785_s15 = sshll.u32 (!%p1781_p10), %s2760_s9, 6 }
  0x65   : > { %s253_s16 = scalar_lea.vmem (!%p1781_p10), [#allocation3], %s1782_s24  ;;  %s260_s6 = sadd.s32 (!%p1781_p10), %s1954_s19, %s1785_s15 }
  0x66   : > { %s263_s27 = sshll.u32 (!%p1781_p10), %s253_s16, 4  ;;  %s1786_s14 = sshll.u32 (!%p1781_p10), %s260_s6, 6  ;;  %s3031_s27 = int_to_ptr.vmem [resolvable:$true] %s263_s27 }
  0x67   : > { %s3036_s23 = scalar_lea.hbm (!%p1781_p10), %s3350_s0, %s1786_s14  ;;  %s3038_s3 = scalar_lea.sflag (!%p1781_p10), [#allocation4], %s249_s30 }
  0x68   : > { %s2578_s22 = scalar_lea.hbm (!%p1781_p10), %s3036_s23, 2048  ;;  %p3401_p2 = scmp.ne.s32.totalorder (!%p1781_p10), %s3385_s17, 0 }
  0x69   : > { %p2579_p1 = scmp.ne.s32.totalorder (!%p1781_p10), %s3036_s23, %s2578_s22  ;;  %s2582_s19 = scalar_lea.hbm (!%p1781_p10), %s3350_s0, 8192 }
  0x6a   : > { %p2583_p8 = scmp.lt.u32.totalorder %s3036_s23, %s3350_s0  ;;  %p2584_p12 = scmp.lt.u32.totalorder %s2582_s19, %s2578_s22 }
  0x6b   : > { %p2580_p3 = pnand %p2579_p1, %p3401_p2  ;;  %p2586_p4 = scmp.lt.u32.totalorder %s2578_s22, %s3036_s23 }
  0x6c   : > { %p2585_p7 = por %p2584_p12, %p2583_p8 }
  0x6d   : > { %p2581_p6 = pneg %p2580_p3 }
  0x6e   : > { %p2587_p13 = por %p2586_p4, %p2585_p7 }
  0x70   : > { %p2588_p5 = pnand %p2587_p13, %p2581_p6 }
  0x72   : > { %2591 = shalt.err (!%p2588_p5)
}
  0x73   : > { %s2592_s30 = scalar_lea.vmem %s3031_s27, 2048  ;;  %s2770_s6 = smov [#allocation3]  }
  0x74   : > { %p2593_p9 = scmp.ne.s32.totalorder %s3031_s27, %s2592_s30  ;;  %s2596_s14 = sshll.u32 %s2770_s6, 4  ;;  %s2597_s14 = int_to_ptr.vmem [resolvable:$false] %s2596_s14 }
  0x75   : > { %s2598_s13 = scalar_lea.vmem %s2597_s14, 4096  ;;  %p2599_p10 = scmp.lt.s32.totalorder %s3031_s27, %s2597_s14 }
  0x76   : > { %p2594_p11 = pnand %p2593_p9, %p3401_p2  ;;  %p2600_p1 = scmp.lt.s32.totalorder %s2598_s13, %s2592_s30 }
  0x78   : > { %p2595_p0 = pneg %p2594_p11  ;;  %p2601_p3 = por %p2600_p1, %p2599_p10 }
  0x7a   : > { %p2602_p8 = pnand %p2601_p3, %p2595_p0 }
  0x7c   : > { %2605 = shalt.err (!%p2602_p8)
}
  0x7d   : > { %s2771_s21 = smov 128   ;;  %s2772_s22 = smov 8  }
  0x7e   : > { %2256 = dma.hbm_to_vmem [thread:$0]  (%p3401_p2), %s3036_s23, 2048, %s3031_s27, %s3038_s3, %s2771_s21, %s2771_s21, %s2772_s22  }
  0x7f   : > { %s275_s5 = sand.u32 1, %s2732_s26   ;;  %s1955_s19 = sshll.u32 %s2756_s8, 10 }
  0x80   : > { %s1787_s24 = sshll.u32 %s275_s5, 8  ;;  %p3402_p6 = scmp.ne.s32.totalorder %s3388_s12, 0 }
  0x81   : > { %s283_s6 = scalar_lea.hbm %s3352_s2, %s1955_s19  ;;  %s2773_s17 = smov 2048  }
  0x82   : > { %s2257_s15 = scalar_select %p3402_p6, [#allocation0], [#allocation13] }
  0x83   : > { %2258 = sst [smem:[#allocation12]] (%p3402_p6), %s2773_s17  ;;  %s277_s23 = scalar_lea.vmem [#allocation8], %s1787_s24 }
  0x84   : > { %s288_s27 = sld [smem:[%s2257_s15]]   ;;  %s296_s14 = sshll.u32 %s277_s23, 4  ;;  %s297_s14 = int_to_ptr.vmem [resolvable:$true] %s296_s14 }
  0x85   : > { %s2774_s13 = smov 1024   ;;  %s2775_s21 = smov 16  }
  0x86   : > { %2259 = sst [smem:[#allocation12 + $0x1]] (%p3402_p6), %s2774_s13  ;;  %s2776_s22 = smov 64  }
  0x87   : > { %2260 = sst [smem:[#allocation12 + $0x2]] (%p3402_p6), %s2775_s21  ;;  %s2777_s19 = smov 4  }
  0x88   : > { %2261 = sst [smem:[#allocation12 + $0x3]] (%p3402_p6), %s2776_s22  ;;  %s2778_s16 = smov [#allocation11]  }
  0x89   : > { %2262 = sst [smem:[#allocation12 + $0x4]] (%p3402_p6), %s2776_s22 }
  0x8a   : > { %s1790_s5 = sshll.u32 %s288_s27, 26  ;;  %2263 = sst [smem:[#allocation12 + $0x5]] (%p3402_p6), %s2777_s19 }
  0x8b   : > { %s1791_s15 = sadd.s32 134217728, %s1790_s5 }
  0x8c   : > { %2264 = dma.general (%p3402_p6), %s283_s6, 4096, %s297_s14, %s3038_s3, %s2778_s16, [#allocation12], %s1791_s15, 0  }
  0x8d PF: > { %p3403_p2 = scmp.ne.s32.totalorder %s3398_s20, 0 }
  0x8e   : > { %s323_s24 = sand.u32 (!%p3403_p2), 1, %s2889_s11   ;;  %s325_s30 = sand.u32 (!%p3403_p2), 1, %s2740_s28  }
  0x8f   : > { %321 = sbr.rel (%p3403_p2) target bundleno = 1088 (0x440), region = 44  ;;  %s1793_s17 = sshll.u32 (!%p3403_p2), %s325_s30, 7 }
  0x90   : > { %s324_s23 = scalar_lea.sflag (!%p3403_p2), [#allocation4], %s323_s24  ;;  %s3088_s13 = scalar_lea.vmem (!%p3403_p2), [#allocation3], %s1793_s17 }
  0x91   : > { %p3404_p12 = scmp.ne.s32.totalorder (!%p3403_p2), %s3387_s18, 0 }
  0x96   : > { %2691 = dma.done.wait (%p3404_p12), %s324_s23, 2048  }
  0x97   : > { %2693 = vsyncadd (%p3404_p12), %s324_s23, 4294965248  ;;  %p3405_p7 = scmp.eq.s32.totalorder %s2889_s11, 0 }
  0x99   : > { %2695 = dma.done.wait (%p3405_p7), [#allocation7], 2048   ;;  %p3406_p4 = pmov %p3405_p7 }
  0x9a   : > { %s338_s12 = sand.u32 1, %s2728_s25   ;;  %p3407_p13 = scmp.ne.s32.totalorder %s3391_s7, 0 }
  0x9b   : > { %2697 = vsyncadd (%p3406_p4), [#allocation7], 4294965248  ;;  %s1795_s20 = sshll.u32 %s338_s12, 8 }
  0x9c   : > { %s3099_s3 = scalar_lea.vmem [#allocation8], %s1795_s20 }
  0x9d   : > { %2699 = dma.done.wait (%p3407_p13), %s324_s23, 4096  }
  0x9e   : > { %2701 = vsyncadd (%p3407_p13), %s324_s23, 4294963200  ;;  %p3408_p5 = pmov %p3406_p4 }
  0x9f   : > { %p3409_p9 = pmov %p3406_p4 }
  0xa0   : > { %2703 = dma.done.wait (%p3408_p5), [#allocation7], 4096  }
  0xa1   : > { %2705 = vsyncadd (%p3409_p9), [#allocation7], 4294963200  ;;  %s3410_s18 = sld [smem:[#allocation20_spill]] }
  0xa2   : > { %s3411_s21 = sld [smem:[#allocation22_spill]] }
  0xa7   : > { %s375_s6 = sand.u32 1, %s3410_s18  }
  0xa8   : > { %s1797_s27 = sshll.u32 %s375_s6, 2  ;;  %p1798_p11 = scmp.ne.s32.totalorder %s3411_s21, 0 }
  0xa9   : > { %s3112_s14 = scalar_lea.vmem [#allocation10], %s1797_s27  ;;  %v2779_v0 = vmov (!%p1798_p11), 0.0  }
  0xaa   : > { %384 = sbr.rel (%p1798_p11) target bundleno = 177 (0xb1), region = 64  ;;  %385 = vst [vmem:[#allocation2] sm:$0x1] (!%p1798_p11), %v2779_v0  ;;  %386 = vst [vmem:[#allocation2 + $0x1] sm:$0x1] (!%p1798_p11), %v2779_v0 }
  0xab   : > { %387 = vst [vmem:[#allocation2 + $0x2] sm:$0x1] (!%p1798_p11), %v2779_v0  ;;  %388 = vst [vmem:[#allocation2 + $0x3] sm:$0x1] (!%p1798_p11), %v2779_v0 }
  0xb1 PF: > { %v2418_v1 = vld [vmem:[#allocation6 + $0x40] sm:$0xff]   ;;  %v2420_v3 = vld [vmem:[#allocation6 + $0x48] sm:$0xff]   ;;  %v2422_v5 = vld [vmem:[#allocation6 + $0x50] sm:$0xff]   ;;  %v2780_v35 = vmov 0.0   ;;  %vm2781_vm0 = vmmov 0   ;;  %s3412_s7 = sld [smem:[#allocation22_spill]] }
  0xb2   : > { %v2419_v2 = vld [vmem:[#allocation6] sm:$0xff]   ;;  %1956 = vmatprep.subr.bf16.mxu0 %v2418_v1  ;;  %v2421_v4 = vld [vmem:[#allocation6 + $0x8] sm:$0xff]   ;;  %v2423_v6 = vld [vmem:[#allocation6 + $0x10] sm:$0xff]   ;;  %2092 = vmatprep.subr.bf16.mxu1 %v2780_v35 }
  0xb3   : > { %1957 = vmatpush3.bf16.msra.mxu0 %v2419_v2  ;;  %v2424_v7 = vld [vmem:[#allocation6 + $0x58] sm:$0xff]   ;;  %v2426_v9 = vld [vmem:[#allocation6 + $0x60] sm:$0xff]   ;;  %v2428_v11 = vld [vmem:[#allocation6 + $0x68] sm:$0xff]   ;;  %2108 = vmatprep.mubr.msk.bf16.mxu1 %vm2781_vm0, %v2780_v35 }
  0xb4   : > { %1958 = vmatprep.subr.bf16.mxu0 %v2420_v3  ;;  %v2425_v8 = vld [vmem:[#allocation6 + $0x18] sm:$0xff]   ;;  %v2427_v10 = vld [vmem:[#allocation6 + $0x20] sm:$0xff]   ;;  %v2429_v13 = vld [vmem:[#allocation6 + $0x28] sm:$0xff]  }
  0xb5   : > { %v2436_v12 = vld [vmem:[%s3088_s13 + $0x4] ss:$8 sps:$4 sm:$0xff]   ;;  %v2430_v14 = vld [vmem:[#allocation6 + $0x70] sm:$0xff]   ;;  %v2432_v16 = vld [vmem:[#allocation6 + $0x78] sm:$0xff]  }
  0xb6   : > { %645 = vmatprep.mubr.bf16.mxu0 %v2436_v12  ;;  %v2431_v15 = vld [vmem:[#allocation6 + $0x30] sm:$0xff]   ;;  %v2433_v17 = vld [vmem:[#allocation6 + $0x38] sm:$0xff]   ;;  %v2434_v18 = vld [vmem:[%s3088_s13] ss:$8 sps:$4 sm:$0xff]  }
  0xb7   : > { %1959 = vmatpush3.bf16.msra.mxu0 %v2421_v4  ;;  %v2437_v19 = vld [vmem:[%s3088_s13 + $0x14] ss:$8 sps:$4 sm:$0xff]   ;;  %v2439_v20 = vld [vmem:[%s3088_s13 + $0x10] ss:$8 sps:$4 sm:$0xff]   ;;  %v2440_v21 = vld [vmem:[%s3088_s13 + $0x24] ss:$8 sps:$4 sm:$0xff]  }
  0xb8   : > { %1960 = vmatprep.subr.bf16.mxu0 %v2422_v5  ;;  %v2442_v22 = vld [vmem:[%s3088_s13 + $0x20] ss:$8 sps:$4 sm:$0xff]   ;;  %v2443_v23 = vld [vmem:[%s3088_s13 + $0x34] ss:$8 sps:$4 sm:$0xff]   ;;  %v2445_v24 = vld [vmem:[%s3088_s13 + $0x30] ss:$8 sps:$4 sm:$0xff]  }
  0xb9   : > { %v2446_v25 = vld [vmem:[%s3088_s13 + $0x44] ss:$8 sps:$4 sm:$0xff]   ;;  %v2448_v26 = vld [vmem:[%s3088_s13 + $0x40] ss:$8 sps:$4 sm:$0xff]   ;;  %v2449_v27 = vld [vmem:[%s3088_s13 + $0x54] ss:$8 sps:$4 sm:$0xff]  }
  0xba   : > { %v2451_v28 = vld [vmem:[%s3088_s13 + $0x50] ss:$8 sps:$4 sm:$0xff]   ;;  %v2452_v29 = vld [vmem:[%s3088_s13 + $0x64] ss:$8 sps:$4 sm:$0xff]   ;;  %v2454_v30 = vld [vmem:[%s3088_s13 + $0x60] ss:$8 sps:$4 sm:$0xff]  }
  0xbb   : > { %1961 = vmatpush3.bf16.msra.mxu0 %v2423_v6  ;;  %v2455_v31 = vld [vmem:[%s3088_s13 + $0x74] ss:$8 sps:$4 sm:$0xff]   ;;  %v2457_v32 = vld [vmem:[%s3088_s13 + $0x70] ss:$8 sps:$4 sm:$0xff]   ;;  %v2458_v33 = vld [vmem:[%s3099_s3] sm:$0xff]   ;;  %p1911_p0 = scmp.ne.s32.totalorder %s3412_s7, 1 }
  0xbc   : > { %1962 = vmatprep.subr.bf16.mxu0 %v2424_v7  ;;  %v2459_v34 = vld [vmem:[%s3099_s3 + $0x80] sm:$0xff]   ;;  %2093 = vmatpush3.bf16.msra.mxu1 %v2458_v33  ;;  %v2460_v36 = vld [vmem:[%s3099_s3 + $0x8] sm:$0xff]   ;;  %v2462_v38 = vld [vmem:[%s3099_s3 + $0x10] sm:$0xff]   ;;  %vm2783_vm1 = vmmov (!%p1911_p0), 0   ;;  %s3413_s5 = sld [smem:[#allocation31_spill]] (!%p1911_p0)  ;;  %s3414_s12 = sld [smem:[#allocation32_spill]] (!%p1911_p0) }
  0xbd   : > { %v2461_v37 = vld [vmem:[%s3099_s3 + $0x88] sm:$0xff]   ;;  %2094 = vmatprep.subr.bf16.mxu1 %v2780_v35  ;;  %v2463_v39 = vld [vmem:[%s3099_s3 + $0x90] sm:$0xff]   ;;  %v2464_v40 = vld [vmem:[%s3099_s3 + $0x18] sm:$0xff]  }
  0xbe   : > { %v2465_v41 = vld [vmem:[%s3099_s3 + $0x98] sm:$0xff]   ;;  %v2466_v42 = vld [vmem:[%s3099_s3 + $0x20] sm:$0xff]   ;;  %v2468_v44 = vld [vmem:[%s3099_s3 + $0x28] sm:$0xff]  }
  0xbf   : > { %1963 = vmatpush3.bf16.msra.mxu0 %v2425_v8  ;;  %v2467_v43 = vld [vmem:[%s3099_s3 + $0xa0] sm:$0xff]   ;;  %v2469_v45 = vld [vmem:[%s3099_s3 + $0xa8] sm:$0xff]   ;;  %v2470_v46 = vld [vmem:[%s3099_s3 + $0x30] sm:$0xff]  }
  0xc0   : > { %1964 = vmatprep.subr.bf16.mxu0 %v2426_v9  ;;  %2095 = vmatpush3.bf16.msra.mxu1 %v2460_v36  ;;  %v2471_v47 = vld [vmem:[%s3099_s3 + $0xb0] sm:$0xff]   ;;  %v2472_v48 = vld [vmem:[%s3099_s3 + $0x38] sm:$0xff]   ;;  %v2474_v36 = vld [vmem:[%s3099_s3 + $0x40] sm:$0xff]  }
  0xc1   : > { %2096 = vmatprep.subr.bf16.mxu1 %v2780_v35  ;;  %v2473_v55 = vld [vmem:[%s3099_s3 + $0xb8] sm:$0xff]  }
  0xc3   : > { %1965 = vmatpush3.bf16.msra.mxu0 %v2427_v10 }
  0xc4   : > { %1966 = vmatprep.subr.bf16.mxu0 %v2428_v11  ;;  %2097 = vmatpush3.bf16.msra.mxu1 %v2462_v38 }
  0xc5   : > { %2098 = vmatprep.subr.bf16.mxu1 %v2780_v35 }
  0xc7   : > { %1967 = vmatpush3.bf16.msra.mxu0 %v2429_v13 }
  0xc8   : > { %1968 = vmatprep.subr.bf16.mxu0 %v2430_v14  ;;  %2099 = vmatpush3.bf16.msra.mxu1 %v2464_v40  ;;  %v2476_v40 = vld [vmem:[%s3099_s3 + $0x50] sm:$0xff]  }
  0xc9   : > { %2100 = vmatprep.subr.bf16.mxu1 %v2780_v35 }
  0xcb   : > { %1969 = vmatpush3.bf16.msra.mxu0 %v2431_v15 }
  0xcc   : > { %1970 = vmatprep.subr.bf16.mxu0 %v2432_v16  ;;  %2101 = vmatpush3.bf16.msra.mxu1 %v2466_v42  ;;  %v2478_v42 = vld [vmem:[%s3099_s3 + $0x60] sm:$0xff]  }
  0xcd   : > { %2102 = vmatprep.subr.bf16.mxu1 %v2780_v35 }
  0xcf   : > { %1971 = vmatpush3.bf16.msra.mxu0 %v2433_v17 }
  0xd0   : > { %2132 = vmatprep.subr.bf16.mxu0 %v2780_v35  ;;  %2103 = vmatpush3.bf16.msra.mxu1 %v2468_v44  ;;  %v2480_v44 = vld [vmem:[%s3099_s3 + $0x70] sm:$0xff]  }
  0xd1   : > { %2104 = vmatprep.subr.bf16.mxu1 %v2780_v35 }
  0xd2   : > { %646 = vmatmul.mubr.bf16.vlgmr.msra.gmra.mrb[0].mxu0 %v2434_v18 }
  0xd3   : > { %653 = vmatprep.mubr.bf16.mxu0 %v2437_v19  ;;  %2133 = vmatpush3.bf16.msra.mxu0 %v2459_v34 }
  0xd4   : > { %2134 = vmatprep.subr.bf16.mxu0 %v2780_v35  ;;  %2105 = vmatpush3.bf16.msra.mxu1 %v2470_v46  ;;  %v2482_v46 = vld [vmem:[%s3099_s3 + $0xc0] sm:$0xff]  }
  0xd5   : > { %2106 = vmatprep.subr.bf16.mxu1 %v2780_v35 }
  0xd7   : > { %2135 = vmatpush3.bf16.msra.mxu0 %v2461_v37 }
  0xd8   : > { %2136 = vmatprep.subr.bf16.mxu0 %v2780_v35  ;;  %2107 = vmatpush3.bf16.msra.mxu1 %v2472_v48  ;;  %v2483_v48 = vld [vmem:[%s3099_s3 + $0xc8] sm:$0xff]  }
  0xd9   : > { %2112 = vmatprep.subr.bf16.mxu1 %v2780_v35 }
  0xda   : > { %654 = vmatmul.mubr.bf16.gmra.mrb[4].mxu0 %v2439_v20 }
  0xdb   : > { %661 = vmatprep.mubr.bf16.mxu0 %v2440_v21  ;;  %2137 = vmatpush3.bf16.msra.mxu0 %v2463_v39  ;;  %v2475_v39 = vld [vmem:[%s3099_s3 + $0x48] sm:$0xff]  }
  0xdc   : > { %2138 = vmatprep.subr.bf16.mxu0 %v2780_v35 }
  0xdf   : > { %2139 = vmatpush3.bf16.msra.mxu0 %v2465_v41  ;;  %v2477_v41 = vld [vmem:[%s3099_s3 + $0x58] sm:$0xff]  }
  0xe0   : > { %2140 = vmatprep.subr.bf16.mxu0 %v2780_v35 }
  0xe2   : > { %662 = vmatmul.mubr.bf16.gmra.mrb[8].mxu0 %v2442_v22 }
  0xe3   : > { %669 = vmatprep.mubr.bf16.mxu0 %v2443_v23  ;;  %2141 = vmatpush3.bf16.msra.mxu0 %v2467_v43  ;;  %v2479_v43 = vld [vmem:[%s3099_s3 + $0x68] sm:$0xff]  }
  0xe4   : > { %2142 = vmatprep.subr.bf16.mxu0 %v2780_v35 }
  0xe7   : > { %2143 = vmatpush3.bf16.msra.mxu0 %v2469_v45  ;;  %v2481_v45 = vld [vmem:[%s3099_s3 + $0x78] sm:$0xff]  }
  0xe8   : > { %2144 = vmatprep.subr.bf16.mxu0 %v2780_v35 }
  0xea   : > { %670 = vmatmul.mubr.bf16.gmra.mrb[12].mxu0 %v2445_v24 }
  0xeb   : > { %677 = vmatprep.mubr.bf16.mxu0 %v2446_v25  ;;  %2145 = vmatpush3.bf16.msra.mxu0 %v2471_v47 }
  0xec   : > { %2146 = vmatprep.subr.bf16.mxu0 %v2780_v35 }
  0xef   : > { %2147 = vmatpush3.bf16.msra.mxu0 %v2473_v55 }
  0xf2   : > { %678 = vmatmul.mubr.bf16.gmra.mrb[16].mxu0 %v2448_v26 }
  0xf3   : > { %685 = vmatprep.mubr.bf16.mxu0 %v2449_v27 }
  0xfa   : > { %686 = vmatmul.mubr.bf16.gmra.mrb[20].mxu0 %v2451_v28 }
  0xfb   : > { %693 = vmatprep.mubr.bf16.mxu0 %v2452_v29 }
 0x102   : > { %694 = vmatmul.mubr.bf16.gmra.mrb[24].mxu0 %v2454_v30 }
 0x103   : > { %701 = vmatprep.mubr.bf16.mxu0 %v2455_v31 }
 0x10a   : > { %702 = vmatmul.mubr.bf16.gmra.mrb[28].mxu0 %v2457_v32 }
 0x10b   : > { %2148 = vmatprep.mubr.msk.bf16.mxu0 %vm2781_vm0, %v2780_v35 }
 0x1a5   : > { %v1972_v49 = vpop.f32.mrb[0].mxu0 }
 0x1a6   : > { %v1973_v50 = vpop.f32.mrb[1].mxu0 }
 0x1a7   : > { %v1975_v51 = vpop.f32.mrb[2].mxu0  ;;  %v1974_v52 = vadd.f32 %v1973_v50, %v1972_v49  ;;  %v2484_v49 = vld [vmem:[%s3099_s3 + $0xd0] sm:$0xff]   ;;  %v2485_v50 = vld [vmem:[%s3099_s3 + $0xd8] sm:$0xff]  }
 0x1a8   : > { %v1976_v53 = vpop.f32.mrb[3].mxu0 }
 0x1a9   : > { %v1977_v54 = vadd.f32 %v1976_v53, %v1975_v51  ;;  %710 = vxpose.xlu0.b32.start [1/16] (narrow) %v1974_v52, 8  ;;  %v2486_v51 = vld [vmem:[%s3099_s3 + $0xe0] sm:$0xff]   ;;  %v2487_v52 = vld [vmem:[%s3099_s3 + $0xe8] sm:$0xff]   ;;  %v2488_v53 = vld [vmem:[%s3099_s3 + $0xf0] sm:$0xff]  }
 0x1ad   : > { %v1978_v56 = vpop.f32.mrb[4].mxu0  ;;  %711 = vxpose.xlu0.b32.cont [2/16] (narrow) %v1977_v54, 8  ;;  %v2489_v54 = vld [vmem:[%s3099_s3 + $0xf8] sm:$0xff]  }
 0x1ae   : > { %v1979_v57 = vpop.f32.mrb[5].mxu0 }
 0x1af   : > { %v1980_v58 = vadd.f32 %v1979_v57, %v1978_v56  ;;  %v1981_v59 = vpop.f32.mrb[6].mxu0  ;;  %v743_v56 = vld [vmem:[#allocation2] sm:$0x1] }
 0x1b0   : > { %v1982_v60 = vpop.f32.mrb[7].mxu0 }
 0x1b1   : > { %v1983_v61 = vadd.f32 %v1982_v60, %v1981_v59  ;;  %712 = vxpose.xlu0.b32.cont [3/16] (narrow) %v1980_v58, 8  ;;  %v964_v58 = vld [vmem:[#allocation2 + $0x2] sm:$0x1] }
 0x1b5   : > { %v1984_v62 = vpop.f32.mrb[8].mxu0  ;;  %713 = vxpose.xlu0.b32.cont [4/16] (narrow) %v1983_v61, 8 }
 0x1b6   : > { %v1985_v63 = vpop.f32.mrb[9].mxu0 }
 0x1b7   : > { %v1986_v0 = vadd.f32 %v1985_v63, %v1984_v62  ;;  %v1987_v1 = vpop.f32.mrb[10].mxu0 }
 0x1b8   : > { %v1988_v2 = vpop.f32.mrb[11].mxu0 }
 0x1b9   : > { %v1989_v3 = vadd.f32 %v1988_v2, %v1987_v1  ;;  %714 = vxpose.xlu0.b32.cont [5/16] (narrow) %v1986_v0, 8 }
 0x1bd   : > { %v1990_v4 = vpop.f32.mrb[12].mxu0  ;;  %715 = vxpose.xlu0.b32.cont [6/16] (narrow) %v1989_v3, 8 }
 0x1be   : > { %v1991_v5 = vpop.f32.mrb[13].mxu0 }
 0x1bf   : > { %v1992_v6 = vadd.f32 %v1991_v5, %v1990_v4  ;;  %v1993_v7 = vpop.f32.mrb[14].mxu0  ;;  %v851_v4 = vld [vmem:[#allocation2 + $0x1] sm:$0x1] }
 0x1c0   : > { %v1994_v8 = vpop.f32.mrb[15].mxu0 }
 0x1c1   : > { %v1995_v9 = vadd.f32 %v1994_v8, %v1993_v7  ;;  %716 = vxpose.xlu0.b32.cont [7/16] (narrow) %v1992_v6, 8 }
 0x1c5   : > { %v1996_v10 = vpop.f32.mrb[16].mxu0  ;;  %717 = vxpose.xlu0.b32.cont [8/16] (narrow) %v1995_v9, 8  ;;  %v1076_v9 = vld [vmem:[#allocation2 + $0x3] sm:$0x1] }
 0x1c6   : > { %v1997_v11 = vpop.f32.mrb[17].mxu0 }
 0x1c7   : > { %v1998_v12 = vadd.f32 %v1997_v11, %v1996_v10  ;;  %v1999_v13 = vpop.f32.mrb[18].mxu0 }
 0x1c8   : > { %v2000_v14 = vpop.f32.mrb[19].mxu0 }
 0x1c9   : > { %v2001_v15 = vadd.f32 %v2000_v14, %v1999_v13  ;;  %718 = vxpose.xlu0.b32.cont [9/16] (narrow) %v1998_v12, 8 }
 0x1cd   : > { %v2002_v16 = vpop.f32.mrb[20].mxu0  ;;  %719 = vxpose.xlu0.b32.cont [10/16] (narrow) %v2001_v15, 8  ;;  %v2490_v15 = vld [vmem:[#allocation9] sm:$0xff] (!%p1911_p0)  }
 0x1ce   : > { %v2003_v17 = vpop.f32.mrb[21].mxu0 }
 0x1cf   : > { %v2004_v18 = vadd.f32 %v2003_v17, %v2002_v16  ;;  %v2005_v19 = vpop.f32.mrb[22].mxu0  ;;  %v2782_v16 = vmov (!%p1911_p0), 0.0   ;;  %v2491_v17 = vld [vmem:[#allocation9 + $0x40] sm:$0xff] (!%p1911_p0)  }
 0x1d0   : > { %v2006_v20 = vpop.f32.mrb[23].mxu0  ;;  %2172 = vmatprep.subr.bf16.mxu0 (!%p1911_p0), %v2782_v16 }
 0x1d1   : > { %v2007_v21 = vadd.f32 %v2006_v20, %v2005_v19  ;;  %720 = vxpose.xlu0.b32.cont [11/16] (narrow) %v2004_v18, 8  ;;  %v2492_v18 = vld [vmem:[#allocation9 + $0x8] sm:$0xff] (!%p1911_p0)   ;;  %v2494_v20 = vld [vmem:[#allocation9 + $0x10] sm:$0xff] (!%p1911_p0)  }
 0x1d2   : > { %v2493_v19 = vld [vmem:[#allocation9 + $0x48] sm:$0xff] (!%p1911_p0)  }
 0x1d5   : > { %v2008_v22 = vpop.f32.mrb[24].mxu0  ;;  %721 = vxpose.xlu0.b32.cont [12/16] (narrow) %v2007_v21, 8  ;;  %v2495_v21 = vld [vmem:[#allocation9 + $0x50] sm:$0xff] (!%p1911_p0)  }
 0x1d6   : > { %v2009_v23 = vpop.f32.mrb[25].mxu0 }
 0x1d7   : > { %v2010_v24 = vadd.f32 %v2009_v23, %v2008_v22  ;;  %v2011_v25 = vpop.f32.mrb[26].mxu0  ;;  %v2496_v22 = vld [vmem:[#allocation9 + $0x18] sm:$0xff] (!%p1911_p0)  }
 0x1d8   : > { %v2012_v26 = vpop.f32.mrb[27].mxu0  ;;  %v2497_v23 = vld [vmem:[#allocation9 + $0x58] sm:$0xff] (!%p1911_p0)  }
 0x1d9   : > { %v2013_v27 = vadd.f32 %v2012_v26, %v2011_v25  ;;  %722 = vxpose.xlu0.b32.cont [13/16] (narrow) %v2010_v24, 8  ;;  %v2498_v24 = vld [vmem:[#allocation9 + $0x20] sm:$0xff] (!%p1911_p0)   ;;  %v2500_v26 = vld [vmem:[#allocation9 + $0x28] sm:$0xff] (!%p1911_p0)  }
 0x1da   : > { %v2499_v25 = vld [vmem:[#allocation9 + $0x60] sm:$0xff] (!%p1911_p0)  }
 0x1dd   : > { %v2014_v28 = vpop.f32.mrb[28].mxu0  ;;  %723 = vxpose.xlu0.b32.cont [14/16] (narrow) %v2013_v27, 8  ;;  %v2501_v27 = vld [vmem:[#allocation9 + $0x68] sm:$0xff] (!%p1911_p0)  }
 0x1de   : > { %v2015_v29 = vpop.f32.mrb[29].mxu0 }
 0x1df   : > { %v2016_v30 = vadd.f32 %v2015_v29, %v2014_v28  ;;  %v2017_v31 = vpop.f32.mrb[30].mxu0  ;;  %v2502_v28 = vld [vmem:[#allocation9 + $0x30] sm:$0xff] (!%p1911_p0)  }
 0x1e0   : > { %v2018_v32 = vpop.f32.mrb[31].mxu0 }
 0x1e1   : > { %v2019_v33 = vadd.f32 %v2018_v32, %v2017_v31  ;;  %724 = vxpose.xlu0.b32.cont [15/16] (narrow) %v2016_v30, 8  ;;  %v2503_v30 = vld [vmem:[#allocation9 + $0x70] sm:$0xff] (!%p1911_p0)   ;;  %v1191_v31 = vld [vmem:[%s3413_s5] sm:$0x1] (!%p1911_p0) }
 0x1e5   : > { %725 = vxpose.xlu0.b32.end [16/16] (narrow) %v2019_v33, 8  ;;  %v1920_v33 = vld [vmem:[%s3413_s5 + $0x1] sm:$0x1] (!%p1911_p0) }
 0x229   : > { %v726_v34 = vpop.trf.xlu0 }
 0x22a   : > { %v742_v37 = vpack.c.bf16 %v726_v34, %v726_v34 }
 0x22c   : > { %v983_v38 = vrot.slane %v742_v37, 1  ;;  %2109 = vmatmul.mubr.bf16.vlgmr.msra.gmra.mrb[0].mxu1 %v742_v37  ;;  %v870_v47 = vshrl.u32 %v742_v37, 16 }
 0x22d   : > { %2113 = vmatpush3.bf16.msra.mxu1 %v2474_v36  ;;  %2128 = vmatprep.mubr.msk.bf16.mxu1 %vm2781_vm0, %v2780_v35  ;;  %v2504_v36 = vld [vmem:[#allocation9 + $0x38] sm:$0xff] (!%p1911_p0)  }
 0x22e   : > { %2149 = vmatmul.mubr.bf16.vlgmr.msra.gmra.mrb[32].mxu0 %v983_v38  ;;  %2114 = vmatprep.subr.bf16.mxu1 %v2780_v35  ;;  %v1094_v55 = vrot.slane %v870_v47, 1  ;;  %v2505_v38 = vld [vmem:[#allocation9 + $0x78] sm:$0xff] (!%p1911_p0)  }
 0x22f   : > { %2173 = vmatpush3.bf16.msra.mxu0 (!%p1911_p0), %v2490_v15  ;;  %2188 = vmatprep.mubr.msk.bf16.mxu0 (!%p1911_p0), %vm2783_vm1, %v2782_v16 }
 0x230   : > { %2174 = vmatprep.subr.bf16.mxu0 (!%p1911_p0), %v2782_v16 }
 0x231   : > { %2115 = vmatpush3.bf16.msra.mxu1 %v2475_v39 }
 0x232   : > { %2116 = vmatprep.subr.bf16.mxu1 %v2780_v35 }
 0x233   : > { %2175 = vmatpush3.bf16.msra.mxu0 (!%p1911_p0), %v2492_v18 }
 0x234   : > { %2176 = vmatprep.subr.bf16.mxu0 (!%p1911_p0), %v2782_v16 }
 0x235   : > { %2117 = vmatpush3.bf16.msra.mxu1 %v2476_v40 }
 0x236   : > { %2118 = vmatprep.subr.bf16.mxu1 %v2780_v35 }
 0x237   : > { %2177 = vmatpush3.bf16.msra.mxu0 (!%p1911_p0), %v2494_v20 }
 0x238   : > { %2178 = vmatprep.subr.bf16.mxu0 (!%p1911_p0), %v2782_v16 }
 0x239   : > { %2119 = vmatpush3.bf16.msra.mxu1 %v2477_v41  ;;  %v2506_v41 = vld [vmem:[#allocation9 + $0x80] sm:$0xff] (!%p1911_p0)  }
 0x23a   : > { %2120 = vmatprep.subr.bf16.mxu1 %v2780_v35 }
 0x23b   : > { %2179 = vmatpush3.bf16.msra.mxu0 (!%p1911_p0), %v2496_v22 }
 0x23c   : > { %2180 = vmatprep.subr.bf16.mxu0 (!%p1911_p0), %v2782_v16 }
 0x23d   : > { %2121 = vmatpush3.bf16.msra.mxu1 %v2478_v42  ;;  %v2507_v42 = vld [vmem:[#allocation9 + $0xc0] sm:$0xff] (!%p1911_p0)  }
 0x23e   : > { %2122 = vmatprep.subr.bf16.mxu1 %v2780_v35 }
 0x23f   : > { %2181 = vmatpush3.bf16.msra.mxu0 (!%p1911_p0), %v2498_v24 }
 0x240   : > { %2182 = vmatprep.subr.bf16.mxu0 (!%p1911_p0), %v2782_v16 }
 0x241   : > { %2123 = vmatpush3.bf16.msra.mxu1 %v2479_v43  ;;  %v2508_v43 = vld [vmem:[#allocation9 + $0x88] sm:$0xff] (!%p1911_p0)  }
 0x242   : > { %2124 = vmatprep.subr.bf16.mxu1 %v2780_v35 }
 0x243   : > { %2183 = vmatpush3.bf16.msra.mxu0 (!%p1911_p0), %v2500_v26 }
 0x244   : > { %2184 = vmatprep.subr.bf16.mxu0 (!%p1911_p0), %v2782_v16 }
 0x245   : > { %2125 = vmatpush3.bf16.msra.mxu1 %v2480_v44  ;;  %v2509_v44 = vld [vmem:[#allocation9 + $0xc8] sm:$0xff] (!%p1911_p0)  }
 0x246   : > { %2126 = vmatprep.subr.bf16.mxu1 %v2780_v35 }
 0x247   : > { %2185 = vmatpush3.bf16.msra.mxu0 (!%p1911_p0), %v2502_v28 }
 0x248   : > { %2186 = vmatprep.subr.bf16.mxu0 (!%p1911_p0), %v2782_v16 }
 0x249   : > { %2127 = vmatpush3.bf16.msra.mxu1 %v2481_v45  ;;  %v2510_v45 = vld [vmem:[#allocation9 + $0x90] sm:$0xff] (!%p1911_p0)  }
 0x24a   : > { %2152 = vmatprep.subr.bf16.mxu1 %v2780_v35 }
 0x24b   : > { %2187 = vmatpush3.bf16.msra.mxu0 (!%p1911_p0), %v2504_v36 }
 0x24c   : > { %2129 = vmatmul.mubr.bf16.vlgmr.msra.gmra.mrb[4].mxu1 %v870_v47  ;;  %2212 = vmatprep.subr.bf16.mxu0 (!%p1911_p0), %v2782_v16  ;;  %v2512_v47 = vld [vmem:[#allocation9 + $0x98] sm:$0xff] (!%p1911_p0)  }
 0x24d   : > { %2153 = vmatpush3.bf16.msra.mxu1 %v2482_v46  ;;  %2168 = vmatprep.mubr.msk.bf16.mxu1 %vm2781_vm0, %v2780_v35  ;;  %v2511_v46 = vld [vmem:[#allocation9 + $0xd0] sm:$0xff] (!%p1911_p0)  }
 0x24e   : > { %2154 = vmatprep.subr.bf16.mxu1 %v2780_v35 }
 0x251   : > { %2155 = vmatpush3.bf16.msra.mxu1 %v2483_v48  ;;  %v2513_v48 = vld [vmem:[#allocation9 + $0xd8] sm:$0xff] (!%p1911_p0)  }
 0x252   : > { %2156 = vmatprep.subr.bf16.mxu1 %v2780_v35 }
 0x255   : > { %2157 = vmatpush3.bf16.msra.mxu1 %v2484_v49  ;;  %v2514_v49 = vld [vmem:[#allocation9 + $0xa0] sm:$0xff] (!%p1911_p0)  }
 0x256   : > { %2158 = vmatprep.subr.bf16.mxu1 %v2780_v35 }
 0x259   : > { %2159 = vmatpush3.bf16.msra.mxu1 %v2485_v50  ;;  %v2515_v50 = vld [vmem:[#allocation9 + $0xe0] sm:$0xff] (!%p1911_p0)  }
 0x25a   : > { %2160 = vmatprep.subr.bf16.mxu1 %v2780_v35 }
 0x25d   : > { %2161 = vmatpush3.bf16.msra.mxu1 %v2486_v51  ;;  %v2516_v51 = vld [vmem:[#allocation9 + $0xa8] sm:$0xff] (!%p1911_p0)  }
 0x25e   : > { %2162 = vmatprep.subr.bf16.mxu1 %v2780_v35 }
 0x261   : > { %2163 = vmatpush3.bf16.msra.mxu1 %v2487_v52  ;;  %v2517_v52 = vld [vmem:[#allocation9 + $0xe8] sm:$0xff] (!%p1911_p0)  }
 0x262   : > { %2164 = vmatprep.subr.bf16.mxu1 %v2780_v35 }
 0x265   : > { %2165 = vmatpush3.bf16.msra.mxu1 %v2488_v53  ;;  %v2518_v53 = vld [vmem:[#allocation9 + $0xb0] sm:$0xff] (!%p1911_p0)  }
 0x266   : > { %2166 = vmatprep.subr.bf16.mxu1 %v2780_v35 }
 0x269   : > { %2167 = vmatpush3.bf16.msra.mxu1 %v2489_v54 }
 0x26a   : > { %2192 = vmatprep.subr.bf16.mxu1 (!%p1911_p0), %v2782_v16 }
 0x26c   : > { %2169 = vmatmul.mubr.bf16.vlgmr.msra.gmra.mrb[8].mxu1 %v1094_v55  ;;  %v1930_v55 = vld [vmem:[%s3413_s5 + $0x2] sm:$0x1] (!%p1911_p0) }
 0x26d   : > { %2193 = vmatpush3.bf16.msra.mxu1 (!%p1911_p0), %v2491_v17  ;;  %2208 = vmatprep.mubr.msk.bf16.mxu1 (!%p1911_p0), %vm2783_vm1, %v2782_v16 }
 0x26e   : > { %2194 = vmatprep.subr.bf16.mxu1 (!%p1911_p0), %v2782_v16 }
 0x271   : > { %2195 = vmatpush3.bf16.msra.mxu1 (!%p1911_p0), %v2493_v19 }
 0x272   : > { %2196 = vmatprep.subr.bf16.mxu1 (!%p1911_p0), %v2782_v16 }
 0x275   : > { %2197 = vmatpush3.bf16.msra.mxu1 (!%p1911_p0), %v2495_v21 }
 0x276   : > { %2198 = vmatprep.subr.bf16.mxu1 (!%p1911_p0), %v2782_v16 }
 0x279   : > { %2199 = vmatpush3.bf16.msra.mxu1 (!%p1911_p0), %v2497_v23 }
 0x27a   : > { %2200 = vmatprep.subr.bf16.mxu1 (!%p1911_p0), %v2782_v16 }
 0x27d   : > { %2201 = vmatpush3.bf16.msra.mxu1 (!%p1911_p0), %v2499_v25 }
 0x27e   : > { %2202 = vmatprep.subr.bf16.mxu1 (!%p1911_p0), %v2782_v16 }
 0x281   : > { %2203 = vmatpush3.bf16.msra.mxu1 (!%p1911_p0), %v2501_v27 }
 0x282   : > { %2204 = vmatprep.subr.bf16.mxu1 (!%p1911_p0), %v2782_v16 }
 0x285   : > { %2205 = vmatpush3.bf16.msra.mxu1 (!%p1911_p0), %v2503_v30 }
 0x286   : > { %2206 = vmatprep.subr.bf16.mxu1 (!%p1911_p0), %v2782_v16 }
 0x289   : > { %2207 = vmatpush3.bf16.msra.mxu1 (!%p1911_p0), %v2505_v38 }
 0x28a   : > { %2232 = vmatprep.subr.bf16.mxu1 (!%p1911_p0), %v2782_v16 }
 0x2ff   : > { %v842_v57 = vpop.f32.mrb[0].mxu1 }
 0x300   : > { %v848_v59 = vadd.f32 %v842_v57, %v743_v56  ;;  %v2110_v60 = vpop.f32.mrb[1].mxu1  ;;  %v2519_v56 = vld [vmem:[#allocation9 + $0xf0] sm:$0xff] (!%p1911_p0)  }
 0x301   : > { %v845_v61 = vpop.f32.mrb[2].mxu1  ;;  %v1067_v62 = vpop.f32.mrb[32].mxu0  ;;  %v2520_v60 = vld [vmem:[#allocation9 + $0xb8] sm:$0xff] (!%p1911_p0)  }
 0x302   : > { %849 = vst [vmem:[#allocation2] sm:$0x1] %v848_v59  ;;  %v1073_v63 = vadd.f32 %v1067_v62, %v964_v58  ;;  %v2111_v0 = vpop.f32.mrb[3].mxu1  ;;  %v2150_v1 = vpop.f32.mrb[33].mxu0  ;;  %v1940_v58 = vld [vmem:[%s3413_s5 + $0x3] sm:$0x1] (!%p1911_p0) }
 0x303   : > { %v1070_v2 = vpop.f32.mrb[34].mxu0  ;;  %v2521_v62 = vld [vmem:[#allocation9 + $0xf8] sm:$0xff] (!%p1911_p0)  }
 0x304   : > { %1074 = vst [vmem:[#allocation2 + $0x2] sm:$0x1] %v1073_v63  ;;  %v2151_v3 = vpop.f32.mrb[35].mxu0  ;;  %v1210_v1 = vld [vmem:[%s3414_s12] sm:$0x1] (!%p1911_p0) }
 0x305   : > { %v1921_v2 = vld [vmem:[%s3414_s12 + $0x1] sm:$0x1] (!%p1911_p0) }
 0x309   : > { %v1190_v29 = vld [vmem:[#allocation2] sm:$0x1] (!%p1911_p0) }
 0x30a   : > { %v1192_v34 = vadd.f32 (!%p1911_p0), %v1191_v31, %v1190_v29 }
 0x30b   : > { %v1413_v54 = vld [vmem:[#allocation2 + $0x2] sm:$0x1] (!%p1911_p0) }
 0x30c   : > { %v1193_v39 = vpack.c.bf16 (!%p1911_p0), %v1192_v34, %v1192_v34  ;;  %v1416_v59 = vadd.f32 (!%p1911_p0), %v1930_v55, %v1413_v54 }
 0x30e   : > { %2189 = vmatmul.mubr.bf16.vlgmr.msra.gmra.mrb[0].mxu0 (!%p1911_p0), %v1193_v39  ;;  %v1417_v63 = vpack.c.bf16 (!%p1911_p0), %v1416_v59, %v1416_v59 }
 0x30f   : > { %2213 = vmatpush3.bf16.msra.mxu0 (!%p1911_p0), %v2506_v41  ;;  %2228 = vmatprep.mubr.msk.bf16.mxu0 (!%p1911_p0), %vm2783_vm1, %v2782_v16 }
 0x310   : > { %2214 = vmatprep.subr.bf16.mxu0 (!%p1911_p0), %v2782_v16 }
 0x313   : > { %2215 = vmatpush3.bf16.msra.mxu0 (!%p1911_p0), %v2508_v43 }
 0x314   : > { %2216 = vmatprep.subr.bf16.mxu0 (!%p1911_p0), %v2782_v16 }
 0x317   : > { %2217 = vmatpush3.bf16.msra.mxu0 (!%p1911_p0), %v2510_v45 }
 0x318   : > { %2218 = vmatprep.subr.bf16.mxu0 (!%p1911_p0), %v2782_v16 }
 0x31b   : > { %2219 = vmatpush3.bf16.msra.mxu0 (!%p1911_p0), %v2512_v47 }
 0x31c   : > { %2220 = vmatprep.subr.bf16.mxu0 (!%p1911_p0), %v2782_v16 }
 0x31f   : > { %v955_v5 = vpop.f32.mrb[4].mxu1  ;;  %2221 = vmatpush3.bf16.msra.mxu0 (!%p1911_p0), %v2514_v49 }
 0x320   : > { %v961_v35 = vadd.f32 %v955_v5, %v851_v4  ;;  %v2130_v6 = vpop.f32.mrb[5].mxu1  ;;  %2222 = vmatprep.subr.bf16.mxu0 (!%p1911_p0), %v2782_v16 }
 0x321   : > { %v958_v7 = vpop.f32.mrb[6].mxu1 }
 0x322   : > { %962 = vst [vmem:[#allocation2 + $0x1] sm:$0x1] %v961_v35  ;;  %v2131_v8 = vpop.f32.mrb[7].mxu1 }
 0x323   : > { %2223 = vmatpush3.bf16.msra.mxu0 (!%p1911_p0), %v2516_v51 }
 0x324   : > { %2224 = vmatprep.subr.bf16.mxu0 (!%p1911_p0), %v2782_v16 }
 0x327   : > { %2225 = vmatpush3.bf16.msra.mxu0 (!%p1911_p0), %v2518_v53 }
 0x328   : > { %2226 = vmatprep.subr.bf16.mxu0 (!%p1911_p0), %v2782_v16 }
 0x329   : > { %v1300_v32 = vld [vmem:[#allocation2 + $0x1] sm:$0x1] (!%p1911_p0) }
 0x32a   : > { %v1303_v37 = vadd.f32 (!%p1911_p0), %v1920_v33, %v1300_v32 }
 0x32b   : > { %2227 = vmatpush3.bf16.msra.mxu0 (!%p1911_p0), %v2520_v60 }
 0x32c   : > { %v1304_v40 = vpack.c.bf16 (!%p1911_p0), %v1303_v37, %v1303_v37 }
 0x32e   : > { %2209 = vmatmul.mubr.bf16.vlgmr.msra.gmra.mrb[0].mxu1 (!%p1911_p0), %v1304_v40  ;;  %2229 = vmatmul.mubr.bf16.vlgmr.msra.gmra.mrb[4].mxu0 (!%p1911_p0), %v1417_v63 }
 0x32f   : > { %2233 = vmatpush3.bf16.msra.mxu1 (!%p1911_p0), %v2507_v42  ;;  %2248 = vmatprep.mubr.msk.bf16.mxu1 (!%p1911_p0), %vm2783_vm1, %v2782_v16 }
 0x330   : > { %2234 = vmatprep.subr.bf16.mxu1 (!%p1911_p0), %v2782_v16 }
 0x333   : > { %2235 = vmatpush3.bf16.msra.mxu1 (!%p1911_p0), %v2509_v44 }
 0x334   : > { %2236 = vmatprep.subr.bf16.mxu1 (!%p1911_p0), %v2782_v16 }
 0x337   : > { %2237 = vmatpush3.bf16.msra.mxu1 (!%p1911_p0), %v2511_v46 }
 0x338   : > { %2238 = vmatprep.subr.bf16.mxu1 (!%p1911_p0), %v2782_v16 }
 0x33b   : > { %2239 = vmatpush3.bf16.msra.mxu1 (!%p1911_p0), %v2513_v48 }
 0x33c   : > { %1189 = sbr.rel (%p1911_p0) target bundleno = 1061 (0x425), region = 68  ;;  %2240 = vmatprep.subr.bf16.mxu1 (!%p1911_p0), %v2782_v16 }
 0x33f   : > { %v1178_v10 = vpop.f32.mrb[8].mxu1  ;;  %2241 = vmatpush3.bf16.msra.mxu1 (!%p1911_p0), %v2515_v50 }
 0x340   : > { %v1184_v11 = vadd.f32 %v1178_v10, %v1076_v9  ;;  %v2170_v12 = vpop.f32.mrb[9].mxu1  ;;  %2242 = vmatprep.subr.bf16.mxu1 (!%p1911_p0), %v2782_v16 }
 0x341   : > { %v1181_v13 = vpop.f32.mrb[10].mxu1  ;;  %v1931_v12 = vld [vmem:[%s3414_s12 + $0x2] sm:$0x1] (!%p1911_p0) }
 0x342   : > { %1185 = vst [vmem:[#allocation2 + $0x3] sm:$0x1] %v1184_v11  ;;  %v2171_v14 = vpop.f32.mrb[11].mxu1  ;;  %v1941_v13 = vld [vmem:[%s3414_s12 + $0x3] sm:$0x1] (!%p1911_p0) }
 0x343   : > { %2243 = vmatpush3.bf16.msra.mxu1 %v2517_v52 }
 0x344   : > { %2244 = vmatprep.subr.bf16.mxu1 %v2782_v16 }
 0x347   : > { %2245 = vmatpush3.bf16.msra.mxu1 %v2519_v56 }
 0x348   : > { %2246 = vmatprep.subr.bf16.mxu1 %v2782_v16 }
 0x349   : > { %v1526_v57 = vld [vmem:[#allocation2 + $0x3] sm:$0x1] }
 0x34a   : > { %v1529_v61 = vadd.f32 %v1940_v58, %v1526_v57 }
 0x34b   : > { %2247 = vmatpush3.bf16.msra.mxu1 %v2521_v62 }
 0x34c   : > { %v1530_v0 = vpack.c.bf16 %v1529_v61, %v1529_v61 }
 0x34e   : > { %2249 = vmatmul.mubr.bf16.vlgmr.msra.gmra.mrb[4].mxu1 %v1530_v0 }
 0x3e1   : > { %v1293_v3 = vpop.f32.mrb[0].mxu0 }
 0x3e2   : > { %v1294_v4 = vadd.f32 %v1293_v3, %v1210_v1  ;;  %v2190_v35 = vpop.f32.mrb[1].mxu0 }
 0x3e3   : > { %v1296_v8 = vpop.f32.mrb[2].mxu0 }
 0x3e4   : > { %1299 = vst [vmem:[%s3112_s14] sm:$0x1] %v1294_v4  ;;  %v2191_v10 = vpop.f32.mrb[3].mxu0 }
 0x401   : > { %v1406_v5 = vpop.f32.mrb[0].mxu1  ;;  %v1519_v14 = vpop.f32.mrb[4].mxu0 }
 0x402   : > { %v1407_v6 = vadd.f32 %v1921_v2, %v1406_v5  ;;  %v2210_v7 = vpop.f32.mrb[1].mxu1  ;;  %v1520_v15 = vadd.f32 %v1931_v12, %v1519_v14  ;;  %v2230_v17 = vpop.f32.mrb[5].mxu0 }
 0x403   : > { %v1409_v9 = vpop.f32.mrb[2].mxu1  ;;  %v1522_v20 = vpop.f32.mrb[6].mxu0 }
 0x404   : > { %1412 = vst [vmem:[%s3112_s14 + $0x1] sm:$0x1] %v1407_v6  ;;  %v2211_v11 = vpop.f32.mrb[3].mxu1  ;;  %1525 = vst [vmem:[%s3112_s14 + $0x2] sm:$0x1] %v1520_v15  ;;  %v2231_v22 = vpop.f32.mrb[7].mxu0 }
 0x421   : > { %v1632_v16 = vpop.f32.mrb[4].mxu1 }
 0x422   : > { %v1633_v18 = vadd.f32 %v1941_v13, %v1632_v16  ;;  %v2250_v19 = vpop.f32.mrb[5].mxu1 }
 0x423   : > { %v1635_v21 = vpop.f32.mrb[6].mxu1 }
 0x424   : > { %1638 = vst [vmem:[%s3112_s14 + $0x3] sm:$0x1] %v1633_v18  ;;  %v2251_v23 = vpop.f32.mrb[7].mxu1 }
 0x425 PF: > { %s3415_s11 = sld [smem:[#allocation23_spill]]  ;;  %s3417_s19 = sld [smem:[#allocation29_spill]] }
 0x426   : > { %s3418_s30 = sld [smem:[#allocation33_spill]]  ;;  %s1653_s13 = sshll.u32 %s3112_s14, 4  ;;  %s1654_s13 = int_to_ptr.vmem [resolvable:$true] %s1653_s13 }
 0x427   : > { %s1640_s20 = scalar_lea.sflag [#allocation5], %s375_s6  ;;  %s2606_s3 = scalar_lea.vmem %s1654_s13, 64 }
 0x428   : > { %p2607_p10 = scmp.ne.s32.totalorder %s1654_s13, %s2606_s3  ;;  %s2784_s18 = smov [#allocation10]  }
 0x429   : > { %s2610_s27 = sshll.u32 %s2784_s18, 4  ;;  %s2611_s27 = int_to_ptr.vmem [resolvable:$false] %s2610_s27 }
 0x42a   : > { %s2612_s21 = scalar_lea.vmem %s2611_s27, 128  ;;  %p2613_p6 = scmp.lt.s32.totalorder %s1654_s13, %s2611_s27 }
 0x42b   : > { %s1951_s15 = sshll.u32 %s3415_s11, 6  ;;  %p3420_p1 = scmp.ne.s32.totalorder %s3417_s19, 0 }
 0x42c   : > { %s3419_s17 = smov %s3418_s30  ;;  %s3276_s23 = scalar_lea.hbm %s3418_s30, %s1951_s15 }
 0x42d   : > { %p2608_p3 = pnand %p2607_p10, %p3420_p1  ;;  %p2614_p2 = scmp.lt.s32.totalorder %s2612_s21, %s2606_s3 }
 0x42f   : > { %p2609_p8 = pneg %p2608_p3  ;;  %p2615_p12 = por %p2614_p2, %p2613_p6 }
 0x431   : > { %p2616_p7 = pnand %p2615_p12, %p2609_p8 }
 0x433   : > { %2619 = shalt.err (!%p2616_p7)
}
 0x434   : > { %s2620_s6 = scalar_lea.hbm %s3276_s23, 64  ;;  %s2624_s11 = scalar_lea.hbm %s3419_s17, 128 }
 0x435   : > { %p2621_p4 = scmp.ne.s32.totalorder %s3276_s23, %s2620_s6  ;;  %p2625_p9 = scmp.lt.u32.totalorder %s3276_s23, %s3419_s17 }
 0x436   : > { %p2626_p11 = scmp.lt.u32.totalorder %s2624_s11, %s2620_s6  ;;  %p2628_p10 = scmp.lt.u32.totalorder %s2620_s6, %s3276_s23 }
 0x437   : > { %p2622_p13 = pnand %p2621_p4, %p3420_p1 }
 0x438   : > { %p2627_p0 = por %p2626_p11, %p2625_p9 }
 0x439   : > { %p2623_p5 = pneg %p2622_p13 }
 0x43a   : > { %p2629_p3 = por %p2628_p10, %p2627_p0 }
 0x43c   : > { %p2630_p8 = pnand %p2629_p3, %p2623_p5 }
 0x43e   : > { %2633 = shalt.err (!%p2630_p8)
}
 0x43f   : > { %2271 = dma.vmem_to_hbm [thread:$0]  (%p3420_p1), %s1654_s13, 64, %s3276_s23, %s1640_s20  }
 0x440 PF: > { %s3421_s16 = sld [smem:[#allocation19_spill]]  ;;  %s3422_s24 = sld [smem:[#allocation30_spill]] }
 0x441   : > { %p2288_p6 = scmp.ge.s32.totalorder %s2764_s10, 2 }
 0x446   : > { %s1665_s30 = sand.u32 1, %s3421_s16   ;;  %p3423_p2 = scmp.ne.s32.totalorder %s3422_s24, 0 }
 0x447   : > { %s1666_s3 = scalar_lea.sflag [#allocation5], %s1665_s30 }
 0x448   : > { %p2281_p12 = pnand %p2288_p6, %p3423_p2 }
 0x44a   : > { %2707 = dma.done.wait (!%p2281_p12), %s1666_s3, 64  }
 0x44b   : > { %2709 = vsyncadd (!%p2281_p12), %s1666_s3, 4294967232  ;;  %s23_s10 = sadd.s32 1, %s2764_s10   ;;  %s3425_s21 = sld [smem:[#allocation20_spill]] }
 0x44c   : > { %p3303_p7 = scmp.ge.s32.totalorder %s23_s10, 6   ;;  %s3426_s22 = sld [smem:[#allocation21_spill]] }
 0x44d   : > { %s3427_s23 = sld [smem:[#allocation28_spill]]  ;;  %s3428_s19 = sld [smem:[#allocation26_spill]] }
 0x44e   : > { %s3429_s13 = sld [smem:[#allocation27_spill]]  ;;  %s3430_s20 = sld [smem:[#allocation24_spill]] }
 0x44f   : > { %s3431_s6 = sld [smem:[#allocation25_spill]]  ;;  %s3432_s24 = smov %s2728_s25 }
 0x450   : > { %s3433_s25 = smov %s2732_s26  ;;  %s3435_s27 = smov %s2740_s28 }
 0x451   : > { %s3436_s28 = smov %s2744_s29  ;;  %s3438_s30 = smov %s2756_s8 }
 0x452   : > { %s3439_s7 = smov %s2760_s9  ;;  %22 = sbr.rel (!%p3303_p7) target bundleno = 15 (0xf), region = 136 }
 0x453   : > { %s3434_s26 = smov %s3428_s19 }
 0x454   : > { %s3437_s29 = smov %s3429_s13  ;;  %s3440_s8 = smov %s3430_s20 }
 0x455   : > { %s3441_s9 = smov %s3431_s6 }
 0x459   :  { %1671 = vsyncpa [#allocation4], 1 }
 0x45a   :  { %1673 = vsyncpa [#allocation4 + $0x1], 1 }
 0x45b   :  { %1674 = vsyncpa [#allocation7], 1 }
 0x45c   :  { %1675 = vsyncpa [#allocation5], 1 }
 0x45d   :  { %1677 = vsyncpa [#allocation5 + $0x1], 1 }

</bundles_post_ra>
